<compile_context>
chip_gen: v7x
topology: tpu7x:2x2x1
jax: 0.10.0
libtpu: 0.0.40
codegen_flags: <defaults>
</compile_context>

<pallas_src>
import functools

import jax
import jax.numpy as jnp
from jax import lax
from jax.experimental import pallas as pl
from jax.experimental.pallas import tpu as pltpu

BN_EPS = 1e-5  # MyBatchNorm default epsilon


# ----------------------------- Pallas kernels ------------------------------

def _conv_pool_kernel(p00_ref, p01_ref, p10_ref, p11_ref, w_ref, b_ref, o_ref):
    """Fused conv-as-matmul + bias + ReLU + 2x2 max-pool.

    p??_ref: (RB, K) bf16 im2col rows for one corner of each pooling window.
    w_ref:   (K, Cout) bf16.   b_ref: (1, Cout) f32.   o_ref: (RB, Cout) f32.
    max_i relu(patch_i @ W + b) == relu+pool of the conv output (pointwise ops).
    """
    w = w_ref[...]
    b = b_ref[...]

    def corner(p_ref):
        y = jnp.dot(p_ref[...], w, preferred_element_type=jnp.float32)
        return jnp.maximum(y + b, 0.0)

    o_ref[...] = jnp.maximum(jnp.maximum(corner(p00_ref), corner(p01_ref)),
                             jnp.maximum(corner(p10_ref), corner(p11_ref)))


def _fc_bn_kernel(x_ref, w1_ref, b1_ref, g_ref, beta_ref,
                  w2_ref, b2_ref, w3_ref, b3_ref, o_ref, *, batch):
    """Fused fc1 -> MyBatchNorm -> relu-fc2 -> fc3 over the whole batch."""
    h = jnp.dot(x_ref[...], w1_ref[...],
                preferred_element_type=jnp.float32) + b1_ref[...]
    h = jnp.maximum(h, 0.0)

    # MyBatchNorm: torch.var_mean(x, axis=0) -> unbiased variance (correction=1)
    mean = jnp.mean(h, axis=0, keepdims=True)
    d = h - mean
    denom = float(max(batch - 1, 1))
    var = jnp.sum(d * d, axis=0, keepdims=True) * (1.0 / denom)
    h = g_ref[...] * (d * lax.rsqrt(var + BN_EPS)) + beta_ref[...]

    h = jnp.maximum(
        jnp.dot(h, w2_ref[...], preferred_element_type=jnp.float32) + b2_ref[...],
        0.0)
    o_ref[...] = (jnp.dot(h, w3_ref[...], preferred_element_type=jnp.float32)
                  + b3_ref[...])


# ------------------------------ Kernel wrappers -----------------------------

def _pick_block_rows(total_rows, target=512):
    """Largest divisor of total_rows that is <= target and a multiple of 8
    (so the BlockSpec satisfies the (8,128) rule); fall back to one block."""
    if total_rows <= target:
        return total_rows
    for cand in range(target, 7, -1):
        if total_rows % cand == 0 and cand % 8 == 0:
            return cand
    return total_rows


def conv5x5_relu_pool(x_nhwc, w_mat, bias_row, *, block_rows=512):
    """VALID 5x5 conv + bias + ReLU + 2x2/2 max-pool, pool fused in the kernel.

    x_nhwc:  (B, H, W, Cin) bf16.
    w_mat:   (Cin*25, Cout) bf16, rows ordered (cin, ky, kx) = PyTorch flatten.
    bias_row:(1, Cout) f32.
    Returns ((B*Hp*Wp, Cout) f32 with rows in (b, h, w) order, Hp, Wp).
    """
    B, H, W, _ = x_nhwc.shape
    K, cout = w_mat.shape
    ho, wo = H - 4, W - 4

    # One fused XLA op; feature ordering is (cin, ky, kx) -> matches w_mat rows.
    patches = lax.conv_general_dilated_patches(
        x_nhwc, filter_shape=(5, 5), window_strides=(1, 1), padding="VALID",
        dimension_numbers=("NHWC", "HWIO", "NHWC"))        # (B, ho, wo, Cin*25)

    # Floor-mode pooling (F.max_pool2d): drop odd trailing row/col if any.
    hp, wp = ho // 2, wo // 2
    patches = patches[:, :2 * hp, :2 * wp, :]

    # The four corners of every 2x2 pooling window, rows in (b, hp, wp) order.
    corners = [patches[:, dy::2, dx::2, :].reshape(B * hp * wp, K)
               for dy in (0, 1) for dx in (0, 1)]

    rows = B * hp * wp
    rb = _pick_block_rows(rows, block_rows)
    grid = (rows // rb,)
    row_spec = pl.BlockSpec((rb, K), lambda i: (i, 0))

    out = pl.pallas_call(
        _conv_pool_kernel,
        out_shape=jax.ShapeDtypeStruct((rows, cout), jnp.float32),
        grid=grid,
        in_specs=[row_spec, row_spec, row_spec, row_spec,
                  pl.BlockSpec((K, cout), lambda i: (0, 0)),     # weights resident
                  pl.BlockSpec((1, cout), lambda i: (0, 0))],    # bias resident
        out_specs=pl.BlockSpec((rb, cout), lambda i: (i, 0)),
        compiler_params=pltpu.CompilerParams(
            dimension_semantics=("parallel",),
            vmem_limit_bytes=32 * 1024 * 1024),
    )(*corners, w_mat, bias_row)
    return out, hp, wp


def fc_bn_stack(feat, p):
    """Single Pallas call: fc1 + BatchNorm + fc2 + fc3 (whole batch in VMEM)."""
    B = feat.shape[0]
    kernel = functools.partial(_fc_bn_kernel, batch=B)
    vspec = pl.BlockSpec(memory_space=pltpu.MemorySpace.VMEM)
    return pl.pallas_call(
        kernel,
        out_shape=jax.ShapeDtypeStruct((B, p["fc3_w"].shape[1]), jnp.float32),
        in_specs=[vspec] * 9,
        out_specs=vspec,
    )(feat, p["fc1_w"], p["fc1_b"], p["gamma"], p["beta"],
      p["fc2_w"], p["fc2_b"], p["fc3_w"], p["fc3_b"])


# ------------------------------ Params / forward ----------------------------

def init_params(key):
    """Deterministic params with the exact shapes of CNN_3.__init__."""
    def uniform(k, shape, fan_in):
        bound = float(fan_in) ** -0.5
        return jax.random.uniform(k, shape, jnp.float32, -bound, bound)

    ks = jax.random.split(key, 10)
    return {
        "conv1_w": uniform(ks[0], (6, 3, 5, 5), 3 * 25),
        "conv1_b": uniform(ks[1], (6,), 3 * 25),
        "conv2_w": uniform(ks[2], (16, 6, 5, 5), 6 * 25),
        "conv2_b": uniform(ks[3], (16,), 6 * 25),
        "fc1_w": uniform(ks[4], (120, 400), 400),   # PyTorch Linear: (out, in)
        "fc1_b": uniform(ks[5], (120,), 400),
        "fc2_w": uniform(ks[6], (84, 120), 120),
        "fc2_b": uniform(ks[7], (84,), 120),
        "fc3_w": uniform(ks[8], (10, 84), 84),
        "fc3_b": uniform(ks[9], (10,), 84),
        "gamma": jnp.ones((120,), jnp.float32),     # MyBatchNorm(120)
        "beta": jnp.zeros((120,), jnp.float32),
    }


def prepare_params(params):
    """One-time weight re-layout for the kernels (outside the hot path)."""
    def conv_mat(w):  # (Cout, Cin, 5, 5) -> (Cin*25, Cout), PyTorch flatten order
        return w.reshape(w.shape[0], -1).T.astype(jnp.bfloat16)

    # Fold torch's (C, H, W) flatten order into fc1's columns: the kernel
    # features are flattened in (H, W, C) order -> permute fc1 columns to match.
    fc1 = params["fc1_w"].reshape(120, 16, 5, 5)          # cols indexed (c, h, w)
    fc1 = fc1.transpose(0, 2, 3, 1).reshape(120, 400)     # cols indexed (h, w, c)

    row = lambda v: v.reshape(1, -1).astype(jnp.float32)
    return {
        "conv1_w": conv_mat(params["conv1_w"]), "conv1_b": row(params["conv1_b"]),
        "conv2_w": conv_mat(params["conv2_w"]), "conv2_b": row(params["conv2_b"]),
        "fc1_w": fc1.T.astype(jnp.float32),               # (400, 120)
        "fc1_b": row(params["fc1_b"]),
        "gamma": row(params["gamma"]), "beta": row(params["beta"]),
        "fc2_w": params["fc2_w"].T.astype(jnp.float32),   # (120, 84)
        "fc2_b": row(params["fc2_b"]),
        "fc3_w": params["fc3_w"].T.astype(jnp.float32),   # (84, 10)
        "fc3_b": row(params["fc3_b"]),
    }


def cnn3_forward(x_nchw, p):
    B = x_nchw.shape[0]
    c1 = p["conv1_b"].shape[1]
    c2 = p["conv2_b"].shape[1]

    # NCHW (PyTorch) -> NHWC; bf16 operands for the conv matmuls (f32 accum).
    x = jnp.transpose(x_nchw, (0, 2, 3, 1)).astype(jnp.bfloat16)

    y, hp1, wp1 = conv5x5_relu_pool(x, p["conv1_w"], p["conv1_b"])   # (B*14*14, 6)
    y = y.reshape(B, hp1, wp1, c1).astype(jnp.bfloat16)              # (B,14,14,6)

    y, hp2, wp2 = conv5x5_relu_pool(y, p["conv2_w"], p["conv2_b"])   # (B*5*5, 16)
    # Rows are (b, h, w) with channels last -> (B, 400) in (h, w, c) order; the
    # torch (c, h, w) flatten permutation was folded into fc1_w at prep time.
    feat = y.reshape(B, hp2 * wp2 * c2)

    return fc_bn_stack(feat, p)                                      # (B, 10)


# ------------------------------ Pure-JAX reference --------------------------

def reference_forward(x_nchw, params):
    """Mirror of the PyTorch forward (bf16 conv operands matched to the kernel)."""
    def conv_relu_pool(x, w, b):
        y = lax.conv_general_dilated(
            x.astype(jnp.bfloat16), w.astype(jnp.bfloat16), (1, 1), "VALID",
            dimension_numbers=("NCHW", "OIHW", "NCHW"),
            preferred_element_type=jnp.float32)
        y = jnp.maximum(y + b[None, :, None, None], 0.0)
        return lax.reduce_window(y, -jnp.inf, lax.max,
                                 (1, 1, 2, 2), (1, 1, 2, 2), "VALID")

    y = conv_relu_pool(x_nchw, params["conv1_w"], params["conv1_b"])
    y = conv_relu_pool(y, params["conv2_w"], params["conv2_b"])
    feat = y.reshape(y.shape[0], -1)                      # torch (C,H,W) flatten

    hp = lax.Precision.HIGHEST
    h = jnp.maximum(jnp.dot(feat, params["fc1_w"].T, precision=hp)
                    + params["fc1_b"], 0.0)
    mean = jnp.mean(h, axis=0)
    var = jnp.var(h, axis=0, ddof=1)                      # torch.var_mean: unbiased
    h = params["gamma"] * (h - mean) / jnp.sqrt(var + BN_EPS) + params["beta"]
    h = jnp.maximum(jnp.dot(h, params["fc2_w"].T, precision=hp)
                    + params["fc2_b"], 0.0)
    return jnp.dot(h, params["fc3_w"].T, precision=hp) + params["fc3_b"]


# ---------------------------------- Main -------------------------------------

if __name__ == "__main__":
    key = jax.random.PRNGKey(0)
    k_params, k_x = jax.random.split(key)

    params = init_params(k_params)
    kparams = prepare_params(params)          # one-time weight re-layout

    # CNN_3 implies 3x32x32 inputs so that flatten == 16*5*5 == 400.
    x = jax.random.normal(k_x, (4, 3, 32, 32), dtype=jnp.float32)

    fwd = jax.jit(cnn3_forward)
    out = jax.block_until_ready(fwd(x, kparams))

    assert out.shape == (4, 10), out.shape
    assert bool(jnp.all(jnp.isfinite(out)))

    ref = jax.block_until_ready(jax.jit(reference_forward)(x, params))
    max_err = float(jnp.max(jnp.abs(out - ref)))
    assert jnp.allclose(out, ref, atol=2e-2, rtol=2e-2), max_err

    print("KERNEL_OK")
</pallas_src>

<mosaic_0001>
module attributes {stable_mosaic.version = 11 : i64} {
  func.func @_conv_pool_kernel(%arg0: i32, %arg1: memref<392x75xbf16, #tpu.memory_space<vmem>>, %arg2: memref<392x75xbf16, #tpu.memory_space<vmem>>, %arg3: memref<392x75xbf16, #tpu.memory_space<vmem>>, %arg4: memref<392x75xbf16, #tpu.memory_space<vmem>>, %arg5: memref<75x6xbf16, #tpu.memory_space<vmem>>, %arg6: memref<1x6xf32, #tpu.memory_space<vmem>>, %arg7: memref<392x6xf32, #tpu.memory_space<vmem>>) attributes {dimension_semantics = [#tpu.dimension_semantics<parallel>], iteration_bounds = array<i64: 2>, scalar_prefetch = 0 : i64, scratch_operands = 0 : i64, tpu.core_type = #tpu.core_type<tc>, window_params = [{transform_indices = @transform_0, window_bounds = array<i64: 392, 75>}, {transform_indices = @transform_1, window_bounds = array<i64: 392, 75>}, {transform_indices = @transform_2, window_bounds = array<i64: 392, 75>}, {transform_indices = @transform_3, window_bounds = array<i64: 392, 75>}, {pipeline_mode = #tpu.pipeline_mode<synchronous>, transform_indices = @transform_4, window_bounds = array<i64: 75, 6>}, {pipeline_mode = #tpu.pipeline_mode<synchronous>, transform_indices = @transform_5, window_bounds = array<i64: 1, 6>}, {transform_indices = @transform_6, window_bounds = array<i64: 392, 6>}]} {
    %c0 = arith.constant 0 : index
    %c0_0 = arith.constant 0 : index
    %0 = vector.load %arg5[%c0, %c0_0] : memref<75x6xbf16, #tpu.memory_space<vmem>>, vector<75x6xbf16>
    %c0_1 = arith.constant 0 : index
    %c0_2 = arith.constant 0 : index
    %1 = vector.load %arg6[%c0_1, %c0_2] : memref<1x6xf32, #tpu.memory_space<vmem>>, vector<1x6xf32>
    %c0_3 = arith.constant 0 : index
    %c0_4 = arith.constant 0 : index
    %2 = vector.load %arg1[%c0_3, %c0_4] : memref<392x75xbf16, #tpu.memory_space<vmem>>, vector<392x75xbf16>
    %cst = arith.constant dense<0.000000e+00> : vector<392x6xf32>
    %3 = tpu.matmul %2, %0, %cst {dimension_numbers = #tpu.dot_dimension_numbers<[1], [0], [0], [1], [0, 0, 1, 1], [], []>} : vector<392x75xbf16>, vector<75x6xbf16>, vector<392x6xf32> -> vector<392x6xf32>
    %4 = vector.broadcast %1 : vector<1x6xf32> to vector<392x6xf32>
    %5 = arith.addf %3, %4 : vector<392x6xf32>
    %cst_5 = arith.constant 0.000000e+00 : f32
    %6 = vector.broadcast %cst_5 : f32 to vector<392x6xf32>
    %7 = arith.maximumf %5, %6 : vector<392x6xf32>
    %c0_6 = arith.constant 0 : index
    %c0_7 = arith.constant 0 : index
    %8 = vector.load %arg2[%c0_6, %c0_7] : memref<392x75xbf16, #tpu.memory_space<vmem>>, vector<392x75xbf16>
    %cst_8 = arith.constant dense<0.000000e+00> : vector<392x6xf32>
    %9 = tpu.matmul %8, %0, %cst_8 {dimension_numbers = #tpu.dot_dimension_numbers<[1], [0], [0], [1], [0, 0, 1, 1], [], []>} : vector<392x75xbf16>, vector<75x6xbf16>, vector<392x6xf32> -> vector<392x6xf32>
    %10 = vector.broadcast %1 : vector<1x6xf32> to vector<392x6xf32>
    %11 = arith.addf %9, %10 : vector<392x6xf32>
    %cst_9 = arith.constant 0.000000e+00 : f32
    %12 = vector.broadcast %cst_9 : f32 to vector<392x6xf32>
    %13 = arith.maximumf %11, %12 : vector<392x6xf32>
    %14 = arith.maximumf %7, %13 : vector<392x6xf32>
    %c0_10 = arith.constant 0 : index
    %c0_11 = arith.constant 0 : index
    %15 = vector.load %arg3[%c0_10, %c0_11] : memref<392x75xbf16, #tpu.memory_space<vmem>>, vector<392x75xbf16>
    %cst_12 = arith.constant dense<0.000000e+00> : vector<392x6xf32>
    %16 = tpu.matmul %15, %0, %cst_12 {dimension_numbers = #tpu.dot_dimension_numbers<[1], [0], [0], [1], [0, 0, 1, 1], [], []>} : vector<392x75xbf16>, vector<75x6xbf16>, vector<392x6xf32> -> vector<392x6xf32>
    %17 = vector.broadcast %1 : vector<1x6xf32> to vector<392x6xf32>
    %18 = arith.addf %16, %17 : vector<392x6xf32>
    %cst_13 = arith.constant 0.000000e+00 : f32
    %19 = vector.broadcast %cst_13 : f32 to vector<392x6xf32>
    %20 = arith.maximumf %18, %19 : vector<392x6xf32>
    %c0_14 = arith.constant 0 : index
    %c0_15 = arith.constant 0 : index
    %21 = vector.load %arg4[%c0_14, %c0_15] : memref<392x75xbf16, #tpu.memory_space<vmem>>, vector<392x75xbf16>
    %cst_16 = arith.constant dense<0.000000e+00> : vector<392x6xf32>
    %22 = tpu.matmul %21, %0, %cst_16 {dimension_numbers = #tpu.dot_dimension_numbers<[1], [0], [0], [1], [0, 0, 1, 1], [], []>} : vector<392x75xbf16>, vector<75x6xbf16>, vector<392x6xf32> -> vector<392x6xf32>
    %23 = vector.broadcast %1 : vector<1x6xf32> to vector<392x6xf32>
    %24 = arith.addf %22, %23 : vector<392x6xf32>
    %cst_17 = arith.constant 0.000000e+00 : f32
    %25 = vector.broadcast %cst_17 : f32 to vector<392x6xf32>
    %26 = arith.maximumf %24, %25 : vector<392x6xf32>
    %27 = arith.maximumf %20, %26 : vector<392x6xf32>
    %28 = arith.maximumf %14, %27 : vector<392x6xf32>
    %c0_18 = arith.constant 0 : index
    %c0_19 = arith.constant 0 : index
    %29 = vector.load %arg7[%c0_18, %c0_19] : memref<392x6xf32, #tpu.memory_space<vmem>>, vector<392x6xf32>
    tpu.vector_store %arg7[%c0_18, %c0_19], %28 {strides = array<i32>} : memref<392x6xf32, #tpu.memory_space<vmem>>, vector<392x6xf32>,
    return
  }
  func.func @transform_0(%arg0: i32) -> (i32, i32) {
    %c0_i32 = arith.constant 0 : i32
    %c0_i32_0 = arith.constant 0 : i32
    return %arg0, %c0_i32 : i32, i32
  }
  func.func @transform_1(%arg0: i32) -> (i32, i32) {
    %c0_i32 = arith.constant 0 : i32
    %c0_i32_0 = arith.constant 0 : i32
    return %arg0, %c0_i32 : i32, i32
  }
  func.func @transform_2(%arg0: i32) -> (i32, i32) {
    %c0_i32 = arith.constant 0 : i32
    %c0_i32_0 = arith.constant 0 : i32
    return %arg0, %c0_i32 : i32, i32
  }
  func.func @transform_3(%arg0: i32) -> (i32, i32) {
    %c0_i32 = arith.constant 0 : i32
    %c0_i32_0 = arith.constant 0 : i32
    return %arg0, %c0_i32 : i32, i32
  }
  func.func @transform_4(%arg0: i32) -> (i32, i32) {
    %c0_i32 = arith.constant 0 : i32
    %c0_i32_0 = arith.constant 0 : i32
    %c0_i32_1 = arith.constant 0 : i32
    return %c0_i32, %c0_i32_0 : i32, i32
  }
  func.func @transform_5(%arg0: i32) -> (i32, i32) {
    %c0_i32 = arith.constant 0 : i32
    %c0_i32_0 = arith.constant 0 : i32
    %c0_i32_1 = arith.constant 0 : i32
    return %c0_i32, %c0_i32_0 : i32, i32
  }
  func.func @transform_6(%arg0: i32) -> (i32, i32) {
    %c0_i32 = arith.constant 0 : i32
    %c0_i32_0 = arith.constant 0 : i32
    return %arg0, %c0_i32 : i32, i32
  }
}

module attributes {stable_mosaic.version = 11 : i64} {
  func.func @_conv_pool_kernel(%arg0: i32, %arg1: memref<100x150xbf16, #tpu.memory_space<vmem>>, %arg2: memref<100x150xbf16, #tpu.memory_space<vmem>>, %arg3: memref<100x150xbf16, #tpu.memory_space<vmem>>, %arg4: memref<100x150xbf16, #tpu.memory_space<vmem>>, %arg5: memref<150x16xbf16, #tpu.memory_space<vmem>>, %arg6: memref<1x16xf32, #tpu.memory_space<vmem>>, %arg7: memref<100x16xf32, #tpu.memory_space<vmem>>) attributes {dimension_semantics = [#tpu.dimension_semantics<parallel>], iteration_bounds = array<i64: 1>, scalar_prefetch = 0 : i64, scratch_operands = 0 : i64, tpu.core_type = #tpu.core_type<tc>, window_params = [{transform_indices = @transform_0, window_bounds = array<i64: 100, 150>}, {transform_indices = @transform_1, window_bounds = array<i64: 100, 150>}, {transform_indices = @transform_2, window_bounds = array<i64: 100, 150>}, {transform_indices = @transform_3, window_bounds = array<i64: 100, 150>}, {pipeline_mode = #tpu.pipeline_mode<synchronous>, transform_indices = @transform_4, window_bounds = array<i64: 150, 16>}, {pipeline_mode = #tpu.pipeline_mode<synchronous>, transform_indices = @transform_5, window_bounds = array<i64: 1, 16>}, {transform_indices = @transform_6, window_bounds = array<i64: 100, 16>}]} {
    %c0 = arith.constant 0 : index
    %c0_0 = arith.constant 0 : index
    %0 = vector.load %arg5[%c0, %c0_0] : memref<150x16xbf16, #tpu.memory_space<vmem>>, vector<150x16xbf16>
    %c0_1 = arith.constant 0 : index
    %c0_2 = arith.constant 0 : index
    %1 = vector.load %arg6[%c0_1, %c0_2] : memref<1x16xf32, #tpu.memory_space<vmem>>, vector<1x16xf32>
    %c0_3 = arith.constant 0 : index
    %c0_4 = arith.constant 0 : index
    %2 = vector.load %arg1[%c0_3, %c0_4] : memref<100x150xbf16, #tpu.memory_space<vmem>>, vector<100x150xbf16>
    %cst = arith.constant dense<0.000000e+00> : vector<100x16xf32>
    %3 = tpu.matmul %2, %0, %cst {dimension_numbers = #tpu.dot_dimension_numbers<[1], [0], [0], [1], [0, 0, 1, 1], [], []>} : vector<100x150xbf16>, vector<150x16xbf16>, vector<100x16xf32> -> vector<100x16xf32>
    %4 = vector.broadcast %1 : vector<1x16xf32> to vector<100x16xf32>
    %5 = arith.addf %3, %4 : vector<100x16xf32>
    %cst_5 = arith.constant 0.000000e+00 : f32
    %6 = vector.broadcast %cst_5 : f32 to vector<100x16xf32>
    %7 = arith.maximumf %5, %6 : vector<100x16xf32>
    %c0_6 = arith.constant 0 : index
    %c0_7 = arith.constant 0 : index
    %8 = vector.load %arg2[%c0_6, %c0_7] : memref<100x150xbf16, #tpu.memory_space<vmem>>, vector<100x150xbf16>
    %cst_8 = arith.constant dense<0.000000e+00> : vector<100x16xf32>
    %9 = tpu.matmul %8, %0, %cst_8 {dimension_numbers = #tpu.dot_dimension_numbers<[1], [0], [0], [1], [0, 0, 1, 1], [], []>} : vector<100x150xbf16>, vector<150x16xbf16>, vector<100x16xf32> -> vector<100x16xf32>
    %10 = vector.broadcast %1 : vector<1x16xf32> to vector<100x16xf32>
    %11 = arith.addf %9, %10 : vector<100x16xf32>
    %cst_9 = arith.constant 0.000000e+00 : f32
    %12 = vector.broadcast %cst_9 : f32 to vector<100x16xf32>
    %13 = arith.maximumf %11, %12 : vector<100x16xf32>
    %14 = arith.maximumf %7, %13 : vector<100x16xf32>
    %c0_10 = arith.constant 0 : index
    %c0_11 = arith.constant 0 : index
    %15 = vector.load %arg3[%c0_10, %c0_11] : memref<100x150xbf16, #tpu.memory_space<vmem>>, vector<100x150xbf16>
    %cst_12 = arith.constant dense<0.000000e+00> : vector<100x16xf32>
    %16 = tpu.matmul %15, %0, %cst_12 {dimension_numbers = #tpu.dot_dimension_numbers<[1], [0], [0], [1], [0, 0, 1, 1], [], []>} : vector<100x150xbf16>, vector<150x16xbf16>, vector<100x16xf32> -> vector<100x16xf32>
    %17 = vector.broadcast %1 : vector<1x16xf32> to vector<100x16xf32>
    %18 = arith.addf %16, %17 : vector<100x16xf32>
    %cst_13 = arith.constant 0.000000e+00 : f32
    %19 = vector.broadcast %cst_13 : f32 to vector<100x16xf32>
    %20 = arith.maximumf %18, %19 : vector<100x16xf32>
    %c0_14 = arith.constant 0 : index
    %c0_15 = arith.constant 0 : index
    %21 = vector.load %arg4[%c0_14, %c0_15] : memref<100x150xbf16, #tpu.memory_space<vmem>>, vector<100x150xbf16>
    %cst_16 = arith.constant dense<0.000000e+00> : vector<100x16xf32>
    %22 = tpu.matmul %21, %0, %cst_16 {dimension_numbers = #tpu.dot_dimension_numbers<[1], [0], [0], [1], [0, 0, 1, 1], [], []>} : vector<100x150xbf16>, vector<150x16xbf16>, vector<100x16xf32> -> vector<100x16xf32>
    %23 = vector.broadcast %1 : vector<1x16xf32> to vector<100x16xf32>
    %24 = arith.addf %22, %23 : vector<100x16xf32>
    %cst_17 = arith.constant 0.000000e+00 : f32
    %25 = vector.broadcast %cst_17 : f32 to vector<100x16xf32>
    %26 = arith.maximumf %24, %25 : vector<100x16xf32>
    %27 = arith.maximumf %20, %26 : vector<100x16xf32>
    %28 = arith.maximumf %14, %27 : vector<100x16xf32>
    %c0_18 = arith.constant 0 : index
    %c0_19 = arith.constant 0 : index
    %29 = vector.load %arg7[%c0_18, %c0_19] : memref<100x16xf32, #tpu.memory_space<vmem>>, vector<100x16xf32>
    tpu.vector_store %arg7[%c0_18, %c0_19], %28 {strides = array<i32>} : memref<100x16xf32, #tpu.memory_space<vmem>>, vector<100x16xf32>,
    return
  }
  func.func @transform_0(%arg0: i32) -> (i32, i32) {
    %c0_i32 = arith.constant 0 : i32
    %c0_i32_0 = arith.constant 0 : i32
    return %arg0, %c0_i32 : i32, i32
  }
  func.func @transform_1(%arg0: i32) -> (i32, i32) {
    %c0_i32 = arith.constant 0 : i32
    %c0_i32_0 = arith.constant 0 : i32
    return %arg0, %c0_i32 : i32, i32
  }
  func.func @transform_2(%arg0: i32) -> (i32, i32) {
    %c0_i32 = arith.constant 0 : i32
    %c0_i32_0 = arith.constant 0 : i32
    return %arg0, %c0_i32 : i32, i32
  }
  func.func @transform_3(%arg0: i32) -> (i32, i32) {
    %c0_i32 = arith.constant 0 : i32
    %c0_i32_0 = arith.constant 0 : i32
    return %arg0, %c0_i32 : i32, i32
  }
  func.func @transform_4(%arg0: i32) -> (i32, i32) {
    %c0_i32 = arith.constant 0 : i32
    %c0_i32_0 = arith.constant 0 : i32
    %c0_i32_1 = arith.constant 0 : i32
    return %c0_i32, %c0_i32_0 : i32, i32
  }
  func.func @transform_5(%arg0: i32) -> (i32, i32) {
    %c0_i32 = arith.constant 0 : i32
    %c0_i32_0 = arith.constant 0 : i32
    %c0_i32_1 = arith.constant 0 : i32
    return %c0_i32, %c0_i32_0 : i32, i32
  }
  func.func @transform_6(%arg0: i32) -> (i32, i32) {
    %c0_i32 = arith.constant 0 : i32
    %c0_i32_0 = arith.constant 0 : i32
    return %arg0, %c0_i32 : i32, i32
  }
}

module attributes {stable_mosaic.version = 11 : i64} {
  func.func @_fc_bn_kernel(%arg0: memref<4x400xf32, #tpu.memory_space<vmem>>, %arg1: memref<400x120xf32, #tpu.memory_space<vmem>>, %arg2: memref<1x120xf32, #tpu.memory_space<vmem>>, %arg3: memref<1x120xf32, #tpu.memory_space<vmem>>, %arg4: memref<1x120xf32, #tpu.memory_space<vmem>>, %arg5: memref<120x84xf32, #tpu.memory_space<vmem>>, %arg6: memref<1x84xf32, #tpu.memory_space<vmem>>, %arg7: memref<84x10xf32, #tpu.memory_space<vmem>>, %arg8: memref<1x10xf32, #tpu.memory_space<vmem>>, %arg9: memref<4x10xf32, #tpu.memory_space<vmem>>) attributes {dimension_semantics = [], scalar_prefetch = 0 : i64, scratch_operands = 0 : i64, tpu.core_type = #tpu.core_type<tc>} {
    %c0 = arith.constant 0 : index
    %c0_0 = arith.constant 0 : index
    %0 = vector.load %arg0[%c0, %c0_0] : memref<4x400xf32, #tpu.memory_space<vmem>>, vector<4x400xf32>
    %c0_1 = arith.constant 0 : index
    %c0_2 = arith.constant 0 : index
    %1 = vector.load %arg1[%c0_1, %c0_2] : memref<400x120xf32, #tpu.memory_space<vmem>>, vector<400x120xf32>
    %cst = arith.constant dense<0.000000e+00> : vector<4x120xf32>
    %2 = tpu.matmul %0, %1, %cst {dimension_numbers = #tpu.dot_dimension_numbers<[1], [0], [0], [1], [0, 0, 1, 1], [], []>} : vector<4x400xf32>, vector<400x120xf32>, vector<4x120xf32> -> vector<4x120xf32>
    %c0_3 = arith.constant 0 : index
    %c0_4 = arith.constant 0 : index
    %3 = vector.load %arg2[%c0_3, %c0_4] : memref<1x120xf32, #tpu.memory_space<vmem>>, vector<1x120xf32>
    %4 = vector.broadcast %3 : vector<1x120xf32> to vector<4x120xf32>
    %5 = arith.addf %2, %4 : vector<4x120xf32>
    %cst_5 = arith.constant 0.000000e+00 : f32
    %6 = vector.broadcast %cst_5 : f32 to vector<4x120xf32>
    %7 = arith.maximumf %5, %6 : vector<4x120xf32>
    %cst_6 = arith.constant dense<0.000000e+00> : vector<120xf32>
    %8 = vector.multi_reduction <add>, %7, %cst_6 [0] : vector<4x120xf32> to vector<120xf32>
    %9 = vector.shape_cast %8 : vector<120xf32> to vector<1x120xf32>
    %cst_7 = arith.constant 4.000000e+00 : f32
    %10 = vector.broadcast %cst_7 : f32 to vector<1x120xf32>
    %11 = arith.divf %9, %10 : vector<1x120xf32>
    %12 = vector.broadcast %11 : vector<1x120xf32> to vector<4x120xf32>
    %13 = arith.subf %7, %12 : vector<4x120xf32>
    %14 = arith.mulf %13, %13 : vector<4x120xf32>
    %cst_8 = arith.constant dense<0.000000e+00> : vector<120xf32>
    %15 = vector.multi_reduction <add>, %14, %cst_8 [0] : vector<4x120xf32> to vector<120xf32>
    %16 = vector.shape_cast %15 : vector<120xf32> to vector<1x120xf32>
    %cst_9 = arith.constant 0.333333343 : f32
    %17 = vector.broadcast %cst_9 : f32 to vector<1x120xf32>
    %18 = arith.mulf %16, %17 : vector<1x120xf32>
    %c0_10 = arith.constant 0 : index
    %c0_11 = arith.constant 0 : index
    %19 = vector.load %arg3[%c0_10, %c0_11] : memref<1x120xf32, #tpu.memory_space<vmem>>, vector<1x120xf32>
    %cst_12 = arith.constant 9.99999974E-6 : f32
    %20 = vector.broadcast %cst_12 : f32 to vector<1x120xf32>
    %21 = arith.addf %18, %20 : vector<1x120xf32>
    %22 = math.rsqrt %21 : vector<1x120xf32>
    %23 = vector.broadcast %22 : vector<1x120xf32> to vector<4x120xf32>
    %24 = arith.mulf %13, %23 : vector<4x120xf32>
    %25 = vector.broadcast %19 : vector<1x120xf32> to vector<4x120xf32>
    %26 = arith.mulf %25, %24 : vector<4x120xf32>
    %c0_13 = arith.constant 0 : index
    %c0_14 = arith.constant 0 : index
    %27 = vector.load %arg4[%c0_13, %c0_14] : memref<1x120xf32, #tpu.memory_space<vmem>>, vector<1x120xf32>
    %28 = vector.broadcast %27 : vector<1x120xf32> to vector<4x120xf32>
    %29 = arith.addf %26, %28 : vector<4x120xf32>
    %c0_15 = arith.constant 0 : index
    %c0_16 = arith.constant 0 : index
    %30 = vector.load %arg5[%c0_15, %c0_16] : memref<120x84xf32, #tpu.memory_space<vmem>>, vector<120x84xf32>
    %cst_17 = arith.constant dense<0.000000e+00> : vector<4x84xf32>
    %31 = tpu.matmul %29, %30, %cst_17 {dimension_numbers = #tpu.dot_dimension_numbers<[1], [0], [0], [1], [0, 0, 1, 1], [], []>} : vector<4x120xf32>, vector<120x84xf32>, vector<4x84xf32> -> vector<4x84xf32>
    %c0_18 = arith.constant 0 : index
    %c0_19 = arith.constant 0 : index
    %32 = vector.load %arg6[%c0_18, %c0_19] : memref<1x84xf32, #tpu.memory_space<vmem>>, vector<1x84xf32>
    %33 = vector.broadcast %32 : vector<1x84xf32> to vector<4x84xf32>
    %34 = arith.addf %31, %33 : vector<4x84xf32>
    %cst_20 = arith.constant 0.000000e+00 : f32
    %35 = vector.broadcast %cst_20 : f32 to vector<4x84xf32>
    %36 = arith.maximumf %34, %35 : vector<4x84xf32>
    %c0_21 = arith.constant 0 : index
    %c0_22 = arith.constant 0 : index
    %37 = vector.load %arg7[%c0_21, %c0_22] : memref<84x10xf32, #tpu.memory_space<vmem>>, vector<84x10xf32>
    %cst_23 = arith.constant dense<0.000000e+00> : vector<4x10xf32>
    %38 = tpu.matmul %36, %37, %cst_23 {dimension_numbers = #tpu.dot_dimension_numbers<[1], [0], [0], [1], [0, 0, 1, 1], [], []>} : vector<4x84xf32>, vector<84x10xf32>, vector<4x10xf32> -> vector<4x10xf32>
    %c0_24 = arith.constant 0 : index
    %c0_25 = arith.constant 0 : index
    %39 = vector.load %arg8[%c0_24, %c0_25] : memref<1x10xf32, #tpu.memory_space<vmem>>, vector<1x10xf32>
    %40 = vector.broadcast %39 : vector<1x10xf32> to vector<4x10xf32>
    %41 = arith.addf %38, %40 : vector<4x10xf32>
    %c0_26 = arith.constant 0 : index
    %c0_27 = arith.constant 0 : index
    %42 = vector.load %arg9[%c0_26, %c0_27] : memref<4x10xf32, #tpu.memory_space<vmem>>, vector<4x10xf32>
    tpu.vector_store %arg9[%c0_26, %c0_27], %41 {strides = array<i32>} : memref<4x10xf32, #tpu.memory_space<vmem>>, vector<4x10xf32>,
    return
  }
}

</mosaic_0001>

<bundles_post_ra>
// kernel: cnn3_forward.3
= control target key start
LH: loop header
LB: loop body
LE: loop exit
PB: predicated region body
PF: predicated region fallthrough
CT: control target
= control target key end

     0   :  { %s3719_s21 = smov 0   ;;  %s4656_s0 = inlined_call_operand.vmem [shape: bf16[784,75], index: 0, kind: input, shape index: {}]   ;;  %s4657_s1 = inlined_call_operand.vmem [shape: bf16[784,75], index: 1, kind: input, shape index: {}]   ;;  %s4658_s2 = inlined_call_operand.vmem [shape: bf16[784,75], index: 2, kind: input, shape index: {}]   ;;  %s4659_s3 = inlined_call_operand.vmem [shape: bf16[784,75], index: 3, kind: input, shape index: {}]   ;;  %s4660_s4 = inlined_call_operand.vmem [shape: bf16[75,6], index: 4, kind: input, shape index: {}]   ;;  %s4661_s5 = inlined_call_operand.vmem [shape: f32[1,6], index: 5, kind: input, shape index: {}]   ;;  %s4662_s6 = inlined_call_operand.vmem [shape: f32[784,6], index: 6, kind: output, shape index: {}]  }
   0x1 LB: > { %s2777_s22 = sadd.s32 4294967295, %s3679_s21   ;;  %p2781_p0 = scmp.ge.s32.totalorder %s3679_s21, 1  ;;  %s3679_s21 = sphi %s3719_s21, %s16_s21  }
   0x2   : > { %p246_p1 = scmp.lt.s32.totalorder %s3679_s21, 3 }
   0x4   : > { %p247_p2 = pnand %p2781_p0, %p246_p1 }
   0x6   : > { %250 = sbr.rel (%p247_p2) target bundleno = 647 (0x287), region = 44 }
   0xd   : > { %v3566_v0 = vld [vmem:[%s4660_s4] sm:$0xff]   ;;  %v3681_v1 = vmov 0.0   ;;  %v3567_v2 = vld [vmem:[%s4660_s4 + $0x8] sm:$0xff]   ;;  %vm616_vm0 = vcmask 1044480   ;;  %s291_s27 = smul.u32 49, %s2777_s22  ;;  %v3568_v3 = vld [vmem:[%s4660_s4 + $0x10] sm:$0xff]  }
   0xe   : > { %3115 = vmatprep.subr.bf16.mxu0 %v3681_v1  ;;  %3225 = vmatprep.subr.bf16.mxu1 %v3681_v1  ;;  %vm617_vm1 = vcmask 1045504   ;;  %v3682_v4 = vmov 65535   ;;  %vm3683_vm2 = vmmov 0   ;;  %v3569_v6 = vld [vmem:[%s4660_s4 + $0x18] sm:$0xff]   ;;  %v3570_v7 = vld [vmem:[%s4660_s4 + $0x20] sm:$0x3f]  }
   0xf   : > { %3116 = vmatpush3.bf16.msra.mxu0 %v3566_v0  ;;  %3226 = vmatpush3.bf16.msra.mxu1 %v3566_v0  ;;  %p292_p3 = scmp.lt.s32.totalorder %s291_s27, 97  ;;  %v618_v5 = vsel %vm616_vm0, 4294967295, %v3682_v4  ;;  %vm540_vm3 = vcmask 613376   ;;  %vm2635_vm4 = vcmask 48128  }
  0x10   : > { %3117 = vmatprep.subr.bf16.mxu0 %v3681_v1  ;;  %3227 = vmatprep.subr.bf16.mxu1 %v3681_v1  ;;  %v619_v8 = vsel %vm617_vm1, %v618_v5, 0 }
  0x11   : > { %3125 = vmatprep.mubr.msk.bf16.mxu0 %vm3683_vm2, %v3681_v1  ;;  %3235 = vmatprep.mubr.msk.bf16.mxu1 %vm3683_vm2, %v3681_v1  ;;  %s4670_s27 = smov (!%p292_p3, %s291_s27), 97  ;;  %v621_v9 = vand.u32 %v3570_v7, %v619_v8 }
  0x12   : > { %s3757_s10 = sshll.u32 %s4670_s27, 2  ;;  %s2786_s29 = sshll.u32 %s4670_s27, 3 }
  0x13   : > { %3118 = vmatpush3.bf16.msra.mxu0 %v3567_v2  ;;  %3228 = vmatpush3.bf16.msra.mxu1 %v3567_v2  ;;  %s3763_s13 = scalar_lea.vmem %s4656_s0, %s3757_s10  ;;  %s3769_s16 = scalar_lea.vmem %s4657_s1, %s3757_s10 }
  0x14   : > { %3119 = vmatprep.subr.bf16.mxu0 %v3681_v1  ;;  %3229 = vmatprep.subr.bf16.mxu1 %v3681_v1  ;;  %v3571_v10 = vld [vmem:[%s3763_s13] sm:$0xff]   ;;  %v3573_v12 = vld [vmem:[%s3763_s13 + $0x8] sm:$0xff]   ;;  %v3575_v14 = vld [vmem:[%s3763_s13 + $0x10] sm:$0xff]   ;;  %s3829_s19 = scalar_lea.vmem %s4658_s2, %s3757_s10  ;;  %s3835_s23 = scalar_lea.vmem %s4659_s3, %s3757_s10 }
  0x15   : > { %v3572_v11 = vld [vmem:[%s3769_s16] sm:$0xff]   ;;  %v3574_v13 = vld [vmem:[%s3769_s16 + $0x8] sm:$0xff]   ;;  %v3576_v15 = vld [vmem:[%s3769_s16 + $0x10] sm:$0xff]   ;;  %s4405_s8 = scalar_lea.vmem %s4662_s6, %s2786_s29 }
  0x16   : > { %v3577_v16 = vld [vmem:[%s3763_s13 + $0x18] sm:$0xff]   ;;  %v3579_v18 = vld [vmem:[%s3763_s13 + $0x20] sm:$0xff]   ;;  %v3581_v20 = vld [vmem:[%s3763_s13 + $0x28] sm:$0xff]  }
  0x17   : > { %3120 = vmatpush3.bf16.msra.mxu0 %v3568_v3  ;;  %3230 = vmatpush3.bf16.msra.mxu1 %v3568_v3  ;;  %v3578_v17 = vld [vmem:[%s3769_s16 + $0x18] sm:$0xff]   ;;  %v3580_v19 = vld [vmem:[%s3769_s16 + $0x20] sm:$0xff]   ;;  %v3582_v21 = vld [vmem:[%s3769_s16 + $0x28] sm:$0xff]  }
  0x18   : > { %3121 = vmatprep.subr.bf16.mxu0 %v3681_v1  ;;  %3231 = vmatprep.subr.bf16.mxu1 %v3681_v1  ;;  %v3583_v22 = vld [vmem:[%s3763_s13 + $0x30] sm:$0xff]   ;;  %v3585_v24 = vld [vmem:[%s3763_s13 + $0x38] sm:$0xff]   ;;  %v3587_v26 = vld [vmem:[%s3763_s13 + $0x40] sm:$0xff]  }
  0x19   : > { %v3584_v23 = vld [vmem:[%s3769_s16 + $0x30] sm:$0xff]   ;;  %v3586_v25 = vld [vmem:[%s3769_s16 + $0x38] sm:$0xff]   ;;  %v3588_v27 = vld [vmem:[%s3769_s16 + $0x40] sm:$0xff]  }
  0x1a   : > { %v3589_v28 = vld [vmem:[%s3763_s13 + $0x48] sm:$0xff]   ;;  %v3591_v30 = vld [vmem:[%s3763_s13 + $0x50] sm:$0xff]   ;;  %v3593_v32 = vld [vmem:[%s3763_s13 + $0x58] sm:$0xff]  }
  0x1b   : > { %3122 = vmatpush3.bf16.msra.mxu0 %v3569_v6  ;;  %3232 = vmatpush3.bf16.msra.mxu1 %v3569_v6  ;;  %v3590_v29 = vld [vmem:[%s3769_s16 + $0x48] sm:$0xff]   ;;  %v3592_v31 = vld [vmem:[%s3769_s16 + $0x50] sm:$0xff]   ;;  %v3594_v33 = vld [vmem:[%s3769_s16 + $0x58] sm:$0xff]  }
  0x1c   : > { %3123 = vmatprep.subr.bf16.mxu0 %v3681_v1  ;;  %3233 = vmatprep.subr.bf16.mxu1 %v3681_v1  ;;  %v3595_v34 = vld [vmem:[%s3763_s13 + $0x60] sm:$0xff]   ;;  %v3597_v36 = vld [vmem:[%s3763_s13 + $0x68] sm:$0xff]   ;;  %v3599_v38 = vld [vmem:[%s3763_s13 + $0x70] sm:$0xff]  }
  0x1d   : > { %v3596_v35 = vld [vmem:[%s3769_s16 + $0x60] sm:$0xff]   ;;  %v3598_v37 = vld [vmem:[%s3769_s16 + $0x68] sm:$0xff]   ;;  %v3600_v39 = vld [vmem:[%s3769_s16 + $0x70] sm:$0xff]  }
  0x1e   : > { %v3601_v40 = vld [vmem:[%s3763_s13 + $0x78] sm:$0xff]   ;;  %v3603_v42 = vld [vmem:[%s3763_s13 + $0x80] sm:$0xff]   ;;  %v3605_v44 = vld [vmem:[%s3763_s13 + $0x88] sm:$0xff]  }
  0x1f   : > { %3124 = vmatpush3.bf16.msra.mxu0 %v621_v9  ;;  %3234 = vmatpush3.bf16.msra.mxu1 %v621_v9  ;;  %v3602_v41 = vld [vmem:[%s3769_s16 + $0x78] sm:$0xff]   ;;  %v3604_v43 = vld [vmem:[%s3769_s16 + $0x80] sm:$0xff]   ;;  %v3606_v45 = vld [vmem:[%s3769_s16 + $0x88] sm:$0xff]  }
  0x20   : > { %3335 = vmatprep.subr.bf16.mxu0 %v3681_v1  ;;  %3445 = vmatprep.subr.bf16.mxu1 %v3681_v1  ;;  %v3607_v46 = vld [vmem:[%s3763_s13 + $0x90] sm:$0xff]   ;;  %v3609_v48 = vld [vmem:[%s3763_s13 + $0x98] sm:$0xff]   ;;  %v3611_v50 = vld [vmem:[%s3763_s13 + $0xa0] sm:$0xff]  }
  0x21   : > { %v3608_v47 = vld [vmem:[%s3769_s16 + $0x90] sm:$0xff]   ;;  %v3610_v49 = vld [vmem:[%s3769_s16 + $0x98] sm:$0xff]   ;;  %v3612_v51 = vld [vmem:[%s3769_s16 + $0xa0] sm:$0xff]  }
  0x22   : > { %3126 = vmatmul.mubr.msk.bf16.vlgmr.msra.gmra.mrb[0].mxu0 %vm540_vm3, %v3571_v10  ;;  %3236 = vmatmul.mubr.msk.bf16.vlgmr.msra.gmra.mrb[0].mxu1 %vm540_vm3, %v3572_v11  ;;  %v3613_v52 = vld [vmem:[%s3763_s13 + $0xa8] sm:$0xff]   ;;  %v3615_v54 = vld [vmem:[%s3763_s13 + $0xb0] sm:$0xff]   ;;  %v3617_v56 = vld [vmem:[%s3763_s13 + $0xb8] sm:$0xff]  }
  0x23   : > { %3336 = vmatpush3.bf16.msra.mxu0 %v3566_v0  ;;  %3446 = vmatpush3.bf16.msra.mxu1 %v3566_v0  ;;  %v3614_v53 = vld [vmem:[%s3769_s16 + $0xa8] sm:$0xff]   ;;  %v3616_v55 = vld [vmem:[%s3769_s16 + $0xb0] sm:$0xff]   ;;  %v3618_v57 = vld [vmem:[%s3769_s16 + $0xb8] sm:$0xff]  }
  0x24   : > { %3129 = vmatprep.mubr.msk.bf16.mxu0 %vm3683_vm2, %v3681_v1  ;;  %3239 = vmatprep.mubr.msk.bf16.mxu1 %vm3683_vm2, %v3681_v1  ;;  %v3619_v58 = vld [vmem:[%s3763_s13 + $0xc0] ss:$0 sps:$4 sm:$0xff]   ;;  %v3623_v62 = vld [vmem:[%s3829_s19 + $0x8] sm:$0xff]   ;;  %v3625_v8 = vld [vmem:[%s3829_s19 + $0x10] sm:$0xff]  }
  0x25   : > { %3337 = vmatprep.subr.bf16.mxu0 %v3681_v1  ;;  %3447 = vmatprep.subr.bf16.mxu1 %v3681_v1  ;;  %v3620_v59 = vld [vmem:[%s3769_s16 + $0xc0] ss:$0 sps:$4 sm:$0xff]   ;;  %v3624_v63 = vld [vmem:[%s3835_s23 + $0x8] sm:$0xff]  }
  0x26   : > { %v3621_v60 = vld [vmem:[%s3829_s19] sm:$0xff]  }
  0x27   : > { %3338 = vmatpush3.bf16.msra.mxu0 %v3567_v2  ;;  %3448 = vmatpush3.bf16.msra.mxu1 %v3567_v2  ;;  %v3622_v61 = vld [vmem:[%s3835_s23] sm:$0xff]  }
  0x28   : > { %3339 = vmatprep.subr.bf16.mxu0 %v3681_v1  ;;  %3449 = vmatprep.subr.bf16.mxu1 %v3681_v1  ;;  %v4010_v0 = vld [vmem:[%s4661_s5] ss:$0 sm:$0xff] }
  0x2a   : > { %3130 = vmatmul.mubr.msk.bf16.gmra.mrb[4].mxu0 %vm540_vm3, %v3573_v12  ;;  %3240 = vmatmul.mubr.msk.bf16.gmra.mrb[4].mxu1 %vm540_vm3, %v3574_v13 }
  0x2b   : > { %3133 = vmatprep.mubr.msk.bf16.mxu0 %vm3683_vm2, %v3681_v1  ;;  %3243 = vmatprep.mubr.msk.bf16.mxu1 %vm3683_vm2, %v3681_v1 }
  0x2c   : > { %3340 = vmatpush3.bf16.msra.mxu0 %v3568_v3  ;;  %3450 = vmatpush3.bf16.msra.mxu1 %v3568_v3 }
  0x2d   : > { %3341 = vmatprep.subr.bf16.mxu0 %v3681_v1  ;;  %3451 = vmatprep.subr.bf16.mxu1 %v3681_v1 }
  0x30   : > { %3342 = vmatpush3.bf16.msra.mxu0 %v3569_v6  ;;  %3452 = vmatpush3.bf16.msra.mxu1 %v3569_v6 }
  0x31   : > { %3343 = vmatprep.subr.bf16.mxu0 %v3681_v1  ;;  %3453 = vmatprep.subr.bf16.mxu1 %v3681_v1 }
  0x32   : > { %3134 = vmatmul.mubr.msk.bf16.gmra.mrb[8].mxu0 %vm540_vm3, %v3575_v14  ;;  %3244 = vmatmul.mubr.msk.bf16.gmra.mrb[8].mxu1 %vm540_vm3, %v3576_v15 }
  0x33   : > { %3137 = vmatprep.mubr.msk.bf16.mxu0 %vm3683_vm2, %v3681_v1  ;;  %3247 = vmatprep.mubr.msk.bf16.mxu1 %vm3683_vm2, %v3681_v1 }
  0x34   : > { %3344 = vmatpush3.bf16.msra.mxu0 %v621_v9  ;;  %3454 = vmatpush3.bf16.msra.mxu1 %v621_v9  ;;  %v3626_v9 = vld [vmem:[%s3835_s23 + $0x10] sm:$0xff]  }
  0x3a   : > { %3138 = vmatmul.mubr.msk.bf16.gmra.mrb[12].mxu0 %vm540_vm3, %v3577_v16  ;;  %3248 = vmatmul.mubr.msk.bf16.gmra.mrb[12].mxu1 %vm540_vm3, %v3578_v17 }
  0x3b   : > { %3141 = vmatprep.mubr.msk.bf16.mxu0 %vm3683_vm2, %v3681_v1  ;;  %3251 = vmatprep.mubr.msk.bf16.mxu1 %vm3683_vm2, %v3681_v1 }
  0x42   : > { %3142 = vmatmul.mubr.msk.bf16.gmra.mrb[16].mxu0 %vm540_vm3, %v3579_v18  ;;  %3252 = vmatmul.mubr.msk.bf16.gmra.mrb[16].mxu1 %vm540_vm3, %v3580_v19 }
  0x43   : > { %3145 = vmatprep.mubr.msk.bf16.mxu0 %vm3683_vm2, %v3681_v1  ;;  %3255 = vmatprep.mubr.msk.bf16.mxu1 %vm3683_vm2, %v3681_v1 }
  0x4a   : > { %3146 = vmatmul.mubr.msk.bf16.gmra.mrb[20].mxu0 %vm540_vm3, %v3581_v20  ;;  %3256 = vmatmul.mubr.msk.bf16.gmra.mrb[20].mxu1 %vm540_vm3, %v3582_v21 }
  0x4b   : > { %3149 = vmatprep.mubr.msk.bf16.mxu0 %vm3683_vm2, %v3681_v1  ;;  %3259 = vmatprep.mubr.msk.bf16.mxu1 %vm3683_vm2, %v3681_v1 }
  0x52   : > { %3150 = vmatmul.mubr.msk.bf16.gmra.mrb[24].mxu0 %vm540_vm3, %v3583_v22  ;;  %3260 = vmatmul.mubr.msk.bf16.gmra.mrb[24].mxu1 %vm540_vm3, %v3584_v23 }
  0x53   : > { %3153 = vmatprep.mubr.msk.bf16.mxu0 %vm3683_vm2, %v3681_v1  ;;  %3263 = vmatprep.mubr.msk.bf16.mxu1 %vm3683_vm2, %v3681_v1 }
  0x5a   : > { %3154 = vmatmul.mubr.msk.bf16.gmra.mrb[28].mxu0 %vm540_vm3, %v3585_v24  ;;  %3264 = vmatmul.mubr.msk.bf16.gmra.mrb[28].mxu1 %vm540_vm3, %v3586_v25 }
  0x5b   : > { %3157 = vmatprep.mubr.msk.bf16.mxu0 %vm3683_vm2, %v3681_v1  ;;  %3267 = vmatprep.mubr.msk.bf16.mxu1 %vm3683_vm2, %v3681_v1 }
  0x62   : > { %3158 = vmatmul.mubr.msk.bf16.gmra.mrb[32].mxu0 %vm540_vm3, %v3587_v26  ;;  %3268 = vmatmul.mubr.msk.bf16.gmra.mrb[32].mxu1 %vm540_vm3, %v3588_v27 }
  0x63   : > { %3161 = vmatprep.mubr.msk.bf16.mxu0 %vm3683_vm2, %v3681_v1  ;;  %3271 = vmatprep.mubr.msk.bf16.mxu1 %vm3683_vm2, %v3681_v1 }
  0x6a   : > { %3162 = vmatmul.mubr.msk.bf16.gmra.mrb[36].mxu0 %vm540_vm3, %v3589_v28  ;;  %3272 = vmatmul.mubr.msk.bf16.gmra.mrb[36].mxu1 %vm540_vm3, %v3590_v29  ;;  %v3627_v28 = vld [vmem:[%s3829_s19 + $0x18] sm:$0xff]  }
  0x6b   : > { %3165 = vmatprep.mubr.msk.bf16.mxu0 %vm3683_vm2, %v3681_v1  ;;  %3275 = vmatprep.mubr.msk.bf16.mxu1 %vm3683_vm2, %v3681_v1  ;;  %v3628_v29 = vld [vmem:[%s3835_s23 + $0x18] sm:$0xff]  }
  0x72   : > { %3166 = vmatmul.mubr.msk.bf16.gmra.mrb[40].mxu0 %vm540_vm3, %v3591_v30  ;;  %3276 = vmatmul.mubr.msk.bf16.gmra.mrb[40].mxu1 %vm540_vm3, %v3592_v31 }
  0x73   : > { %3169 = vmatprep.mubr.msk.bf16.mxu0 %vm3683_vm2, %v3681_v1  ;;  %3279 = vmatprep.mubr.msk.bf16.mxu1 %vm3683_vm2, %v3681_v1 }
  0x7a   : > { %3170 = vmatmul.mubr.msk.bf16.gmra.mrb[44].mxu0 %vm540_vm3, %v3593_v32  ;;  %3280 = vmatmul.mubr.msk.bf16.gmra.mrb[44].mxu1 %vm540_vm3, %v3594_v33 }
  0x7b   : > { %3173 = vmatprep.mubr.msk.bf16.mxu0 %vm3683_vm2, %v3681_v1  ;;  %3283 = vmatprep.mubr.msk.bf16.mxu1 %vm3683_vm2, %v3681_v1 }
  0x82   : > { %3174 = vmatmul.mubr.msk.bf16.gmra.mrb[48].mxu0 %vm540_vm3, %v3595_v34  ;;  %3284 = vmatmul.mubr.msk.bf16.gmra.mrb[48].mxu1 %vm540_vm3, %v3596_v35 }
  0x83   : > { %3177 = vmatprep.mubr.msk.bf16.mxu0 %vm3683_vm2, %v3681_v1  ;;  %3287 = vmatprep.mubr.msk.bf16.mxu1 %vm3683_vm2, %v3681_v1 }
  0x8a   : > { %3178 = vmatmul.mubr.msk.bf16.gmra.mrb[52].mxu0 %vm540_vm3, %v3597_v36  ;;  %3288 = vmatmul.mubr.msk.bf16.gmra.mrb[52].mxu1 %vm540_vm3, %v3598_v37 }
  0x8b   : > { %3181 = vmatprep.mubr.msk.bf16.mxu0 %vm3683_vm2, %v3681_v1  ;;  %3291 = vmatprep.mubr.msk.bf16.mxu1 %vm3683_vm2, %v3681_v1 }
  0x92   : > { %3182 = vmatmul.mubr.msk.bf16.gmra.mrb[56].mxu0 %vm540_vm3, %v3599_v38  ;;  %3292 = vmatmul.mubr.msk.bf16.gmra.mrb[56].mxu1 %vm540_vm3, %v3600_v39 }
  0x93   : > { %3185 = vmatprep.mubr.msk.bf16.mxu0 %vm3683_vm2, %v3681_v1  ;;  %3295 = vmatprep.mubr.msk.bf16.mxu1 %vm3683_vm2, %v3681_v1 }
  0x9a   : > { %3186 = vmatmul.mubr.msk.bf16.gmra.mrb[60].mxu0 %vm540_vm3, %v3601_v40  ;;  %3296 = vmatmul.mubr.msk.bf16.gmra.mrb[60].mxu1 %vm540_vm3, %v3602_v41 }
  0x9b   : > { %3189 = vmatprep.mubr.msk.bf16.mxu0 %vm3683_vm2, %v3681_v1  ;;  %3299 = vmatprep.mubr.msk.bf16.mxu1 %vm3683_vm2, %v3681_v1 }
  0xa2   : > { %3190 = vmatmul.mubr.msk.bf16.gmra.mrb[64].mxu0 %vm540_vm3, %v3603_v42  ;;  %3300 = vmatmul.mubr.msk.bf16.gmra.mrb[64].mxu1 %vm540_vm3, %v3604_v43 }
  0xa3   : > { %3193 = vmatprep.mubr.msk.bf16.mxu0 %vm3683_vm2, %v3681_v1  ;;  %3303 = vmatprep.mubr.msk.bf16.mxu1 %vm3683_vm2, %v3681_v1 }
  0xaa   : > { %3194 = vmatmul.mubr.msk.bf16.gmra.mrb[68].mxu0 %vm540_vm3, %v3605_v44  ;;  %3304 = vmatmul.mubr.msk.bf16.gmra.mrb[68].mxu1 %vm540_vm3, %v3606_v45 }
  0xab   : > { %3197 = vmatprep.mubr.msk.bf16.mxu0 %vm3683_vm2, %v3681_v1  ;;  %3307 = vmatprep.mubr.msk.bf16.mxu1 %vm3683_vm2, %v3681_v1 }
  0xb2   : > { %3198 = vmatmul.mubr.msk.bf16.gmra.mrb[72].mxu0 %vm540_vm3, %v3607_v46  ;;  %3308 = vmatmul.mubr.msk.bf16.gmra.mrb[72].mxu1 %vm540_vm3, %v3608_v47 }
  0xb3   : > { %3201 = vmatprep.mubr.msk.bf16.mxu0 %vm3683_vm2, %v3681_v1  ;;  %3311 = vmatprep.mubr.msk.bf16.mxu1 %vm3683_vm2, %v3681_v1 }
  0xba   : > { %3202 = vmatmul.mubr.msk.bf16.gmra.mrb[76].mxu0 %vm540_vm3, %v3609_v48  ;;  %3312 = vmatmul.mubr.msk.bf16.gmra.mrb[76].mxu1 %vm540_vm3, %v3610_v49  ;;  %v3629_v48 = vld [vmem:[%s3829_s19 + $0x20] sm:$0xff]  }
  0xbb   : > { %3205 = vmatprep.mubr.msk.bf16.mxu0 %vm3683_vm2, %v3681_v1  ;;  %3315 = vmatprep.mubr.msk.bf16.mxu1 %vm3683_vm2, %v3681_v1  ;;  %v3630_v49 = vld [vmem:[%s3835_s23 + $0x20] sm:$0xff]  }
  0xc2   : > { %3206 = vmatmul.mubr.msk.bf16.gmra.mrb[80].mxu0 %vm540_vm3, %v3611_v50  ;;  %3316 = vmatmul.mubr.msk.bf16.gmra.mrb[80].mxu1 %vm540_vm3, %v3612_v51 }
  0xc3   : > { %3209 = vmatprep.mubr.msk.bf16.mxu0 %vm3683_vm2, %v3681_v1  ;;  %3319 = vmatprep.mubr.msk.bf16.mxu1 %vm3683_vm2, %v3681_v1 }
  0xca   : > { %3210 = vmatmul.mubr.msk.bf16.gmra.mrb[84].mxu0 %vm540_vm3, %v3613_v52  ;;  %3320 = vmatmul.mubr.msk.bf16.gmra.mrb[84].mxu1 %vm540_vm3, %v3614_v53 }
  0xcb   : > { %3213 = vmatprep.mubr.msk.bf16.mxu0 %vm3683_vm2, %v3681_v1  ;;  %3323 = vmatprep.mubr.msk.bf16.mxu1 %vm3683_vm2, %v3681_v1 }
  0xd2   : > { %3214 = vmatmul.mubr.msk.bf16.gmra.mrb[88].mxu0 %vm540_vm3, %v3615_v54  ;;  %3324 = vmatmul.mubr.msk.bf16.gmra.mrb[88].mxu1 %vm540_vm3, %v3616_v55 }
  0xd3   : > { %3217 = vmatprep.mubr.msk.bf16.mxu0 %vm3683_vm2, %v3681_v1  ;;  %3327 = vmatprep.mubr.msk.bf16.mxu1 %vm3683_vm2, %v3681_v1 }
  0xda   : > { %3218 = vmatmul.mubr.msk.bf16.gmra.mrb[92].mxu0 %vm540_vm3, %v3617_v56  ;;  %3328 = vmatmul.mubr.msk.bf16.gmra.mrb[92].mxu1 %vm540_vm3, %v3618_v57 }
  0xdb   : > { %3221 = vmatprep.mubr.msk.bf16.mxu0 %vm3683_vm2, %v3681_v1  ;;  %3331 = vmatprep.mubr.msk.bf16.mxu1 %vm3683_vm2, %v3681_v1 }
  0xe2   : > { %3222 = vmatmul.mubr.msk.bf16.gmra.mrb[96].mxu0 %vm540_vm3, %v3619_v58  ;;  %3332 = vmatmul.mubr.msk.bf16.gmra.mrb[96].mxu1 %vm540_vm3, %v3620_v59 }
  0xe3   : > { %3345 = vmatprep.mubr.msk.bf16.mxu0 %vm3683_vm2, %v3681_v1  ;;  %3455 = vmatprep.mubr.msk.bf16.mxu1 %vm3683_vm2, %v3681_v1 }
  0xea   : > { %3346 = vmatmul.mubr.msk.bf16.vlgmr.msra.gmra.mrb[100].mxu0 %vm540_vm3, %v3621_v60  ;;  %3456 = vmatmul.mubr.msk.bf16.vlgmr.msra.gmra.mrb[100].mxu1 %vm540_vm3, %v3622_v61 }
  0xeb   : > { %3349 = vmatprep.mubr.msk.bf16.mxu0 %vm3683_vm2, %v3681_v1  ;;  %3459 = vmatprep.mubr.msk.bf16.mxu1 %vm3683_vm2, %v3681_v1 }
  0xf2   : > { %3350 = vmatmul.mubr.msk.bf16.gmra.mrb[104].mxu0 %vm540_vm3, %v3623_v62  ;;  %3460 = vmatmul.mubr.msk.bf16.gmra.mrb[104].mxu1 %vm540_vm3, %v3624_v63 }
  0xf3   : > { %3353 = vmatprep.mubr.msk.bf16.mxu0 %vm3683_vm2, %v3681_v1  ;;  %3463 = vmatprep.mubr.msk.bf16.mxu1 %vm3683_vm2, %v3681_v1 }
  0xf5   : > { %v657_v2 = vpop.f32.mrb[0].mxu0  ;;  %v1185_v3 = vpop.f32.mrb[0].mxu1 }
  0xf6   : > { %v658_v4 = vadd.f32 %v4010_v0, %v657_v2  ;;  %v1186_v5 = vadd.f32 %v4010_v0, %v1185_v3  ;;  %v3127_v6 = vpop.f32.mrb[1].mxu0  ;;  %v3237_v7 = vpop.f32.mrb[1].mxu1 }
  0xf7   : > { %v660_v10 = vpop.f32.mrb[2].mxu0  ;;  %v1188_v11 = vpop.f32.mrb[2].mxu1  ;;  %v3631_v6 = vld [vmem:[%s3829_s19 + $0x28] sm:$0xff]  }
  0xf8   : > { %v855_v12 = vmax.f32 %v658_v4, 0.0  ;;  %v1383_v13 = vmax.f32 %v1186_v5, 0.0  ;;  %v661_v14 = vadd.f32 %v4010_v0, %v660_v10  ;;  %v1189_v15 = vadd.f32 %v4010_v0, %v1188_v11  ;;  %v3128_v16 = vpop.f32.mrb[3].mxu0  ;;  %v3238_v17 = vpop.f32.mrb[3].mxu1  ;;  %v3632_v7 = vld [vmem:[%s3835_s23 + $0x28] sm:$0xff]  }
  0xfa   : > { %v4022_v18 = vmax.f32 %v855_v12, %v1383_v13  ;;  %v856_v19 = vmax.f32 %v661_v14, 0.0  ;;  %v1384_v20 = vmax.f32 %v1189_v15, 0.0  ;;  %3354 = vmatmul.mubr.msk.bf16.gmra.mrb[108].mxu0 %vm540_vm3, %v3625_v8  ;;  %3464 = vmatmul.mubr.msk.bf16.gmra.mrb[108].mxu1 %vm540_vm3, %v3626_v9 }
  0xfb   : > { %3357 = vmatprep.mubr.msk.bf16.mxu0 %vm3683_vm2, %v3681_v1  ;;  %3467 = vmatprep.mubr.msk.bf16.mxu1 %vm3683_vm2, %v3681_v1 }
  0xfc   : > { %v4030_v21 = vmax.f32 %v856_v19, %v1384_v20 }
  0xfd   : > { %v665_v22 = vpop.f32.mrb[4].mxu0  ;;  %v1193_v23 = vpop.f32.mrb[4].mxu1 }
  0xfe   : > { %v666_v24 = vadd.f32 %v4010_v0, %v665_v22  ;;  %v1194_v25 = vadd.f32 %v4010_v0, %v1193_v23  ;;  %v3131_v26 = vpop.f32.mrb[5].mxu0  ;;  %v3241_v27 = vpop.f32.mrb[5].mxu1 }
  0xff   : > { %v668_v30 = vpop.f32.mrb[6].mxu0  ;;  %v1196_v31 = vpop.f32.mrb[6].mxu1 }
 0x100   : > { %v857_v32 = vmax.f32 %v666_v24, 0.0  ;;  %v1385_v33 = vmax.f32 %v1194_v25, 0.0  ;;  %v669_v34 = vadd.f32 %v4010_v0, %v668_v30  ;;  %v1197_v35 = vadd.f32 %v4010_v0, %v1196_v31  ;;  %v3132_v36 = vpop.f32.mrb[7].mxu0  ;;  %v3242_v37 = vpop.f32.mrb[7].mxu1 }
 0x102   : > { %v4038_v38 = vmax.f32 %v857_v32, %v1385_v33  ;;  %v858_v39 = vmax.f32 %v669_v34, 0.0  ;;  %v1386_v40 = vmax.f32 %v1197_v35, 0.0  ;;  %3358 = vmatmul.mubr.msk.bf16.gmra.mrb[112].mxu0 %vm540_vm3, %v3627_v28  ;;  %3468 = vmatmul.mubr.msk.bf16.gmra.mrb[112].mxu1 %vm540_vm3, %v3628_v29  ;;  %v3633_v28 = vld [vmem:[%s3829_s19 + $0x30] sm:$0xff]  }
 0x103   : > { %3361 = vmatprep.mubr.msk.bf16.mxu0 %vm3683_vm2, %v3681_v1  ;;  %3471 = vmatprep.mubr.msk.bf16.mxu1 %vm3683_vm2, %v3681_v1  ;;  %v3634_v29 = vld [vmem:[%s3835_s23 + $0x30] sm:$0xff]  }
 0x104   : > { %v4046_v41 = vmax.f32 %v858_v39, %v1386_v40 }
 0x105   : > { %v673_v42 = vpop.f32.mrb[8].mxu0  ;;  %v1201_v43 = vpop.f32.mrb[8].mxu1 }
 0x106   : > { %v674_v44 = vadd.f32 %v4010_v0, %v673_v42  ;;  %v1202_v45 = vadd.f32 %v4010_v0, %v1201_v43  ;;  %v3135_v46 = vpop.f32.mrb[9].mxu0  ;;  %v3245_v47 = vpop.f32.mrb[9].mxu1 }
 0x107   : > { %v676_v50 = vpop.f32.mrb[10].mxu0  ;;  %v1204_v51 = vpop.f32.mrb[10].mxu1 }
 0x108   : > { %v859_v52 = vmax.f32 %v674_v44, 0.0  ;;  %v1387_v53 = vmax.f32 %v1202_v45, 0.0  ;;  %v677_v54 = vadd.f32 %v4010_v0, %v676_v50  ;;  %v1205_v55 = vadd.f32 %v4010_v0, %v1204_v51  ;;  %v3136_v56 = vpop.f32.mrb[11].mxu0  ;;  %v3246_v57 = vpop.f32.mrb[11].mxu1  ;;  %v3635_v50 = vld [vmem:[%s3829_s19 + $0x38] sm:$0xff]  }
 0x109   : > { %v3636_v51 = vld [vmem:[%s3835_s23 + $0x38] sm:$0xff]  }
 0x10a   : > { %v4054_v58 = vmax.f32 %v859_v52, %v1387_v53  ;;  %v860_v59 = vmax.f32 %v677_v54, 0.0  ;;  %v1388_v60 = vmax.f32 %v1205_v55, 0.0  ;;  %3362 = vmatmul.mubr.msk.bf16.gmra.mrb[116].mxu0 %vm540_vm3, %v3629_v48  ;;  %3472 = vmatmul.mubr.msk.bf16.gmra.mrb[116].mxu1 %vm540_vm3, %v3630_v49 }
 0x10b   : > { %3365 = vmatprep.mubr.msk.bf16.mxu0 %vm3683_vm2, %v3681_v1  ;;  %3475 = vmatprep.mubr.msk.bf16.mxu1 %vm3683_vm2, %v3681_v1 }
 0x10c   : > { %v4062_v61 = vmax.f32 %v860_v59, %v1388_v60 }
 0x10d   : > { %v681_v62 = vpop.f32.mrb[12].mxu0  ;;  %v1209_v63 = vpop.f32.mrb[12].mxu1 }
 0x10e   : > { %v682_v2 = vadd.f32 %v4010_v0, %v681_v62  ;;  %v1210_v3 = vadd.f32 %v4010_v0, %v1209_v63  ;;  %v3139_v4 = vpop.f32.mrb[13].mxu0  ;;  %v3249_v5 = vpop.f32.mrb[13].mxu1 }
 0x10f   : > { %v684_v8 = vpop.f32.mrb[14].mxu0  ;;  %v1212_v9 = vpop.f32.mrb[14].mxu1 }
 0x110   : > { %v861_v10 = vmax.f32 %v682_v2, 0.0  ;;  %v1389_v11 = vmax.f32 %v1210_v3, 0.0  ;;  %v685_v12 = vadd.f32 %v4010_v0, %v684_v8  ;;  %v1213_v13 = vadd.f32 %v4010_v0, %v1212_v9  ;;  %v3140_v14 = vpop.f32.mrb[15].mxu0  ;;  %v3250_v15 = vpop.f32.mrb[15].mxu1 }
 0x112   : > { %v4070_v16 = vmax.f32 %v861_v10, %v1389_v11  ;;  %v862_v17 = vmax.f32 %v685_v12, 0.0  ;;  %v1390_v19 = vmax.f32 %v1213_v13, 0.0  ;;  %3366 = vmatmul.mubr.msk.bf16.gmra.mrb[120].mxu0 %vm540_vm3, %v3631_v6  ;;  %3476 = vmatmul.mubr.msk.bf16.gmra.mrb[120].mxu1 %vm540_vm3, %v3632_v7  ;;  %v3637_v10 = vld [vmem:[%s3829_s19 + $0x40] sm:$0xff]  }
 0x113   : > { %3369 = vmatprep.mubr.msk.bf16.mxu0 %vm3683_vm2, %v3681_v1  ;;  %3479 = vmatprep.mubr.msk.bf16.mxu1 %vm3683_vm2, %v3681_v1  ;;  %v3638_v11 = vld [vmem:[%s3835_s23 + $0x40] sm:$0xff]  }
 0x114   : > { %v4078_v20 = vmax.f32 %v862_v17, %v1390_v19 }
 0x115   : > { %v689_v22 = vpop.f32.mrb[16].mxu0  ;;  %v1217_v23 = vpop.f32.mrb[16].mxu1 }
 0x116   : > { %v690_v24 = vadd.f32 %v4010_v0, %v689_v22  ;;  %v1218_v25 = vadd.f32 %v4010_v0, %v1217_v23  ;;  %v3143_v26 = vpop.f32.mrb[17].mxu0  ;;  %v3253_v27 = vpop.f32.mrb[17].mxu1 }
 0x117   : > { %v692_v30 = vpop.f32.mrb[18].mxu0  ;;  %v1220_v31 = vpop.f32.mrb[18].mxu1 }
 0x118   : > { %v863_v32 = vmax.f32 %v690_v24, 0.0  ;;  %v1391_v33 = vmax.f32 %v1218_v25, 0.0  ;;  %v693_v34 = vadd.f32 %v4010_v0, %v692_v30  ;;  %v1221_v35 = vadd.f32 %v4010_v0, %v1220_v31  ;;  %v3144_v36 = vpop.f32.mrb[19].mxu0  ;;  %v3254_v37 = vpop.f32.mrb[19].mxu1 }
 0x11a   : > { %v4086_v39 = vmax.f32 %v863_v32, %v1391_v33  ;;  %v864_v40 = vmax.f32 %v693_v34, 0.0  ;;  %v1392_v42 = vmax.f32 %v1221_v35, 0.0  ;;  %3370 = vmatmul.mubr.msk.bf16.gmra.mrb[124].mxu0 %vm540_vm3, %v3633_v28  ;;  %3480 = vmatmul.mubr.msk.bf16.gmra.mrb[124].mxu1 %vm540_vm3, %v3634_v29  ;;  %v3639_v34 = vld [vmem:[%s3829_s19 + $0x48] sm:$0xff]  }
 0x11b   : > { %3373 = vmatprep.mubr.msk.bf16.mxu0 %vm3683_vm2, %v3681_v1  ;;  %3483 = vmatprep.mubr.msk.bf16.mxu1 %vm3683_vm2, %v3681_v1  ;;  %v3640_v35 = vld [vmem:[%s3835_s23 + $0x48] sm:$0xff]  }
 0x11c   : > { %v4094_v43 = vmax.f32 %v864_v40, %v1392_v42 }
 0x11d   : > { %v697_v44 = vpop.f32.mrb[20].mxu0  ;;  %v1225_v45 = vpop.f32.mrb[20].mxu1 }
 0x11e   : > { %v698_v46 = vadd.f32 %v4010_v0, %v697_v44  ;;  %v1226_v47 = vadd.f32 %v4010_v0, %v1225_v45  ;;  %v3147_v48 = vpop.f32.mrb[21].mxu0  ;;  %v3257_v49 = vpop.f32.mrb[21].mxu1 }
 0x11f   : > { %v700_v52 = vpop.f32.mrb[22].mxu0  ;;  %v1228_v53 = vpop.f32.mrb[22].mxu1 }
 0x120   : > { %v865_v54 = vmax.f32 %v698_v46, 0.0  ;;  %v1393_v55 = vmax.f32 %v1226_v47, 0.0  ;;  %v701_v56 = vadd.f32 %v4010_v0, %v700_v52  ;;  %v1229_v57 = vadd.f32 %v4010_v0, %v1228_v53  ;;  %v3148_v59 = vpop.f32.mrb[23].mxu0  ;;  %v3258_v60 = vpop.f32.mrb[23].mxu1 }
 0x121   : > { %v3641_v59 = vld [vmem:[%s3829_s19 + $0x50] sm:$0xff]  }
 0x122   : > { %v4102_v62 = vmax.f32 %v865_v54, %v1393_v55  ;;  %v866_v63 = vmax.f32 %v701_v56, 0.0  ;;  %v1394_v2 = vmax.f32 %v1229_v57, 0.0  ;;  %3374 = vmatmul.mubr.msk.bf16.gmra.mrb[128].mxu0 %vm540_vm3, %v3635_v50  ;;  %3484 = vmatmul.mubr.msk.bf16.gmra.mrb[128].mxu1 %vm540_vm3, %v3636_v51  ;;  %v3642_v60 = vld [vmem:[%s3835_s23 + $0x50] sm:$0xff]  }
 0x123   : > { %3377 = vmatprep.mubr.msk.bf16.mxu0 %vm3683_vm2, %v3681_v1  ;;  %3487 = vmatprep.mubr.msk.bf16.mxu1 %vm3683_vm2, %v3681_v1 }
 0x124   : > { %v4110_v3 = vmax.f32 %v866_v63, %v1394_v2 }
 0x125   : > { %v705_v4 = vpop.f32.mrb[24].mxu0  ;;  %v1233_v5 = vpop.f32.mrb[24].mxu1 }
 0x126   : > { %v706_v6 = vadd.f32 %v4010_v0, %v705_v4  ;;  %v1234_v7 = vadd.f32 %v4010_v0, %v1233_v5  ;;  %v3151_v8 = vpop.f32.mrb[25].mxu0  ;;  %v3261_v9 = vpop.f32.mrb[25].mxu1 }
 0x127   : > { %v708_v12 = vpop.f32.mrb[26].mxu0  ;;  %v1236_v13 = vpop.f32.mrb[26].mxu1 }
 0x128   : > { %v867_v14 = vmax.f32 %v706_v6, 0.0  ;;  %v1395_v15 = vmax.f32 %v1234_v7, 0.0  ;;  %v709_v17 = vadd.f32 %v4010_v0, %v708_v12  ;;  %v1237_v19 = vadd.f32 %v4010_v0, %v1236_v13  ;;  %v3152_v22 = vpop.f32.mrb[27].mxu0  ;;  %v3262_v23 = vpop.f32.mrb[27].mxu1 }
 0x12a   : > { %v4118_v24 = vmax.f32 %v867_v14, %v1395_v15  ;;  %v868_v25 = vmax.f32 %v709_v17, 0.0  ;;  %v1396_v26 = vmax.f32 %v1237_v19, 0.0  ;;  %3378 = vmatmul.mubr.msk.bf16.gmra.mrb[132].mxu0 %vm540_vm3, %v3637_v10  ;;  %3488 = vmatmul.mubr.msk.bf16.gmra.mrb[132].mxu1 %vm540_vm3, %v3638_v11 }
 0x12b   : > { %3381 = vmatprep.mubr.msk.bf16.mxu0 %vm3683_vm2, %v3681_v1  ;;  %3491 = vmatprep.mubr.msk.bf16.mxu1 %vm3683_vm2, %v3681_v1 }
 0x12c   : > { %v4126_v27 = vmax.f32 %v868_v25, %v1396_v26  ;;  %v3643_v25 = vld [vmem:[%s3829_s19 + $0x58] sm:$0xff]  }
 0x12d   : > { %v713_v28 = vpop.f32.mrb[28].mxu0  ;;  %v1241_v29 = vpop.f32.mrb[28].mxu1  ;;  %v3644_v26 = vld [vmem:[%s3835_s23 + $0x58] sm:$0xff]  }
 0x12e   : > { %v714_v30 = vadd.f32 %v4010_v0, %v713_v28  ;;  %v1242_v31 = vadd.f32 %v4010_v0, %v1241_v29  ;;  %v3155_v32 = vpop.f32.mrb[29].mxu0  ;;  %v3265_v33 = vpop.f32.mrb[29].mxu1 }
 0x12f   : > { %v716_v36 = vpop.f32.mrb[30].mxu0  ;;  %v1244_v37 = vpop.f32.mrb[30].mxu1 }
 0x130   : > { %v869_v40 = vmax.f32 %v714_v30, 0.0  ;;  %v1397_v42 = vmax.f32 %v1242_v31, 0.0  ;;  %v717_v44 = vadd.f32 %v4010_v0, %v716_v36  ;;  %v1245_v45 = vadd.f32 %v4010_v0, %v1244_v37  ;;  %v3156_v46 = vpop.f32.mrb[31].mxu0  ;;  %v3266_v47 = vpop.f32.mrb[31].mxu1 }
 0x132   : > { %v4134_v48 = vmax.f32 %v869_v40, %v1397_v42  ;;  %v870_v49 = vmax.f32 %v717_v44, 0.0  ;;  %v1398_v50 = vmax.f32 %v1245_v45, 0.0  ;;  %3382 = vmatmul.mubr.msk.bf16.gmra.mrb[136].mxu0 %vm540_vm3, %v3639_v34  ;;  %3492 = vmatmul.mubr.msk.bf16.gmra.mrb[136].mxu1 %vm540_vm3, %v3640_v35 }
 0x133   : > { %3385 = vmatprep.mubr.msk.bf16.mxu0 %vm3683_vm2, %v3681_v1  ;;  %3495 = vmatprep.mubr.msk.bf16.mxu1 %vm3683_vm2, %v3681_v1 }
 0x134   : > { %v4142_v51 = vmax.f32 %v870_v49, %v1398_v50 }
 0x135   : > { %v721_v52 = vpop.f32.mrb[32].mxu0  ;;  %v1249_v53 = vpop.f32.mrb[32].mxu1 }
 0x136   : > { %v722_v54 = vadd.f32 %v4010_v0, %v721_v52  ;;  %v1250_v55 = vadd.f32 %v4010_v0, %v1249_v53  ;;  %v3159_v56 = vpop.f32.mrb[33].mxu0  ;;  %v3269_v57 = vpop.f32.mrb[33].mxu1  ;;  %v3645_v52 = vld [vmem:[%s3829_s19 + $0x60] sm:$0xff]  }
 0x137   : > { %v724_v63 = vpop.f32.mrb[34].mxu0  ;;  %v1252_v2 = vpop.f32.mrb[34].mxu1  ;;  %v3646_v53 = vld [vmem:[%s3835_s23 + $0x60] sm:$0xff]  }
 0x138   : > { %v871_v4 = vmax.f32 %v722_v54, 0.0  ;;  %v1399_v5 = vmax.f32 %v1250_v55, 0.0  ;;  %v725_v6 = vadd.f32 %v4010_v0, %v724_v63  ;;  %v1253_v7 = vadd.f32 %v4010_v0, %v1252_v2  ;;  %v3160_v8 = vpop.f32.mrb[35].mxu0  ;;  %v3270_v9 = vpop.f32.mrb[35].mxu1 }
 0x13a   : > { %v4150_v10 = vmax.f32 %v871_v4, %v1399_v5  ;;  %v872_v11 = vmax.f32 %v725_v6, 0.0  ;;  %v1400_v12 = vmax.f32 %v1253_v7, 0.0  ;;  %3386 = vmatmul.mubr.msk.bf16.gmra.mrb[140].mxu0 %vm540_vm3, %v3641_v59  ;;  %3496 = vmatmul.mubr.msk.bf16.gmra.mrb[140].mxu1 %vm540_vm3, %v3642_v60 }
 0x13b   : > { %3389 = vmatprep.mubr.msk.bf16.mxu0 %vm3683_vm2, %v3681_v1  ;;  %3499 = vmatprep.mubr.msk.bf16.mxu1 %vm3683_vm2, %v3681_v1 }
 0x13c   : > { %v4158_v13 = vmax.f32 %v872_v11, %v1400_v12 }
 0x13d   : > { %v729_v14 = vpop.f32.mrb[36].mxu0  ;;  %v1257_v15 = vpop.f32.mrb[36].mxu1 }
 0x13e   : > { %v730_v17 = vadd.f32 %v4010_v0, %v729_v14  ;;  %v1258_v19 = vadd.f32 %v4010_v0, %v1257_v15  ;;  %v3163_v22 = vpop.f32.mrb[37].mxu0  ;;  %v3273_v23 = vpop.f32.mrb[37].mxu1 }
 0x13f   : > { %v732_v28 = vpop.f32.mrb[38].mxu0  ;;  %v1260_v29 = vpop.f32.mrb[38].mxu1 }
 0x140   : > { %v873_v30 = vmax.f32 %v730_v17, 0.0  ;;  %v1401_v31 = vmax.f32 %v1258_v19, 0.0  ;;  %v733_v32 = vadd.f32 %v4010_v0, %v732_v28  ;;  %v1261_v33 = vadd.f32 %v4010_v0, %v1260_v29  ;;  %v3164_v34 = vpop.f32.mrb[39].mxu0  ;;  %v3274_v35 = vpop.f32.mrb[39].mxu1  ;;  %v3647_v17 = vld [vmem:[%s3829_s19 + $0x68] sm:$0xff]  }
 0x141   : > { %v3648_v19 = vld [vmem:[%s3835_s23 + $0x68] sm:$0xff]  }
 0x142   : > { %v4166_v36 = vmax.f32 %v873_v30, %v1401_v31  ;;  %v874_v37 = vmax.f32 %v733_v32, 0.0  ;;  %v1402_v40 = vmax.f32 %v1261_v33, 0.0  ;;  %3390 = vmatmul.mubr.msk.bf16.gmra.mrb[144].mxu0 %vm540_vm3, %v3643_v25  ;;  %3500 = vmatmul.mubr.msk.bf16.gmra.mrb[144].mxu1 %vm540_vm3, %v3644_v26 }
 0x143   : > { %3393 = vmatprep.mubr.msk.bf16.mxu0 %vm3683_vm2, %v3681_v1  ;;  %3503 = vmatprep.mubr.msk.bf16.mxu1 %vm3683_vm2, %v3681_v1 }
 0x144   : > { %v4174_v42 = vmax.f32 %v874_v37, %v1402_v40 }
 0x145   : > { %v737_v44 = vpop.f32.mrb[40].mxu0  ;;  %v1265_v45 = vpop.f32.mrb[40].mxu1 }
 0x146   : > { %v738_v46 = vadd.f32 %v4010_v0, %v737_v44  ;;  %v1266_v47 = vadd.f32 %v4010_v0, %v1265_v45  ;;  %v3167_v49 = vpop.f32.mrb[41].mxu0  ;;  %v3277_v50 = vpop.f32.mrb[41].mxu1 }
 0x147   : > { %v740_v54 = vpop.f32.mrb[42].mxu0  ;;  %v1268_v55 = vpop.f32.mrb[42].mxu1  ;;  %v3649_v49 = vld [vmem:[%s3829_s19 + $0x70] sm:$0xff]  }
 0x148   : > { %v875_v56 = vmax.f32 %v738_v46, 0.0  ;;  %v1403_v57 = vmax.f32 %v1266_v47, 0.0  ;;  %v741_v59 = vadd.f32 %v4010_v0, %v740_v54  ;;  %v1269_v60 = vadd.f32 %v4010_v0, %v1268_v55  ;;  %v3168_v63 = vpop.f32.mrb[43].mxu0  ;;  %v3278_v2 = vpop.f32.mrb[43].mxu1  ;;  %v3650_v50 = vld [vmem:[%s3835_s23 + $0x70] sm:$0xff]  }
 0x14a   : > { %v4182_v4 = vmax.f32 %v875_v56, %v1403_v57  ;;  %v876_v5 = vmax.f32 %v741_v59, 0.0  ;;  %v1404_v6 = vmax.f32 %v1269_v60, 0.0  ;;  %3394 = vmatmul.mubr.msk.bf16.gmra.mrb[148].mxu0 %vm540_vm3, %v3645_v52  ;;  %3504 = vmatmul.mubr.msk.bf16.gmra.mrb[148].mxu1 %vm540_vm3, %v3646_v53 }
 0x14b   : > { %3397 = vmatprep.mubr.msk.bf16.mxu0 %vm3683_vm2, %v3681_v1  ;;  %3507 = vmatprep.mubr.msk.bf16.mxu1 %vm3683_vm2, %v3681_v1 }
 0x14c   : > { %v4190_v7 = vmax.f32 %v876_v5, %v1404_v6 }
 0x14d   : > { %v745_v8 = vpop.f32.mrb[44].mxu0  ;;  %v1273_v9 = vpop.f32.mrb[44].mxu1 }
 0x14e   : > { %v746_v11 = vadd.f32 %v4010_v0, %v745_v8  ;;  %v1274_v12 = vadd.f32 %v4010_v0, %v1273_v9  ;;  %v3171_v14 = vpop.f32.mrb[45].mxu0  ;;  %v3281_v15 = vpop.f32.mrb[45].mxu1 }
 0x14f   : > { %v748_v22 = vpop.f32.mrb[46].mxu0  ;;  %v1276_v23 = vpop.f32.mrb[46].mxu1 }
 0x150   : > { %v877_v25 = vmax.f32 %v746_v11, 0.0  ;;  %v1405_v26 = vmax.f32 %v1274_v12, 0.0  ;;  %v749_v28 = vadd.f32 %v4010_v0, %v748_v22  ;;  %v1277_v29 = vadd.f32 %v4010_v0, %v1276_v23  ;;  %v3172_v30 = vpop.f32.mrb[47].mxu0  ;;  %v3282_v31 = vpop.f32.mrb[47].mxu1 }
 0x152   : > { %v4198_v32 = vmax.f32 %v877_v25, %v1405_v26  ;;  %v878_v33 = vmax.f32 %v749_v28, 0.0  ;;  %v1406_v34 = vmax.f32 %v1277_v29, 0.0  ;;  %3398 = vmatmul.mubr.msk.bf16.gmra.mrb[152].mxu0 %vm540_vm3, %v3647_v17  ;;  %3508 = vmatmul.mubr.msk.bf16.gmra.mrb[152].mxu1 %vm540_vm3, %v3648_v19  ;;  %v3651_v17 = vld [vmem:[%s3829_s19 + $0x78] sm:$0xff]  }
 0x153   : > { %3401 = vmatprep.mubr.msk.bf16.mxu0 %vm3683_vm2, %v3681_v1  ;;  %3511 = vmatprep.mubr.msk.bf16.mxu1 %vm3683_vm2, %v3681_v1  ;;  %v3652_v19 = vld [vmem:[%s3835_s23 + $0x78] sm:$0xff]  }
 0x154   : > { %v4206_v35 = vmax.f32 %v878_v33, %v1406_v34 }
 0x155   : > { %v753_v37 = vpop.f32.mrb[48].mxu0  ;;  %v1281_v40 = vpop.f32.mrb[48].mxu1 }
 0x156   : > { %v754_v44 = vadd.f32 %v4010_v0, %v753_v37  ;;  %v1282_v45 = vadd.f32 %v4010_v0, %v1281_v40  ;;  %v3175_v46 = vpop.f32.mrb[49].mxu0  ;;  %v3285_v47 = vpop.f32.mrb[49].mxu1 }
 0x157   : > { %v756_v52 = vpop.f32.mrb[50].mxu0  ;;  %v1284_v53 = vpop.f32.mrb[50].mxu1 }
 0x158   : > { %v879_v54 = vmax.f32 %v754_v44, 0.0  ;;  %v1407_v55 = vmax.f32 %v1282_v45, 0.0  ;;  %v757_v56 = vadd.f32 %v4010_v0, %v756_v52  ;;  %v1285_v57 = vadd.f32 %v4010_v0, %v1284_v53  ;;  %v3176_v59 = vpop.f32.mrb[51].mxu0  ;;  %v3286_v60 = vpop.f32.mrb[51].mxu1  ;;  %v3653_v52 = vld [vmem:[%s3829_s19 + $0x80] sm:$0xff]  }
 0x159   : > { %v3654_v53 = vld [vmem:[%s3835_s23 + $0x80] sm:$0xff]  }
 0x15a   : > { %v4214_v63 = vmax.f32 %v879_v54, %v1407_v55  ;;  %v880_v2 = vmax.f32 %v757_v56, 0.0  ;;  %v1408_v5 = vmax.f32 %v1285_v57, 0.0  ;;  %3402 = vmatmul.mubr.msk.bf16.gmra.mrb[156].mxu0 %vm540_vm3, %v3649_v49  ;;  %3512 = vmatmul.mubr.msk.bf16.gmra.mrb[156].mxu1 %vm540_vm3, %v3650_v50 }
 0x15b   : > { %3405 = vmatprep.mubr.msk.bf16.mxu0 %vm3683_vm2, %v3681_v1  ;;  %3515 = vmatprep.mubr.msk.bf16.mxu1 %vm3683_vm2, %v3681_v1 }
 0x15c   : > { %v4222_v6 = vmax.f32 %v880_v2, %v1408_v5 }
 0x15d   : > { %v761_v8 = vpop.f32.mrb[52].mxu0  ;;  %v1289_v9 = vpop.f32.mrb[52].mxu1 }
 0x15e   : > { %v762_v11 = vadd.f32 %v4010_v0, %v761_v8  ;;  %v1290_v12 = vadd.f32 %v4010_v0, %v1289_v9  ;;  %v3179_v14 = vpop.f32.mrb[53].mxu0  ;;  %v3289_v15 = vpop.f32.mrb[53].mxu1 }
 0x15f   : > { %v764_v22 = vpop.f32.mrb[54].mxu0  ;;  %v1292_v23 = vpop.f32.mrb[54].mxu1 }
 0x160   : > { %v881_v25 = vmax.f32 %v762_v11, 0.0  ;;  %v1409_v26 = vmax.f32 %v1290_v12, 0.0  ;;  %v765_v28 = vadd.f32 %v4010_v0, %v764_v22  ;;  %v1293_v29 = vadd.f32 %v4010_v0, %v1292_v23  ;;  %v3180_v30 = vpop.f32.mrb[55].mxu0  ;;  %v3290_v31 = vpop.f32.mrb[55].mxu1 }
 0x162   : > { %v4230_v33 = vmax.f32 %v881_v25, %v1409_v26  ;;  %v882_v34 = vmax.f32 %v765_v28, 0.0  ;;  %v1410_v37 = vmax.f32 %v1293_v29, 0.0  ;;  %3406 = vmatmul.mubr.msk.bf16.gmra.mrb[160].mxu0 %vm540_vm3, %v3651_v17  ;;  %3516 = vmatmul.mubr.msk.bf16.gmra.mrb[160].mxu1 %vm540_vm3, %v3652_v19  ;;  %v3655_v25 = vld [vmem:[%s3829_s19 + $0x88] sm:$0xff]  }
 0x163   : > { %3409 = vmatprep.mubr.msk.bf16.mxu0 %vm3683_vm2, %v3681_v1  ;;  %3519 = vmatprep.mubr.msk.bf16.mxu1 %vm3683_vm2, %v3681_v1  ;;  %v3656_v26 = vld [vmem:[%s3835_s23 + $0x88] sm:$0xff]  }
 0x164   : > { %v4238_v40 = vmax.f32 %v882_v34, %v1410_v37 }
 0x165   : > { %v769_v44 = vpop.f32.mrb[56].mxu0  ;;  %v1297_v45 = vpop.f32.mrb[56].mxu1 }
 0x166   : > { %v770_v46 = vadd.f32 %v4010_v0, %v769_v44  ;;  %v1298_v47 = vadd.f32 %v4010_v0, %v1297_v45  ;;  %v3183_v49 = vpop.f32.mrb[57].mxu0  ;;  %v3293_v50 = vpop.f32.mrb[57].mxu1 }
 0x167   : > { %v772_v54 = vpop.f32.mrb[58].mxu0  ;;  %v1300_v55 = vpop.f32.mrb[58].mxu1 }
 0x168   : > { %v883_v56 = vmax.f32 %v770_v46, 0.0  ;;  %v1411_v57 = vmax.f32 %v1298_v47, 0.0  ;;  %v773_v59 = vadd.f32 %v4010_v0, %v772_v54  ;;  %v1301_v60 = vadd.f32 %v4010_v0, %v1300_v55  ;;  %v3184_v2 = vpop.f32.mrb[59].mxu0  ;;  %v3294_v5 = vpop.f32.mrb[59].mxu1 }
 0x16a   : > { %v4246_v8 = vmax.f32 %v883_v56, %v1411_v57  ;;  %v884_v9 = vmax.f32 %v773_v59, 0.0  ;;  %v1412_v11 = vmax.f32 %v1301_v60, 0.0  ;;  %3410 = vmatmul.mubr.msk.bf16.gmra.mrb[164].mxu0 %vm540_vm3, %v3653_v52  ;;  %3520 = vmatmul.mubr.msk.bf16.gmra.mrb[164].mxu1 %vm540_vm3, %v3654_v53  ;;  %v3657_v59 = vld [vmem:[%s3829_s19 + $0x90] sm:$0xff]  }
 0x16b   : > { %3413 = vmatprep.mubr.msk.bf16.mxu0 %vm3683_vm2, %v3681_v1  ;;  %3523 = vmatprep.mubr.msk.bf16.mxu1 %vm3683_vm2, %v3681_v1  ;;  %v3658_v60 = vld [vmem:[%s3835_s23 + $0x90] sm:$0xff]  }
 0x16c   : > { %v4254_v12 = vmax.f32 %v884_v9, %v1412_v11 }
 0x16d   : > { %v777_v14 = vpop.f32.mrb[60].mxu0  ;;  %v1305_v15 = vpop.f32.mrb[60].mxu1 }
 0x16e   : > { %v778_v17 = vadd.f32 %v4010_v0, %v777_v14  ;;  %v1306_v19 = vadd.f32 %v4010_v0, %v1305_v15  ;;  %v3187_v22 = vpop.f32.mrb[61].mxu0  ;;  %v3297_v23 = vpop.f32.mrb[61].mxu1 }
 0x16f   : > { %v780_v28 = vpop.f32.mrb[62].mxu0  ;;  %v1308_v29 = vpop.f32.mrb[62].mxu1 }
 0x170   : > { %v885_v30 = vmax.f32 %v778_v17, 0.0  ;;  %v1413_v31 = vmax.f32 %v1306_v19, 0.0  ;;  %v781_v34 = vadd.f32 %v4010_v0, %v780_v28  ;;  %v1309_v37 = vadd.f32 %v4010_v0, %v1308_v29  ;;  %v3188_v44 = vpop.f32.mrb[63].mxu0  ;;  %v3298_v45 = vpop.f32.mrb[63].mxu1 }
 0x171   : > { %v3659_v44 = vld [vmem:[%s3829_s19 + $0x98] sm:$0xff]  }
 0x172   : > { %v4262_v46 = vmax.f32 %v885_v30, %v1413_v31  ;;  %v886_v47 = vmax.f32 %v781_v34, 0.0  ;;  %v1414_v49 = vmax.f32 %v1309_v37, 0.0  ;;  %3414 = vmatmul.mubr.msk.bf16.gmra.mrb[168].mxu0 %vm540_vm3, %v3655_v25  ;;  %3524 = vmatmul.mubr.msk.bf16.gmra.mrb[168].mxu1 %vm540_vm3, %v3656_v26  ;;  %v3660_v45 = vld [vmem:[%s3835_s23 + $0x98] sm:$0xff]  }
 0x173   : > { %3417 = vmatprep.mubr.msk.bf16.mxu0 %vm3683_vm2, %v3681_v1  ;;  %3527 = vmatprep.mubr.msk.bf16.mxu1 %vm3683_vm2, %v3681_v1 }
 0x174   : > { %v4270_v50 = vmax.f32 %v886_v47, %v1414_v49 }
 0x175   : > { %v785_v52 = vpop.f32.mrb[64].mxu0  ;;  %v1313_v53 = vpop.f32.mrb[64].mxu1 }
 0x176   : > { %v786_v54 = vadd.f32 %v4010_v0, %v785_v52  ;;  %v1314_v55 = vadd.f32 %v4010_v0, %v1313_v53  ;;  %v3191_v56 = vpop.f32.mrb[65].mxu0  ;;  %v3301_v57 = vpop.f32.mrb[65].mxu1 }
 0x177   : > { %v788_v2 = vpop.f32.mrb[66].mxu0  ;;  %v1316_v5 = vpop.f32.mrb[66].mxu1 }
 0x178   : > { %v887_v9 = vmax.f32 %v786_v54, 0.0  ;;  %v1415_v11 = vmax.f32 %v1314_v55, 0.0  ;;  %v789_v14 = vadd.f32 %v4010_v0, %v788_v2  ;;  %v1317_v15 = vadd.f32 %v4010_v0, %v1316_v5  ;;  %v3192_v17 = vpop.f32.mrb[67].mxu0  ;;  %v3302_v19 = vpop.f32.mrb[67].mxu1 }
 0x17a   : > { %v4278_v22 = vmax.f32 %v887_v9, %v1415_v11  ;;  %v888_v23 = vmax.f32 %v789_v14, 0.0  ;;  %v1416_v25 = vmax.f32 %v1317_v15, 0.0  ;;  %3418 = vmatmul.mubr.msk.bf16.gmra.mrb[172].mxu0 %vm540_vm3, %v3657_v59  ;;  %3528 = vmatmul.mubr.msk.bf16.gmra.mrb[172].mxu1 %vm540_vm3, %v3658_v60 }
 0x17b   : > { %3421 = vmatprep.mubr.msk.bf16.mxu0 %vm3683_vm2, %v3681_v1  ;;  %3531 = vmatprep.mubr.msk.bf16.mxu1 %vm3683_vm2, %v3681_v1 }
 0x17c   : > { %v4286_v26 = vmax.f32 %v888_v23, %v1416_v25  ;;  %v3661_v23 = vld [vmem:[%s3829_s19 + $0xa0] sm:$0xff]  }
 0x17d   : > { %v793_v28 = vpop.f32.mrb[68].mxu0  ;;  %v1321_v29 = vpop.f32.mrb[68].mxu1  ;;  %v3662_v25 = vld [vmem:[%s3835_s23 + $0xa0] sm:$0xff]  }
 0x17e   : > { %v794_v30 = vadd.f32 %v4010_v0, %v793_v28  ;;  %v1322_v31 = vadd.f32 %v4010_v0, %v1321_v29  ;;  %v3195_v34 = vpop.f32.mrb[69].mxu0  ;;  %v3305_v37 = vpop.f32.mrb[69].mxu1 }
 0x17f   : > { %v796_v47 = vpop.f32.mrb[70].mxu0  ;;  %v1324_v49 = vpop.f32.mrb[70].mxu1 }
 0x180   : > { %v889_v52 = vmax.f32 %v794_v30, 0.0  ;;  %v1417_v53 = vmax.f32 %v1322_v31, 0.0  ;;  %v797_v54 = vadd.f32 %v4010_v0, %v796_v47  ;;  %v1325_v55 = vadd.f32 %v4010_v0, %v1324_v49  ;;  %v3196_v56 = vpop.f32.mrb[71].mxu0  ;;  %v3306_v57 = vpop.f32.mrb[71].mxu1 }
 0x182   : > { %v4294_v59 = vmax.f32 %v889_v52, %v1417_v53  ;;  %v890_v60 = vmax.f32 %v797_v54, 0.0  ;;  %v1418_v2 = vmax.f32 %v1325_v55, 0.0  ;;  %3422 = vmatmul.mubr.msk.bf16.gmra.mrb[176].mxu0 %vm540_vm3, %v3659_v44  ;;  %3532 = vmatmul.mubr.msk.bf16.gmra.mrb[176].mxu1 %vm540_vm3, %v3660_v45 }
 0x183   : > { %3425 = vmatprep.mubr.msk.bf16.mxu0 %vm3683_vm2, %v3681_v1  ;;  %3535 = vmatprep.mubr.msk.bf16.mxu1 %vm3683_vm2, %v3681_v1 }
 0x184   : > { %v4302_v5 = vmax.f32 %v890_v60, %v1418_v2 }
 0x185   : > { %v801_v9 = vpop.f32.mrb[72].mxu0  ;;  %v1329_v11 = vpop.f32.mrb[72].mxu1 }
 0x186   : > { %v802_v14 = vadd.f32 %v4010_v0, %v801_v9  ;;  %v1330_v15 = vadd.f32 %v4010_v0, %v1329_v11  ;;  %v3199_v17 = vpop.f32.mrb[73].mxu0  ;;  %v3309_v19 = vpop.f32.mrb[73].mxu1  ;;  %v3663_v9 = vld [vmem:[%s3829_s19 + $0xa8] sm:$0xff]  }
 0x187   : > { %v804_v28 = vpop.f32.mrb[74].mxu0  ;;  %v1332_v29 = vpop.f32.mrb[74].mxu1  ;;  %v3664_v11 = vld [vmem:[%s3835_s23 + $0xa8] sm:$0xff]  }
 0x188   : > { %v891_v30 = vmax.f32 %v802_v14, 0.0  ;;  %v1419_v31 = vmax.f32 %v1330_v15, 0.0  ;;  %v805_v34 = vadd.f32 %v4010_v0, %v804_v28  ;;  %v1333_v37 = vadd.f32 %v4010_v0, %v1332_v29  ;;  %v3200_v44 = vpop.f32.mrb[75].mxu0  ;;  %v3310_v45 = vpop.f32.mrb[75].mxu1 }
 0x18a   : > { %v4310_v47 = vmax.f32 %v891_v30, %v1419_v31  ;;  %v892_v49 = vmax.f32 %v805_v34, 0.0  ;;  %v1420_v52 = vmax.f32 %v1333_v37, 0.0  ;;  %3426 = vmatmul.mubr.msk.bf16.gmra.mrb[180].mxu0 %vm540_vm3, %v3661_v23  ;;  %3536 = vmatmul.mubr.msk.bf16.gmra.mrb[180].mxu1 %vm540_vm3, %v3662_v25 }
 0x18b   : > { %3429 = vmatprep.mubr.msk.bf16.mxu0 %vm3683_vm2, %v3681_v1  ;;  %3539 = vmatprep.mubr.msk.bf16.mxu1 %vm3683_vm2, %v3681_v1 }
 0x18c   : > { %v4318_v53 = vmax.f32 %v892_v49, %v1420_v52 }
 0x18d   : > { %v809_v54 = vpop.f32.mrb[76].mxu0  ;;  %v1337_v55 = vpop.f32.mrb[76].mxu1 }
 0x18e   : > { %v810_v56 = vadd.f32 %v4010_v0, %v809_v54  ;;  %v1338_v57 = vadd.f32 %v4010_v0, %v1337_v55  ;;  %v3203_v60 = vpop.f32.mrb[77].mxu0  ;;  %v3313_v2 = vpop.f32.mrb[77].mxu1 }
 0x18f   : > { %v812_v14 = vpop.f32.mrb[78].mxu0  ;;  %v1340_v15 = vpop.f32.mrb[78].mxu1 }
 0x190   : > { %v893_v17 = vmax.f32 %v810_v56, 0.0  ;;  %v1421_v19 = vmax.f32 %v1338_v57, 0.0  ;;  %v813_v23 = vadd.f32 %v4010_v0, %v812_v14  ;;  %v1341_v25 = vadd.f32 %v4010_v0, %v1340_v15  ;;  %v3204_v28 = vpop.f32.mrb[79].mxu0  ;;  %v3314_v29 = vpop.f32.mrb[79].mxu1  ;;  %v3665_v56 = vld [vmem:[%s3829_s19 + $0xb0] sm:$0xff]  }
 0x191   : > { %v3666_v57 = vld [vmem:[%s3835_s23 + $0xb0] sm:$0xff]  }
 0x192   : > { %v4326_v30 = vmax.f32 %v893_v17, %v1421_v19  ;;  %v894_v31 = vmax.f32 %v813_v23, 0.0  ;;  %v1422_v34 = vmax.f32 %v1341_v25, 0.0  ;;  %3430 = vmatmul.mubr.msk.bf16.gmra.mrb[184].mxu0 %vm540_vm3, %v3663_v9  ;;  %3540 = vmatmul.mubr.msk.bf16.gmra.mrb[184].mxu1 %vm540_vm3, %v3664_v11 }
 0x193   : > { %3433 = vmatprep.mubr.msk.bf16.mxu0 %vm3683_vm2, %v3681_v1  ;;  %3543 = vmatprep.mubr.msk.bf16.mxu1 %vm3683_vm2, %v3681_v1 }
 0x194   : > { %v4334_v37 = vmax.f32 %v894_v31, %v1422_v34 }
 0x195   : > { %v817_v44 = vpop.f32.mrb[80].mxu0  ;;  %v1345_v45 = vpop.f32.mrb[80].mxu1 }
 0x196   : > { %v818_v49 = vadd.f32 %v4010_v0, %v817_v44  ;;  %v1346_v52 = vadd.f32 %v4010_v0, %v1345_v45  ;;  %v3207_v54 = vpop.f32.mrb[81].mxu0  ;;  %v3317_v55 = vpop.f32.mrb[81].mxu1 }
 0x197   : > { %v820_v60 = vpop.f32.mrb[82].mxu0  ;;  %v1348_v2 = vpop.f32.mrb[82].mxu1  ;;  %v3667_v54 = vld [vmem:[%s3829_s19 + $0xb8] sm:$0xff]  }
 0x198   : > { %v895_v9 = vmax.f32 %v818_v49, 0.0  ;;  %v1423_v11 = vmax.f32 %v1346_v52, 0.0  ;;  %v821_v14 = vadd.f32 %v4010_v0, %v820_v60  ;;  %v1349_v15 = vadd.f32 %v4010_v0, %v1348_v2  ;;  %v3208_v17 = vpop.f32.mrb[83].mxu0  ;;  %v3318_v19 = vpop.f32.mrb[83].mxu1  ;;  %v3668_v55 = vld [vmem:[%s3835_s23 + $0xb8] sm:$0xff]  }
 0x19a   : > { %v4342_v23 = vmax.f32 %v895_v9, %v1423_v11  ;;  %v896_v25 = vmax.f32 %v821_v14, 0.0  ;;  %v1424_v28 = vmax.f32 %v1349_v15, 0.0  ;;  %3434 = vmatmul.mubr.msk.bf16.gmra.mrb[188].mxu0 %vm540_vm3, %v3665_v56  ;;  %3544 = vmatmul.mubr.msk.bf16.gmra.mrb[188].mxu1 %vm540_vm3, %v3666_v57  ;;  %v4359_v9 = vld [vmem:[%s4661_s5] ss:$0 sm:$0xff] }
 0x19b   : > { %3437 = vmatprep.mubr.msk.bf16.mxu0 %vm3683_vm2, %v3681_v1  ;;  %3547 = vmatprep.mubr.msk.bf16.mxu1 %vm3683_vm2, %v3681_v1 }
 0x19c   : > { %v4350_v29 = vmax.f32 %v896_v25, %v1424_v28 }
 0x19d   : > { %v825_v31 = vpop.f32.mrb[84].mxu0  ;;  %v1353_v34 = vpop.f32.mrb[84].mxu1 }
 0x19e   : > { %v826_v44 = vadd.f32 %v4010_v0, %v825_v31  ;;  %v1354_v45 = vadd.f32 %v4010_v0, %v1353_v34  ;;  %v3211_v49 = vpop.f32.mrb[85].mxu0  ;;  %v3321_v52 = vpop.f32.mrb[85].mxu1 }
 0x19f   : > { %v828_v56 = vpop.f32.mrb[86].mxu0  ;;  %v1356_v57 = vpop.f32.mrb[86].mxu1 }
 0x1a0   : > { %v897_v60 = vmax.f32 %v826_v44, 0.0  ;;  %v1425_v2 = vmax.f32 %v1354_v45, 0.0  ;;  %v829_v11 = vadd.f32 %v4359_v9, %v828_v56  ;;  %v1357_v14 = vadd.f32 %v4359_v9, %v1356_v57  ;;  %v3212_v15 = vpop.f32.mrb[87].mxu0  ;;  %v3322_v0 = vpop.f32.mrb[87].mxu1  ;;  %v3669_v56 = vld [vmem:[%s3829_s19 + $0xc0] ss:$0 sps:$4 sm:$0xff]  }
 0x1a2   : > { %v4363_v17 = vmax.f32 %v897_v60, %v1425_v2  ;;  %v898_v19 = vmax.f32 %v829_v11, 0.0  ;;  %v1426_v25 = vmax.f32 %v1357_v14, 0.0  ;;  %3438 = vmatmul.mubr.msk.bf16.gmra.mrb[192].mxu0 %vm540_vm3, %v3667_v54  ;;  %3548 = vmatmul.mubr.msk.bf16.gmra.mrb[192].mxu1 %vm540_vm3, %v3668_v55  ;;  %v3670_v54 = vld [vmem:[%s3835_s23 + $0xc0] ss:$0 sps:$4 sm:$0xff]  }
 0x1a3   : > { %3441 = vmatprep.mubr.msk.bf16.mxu0 %vm3683_vm2, %v3681_v1  ;;  %3551 = vmatprep.mubr.msk.bf16.mxu1 %vm3683_vm2, %v3681_v1 }
 0x1a4   : > { %v4371_v28 = vmax.f32 %v898_v19, %v1426_v25 }
 0x1a5   : > { %v833_v31 = vpop.f32.mrb[88].mxu0  ;;  %v1361_v34 = vpop.f32.mrb[88].mxu1 }
 0x1a6   : > { %v834_v44 = vadd.f32 %v4359_v9, %v833_v31  ;;  %v1362_v45 = vadd.f32 %v4359_v9, %v1361_v34  ;;  %v3215_v49 = vpop.f32.mrb[89].mxu0  ;;  %v3325_v52 = vpop.f32.mrb[89].mxu1 }
 0x1a7   : > { %v836_v57 = vpop.f32.mrb[90].mxu0  ;;  %v1364_v55 = vpop.f32.mrb[90].mxu1 }
 0x1a8   : > { %v899_v60 = vmax.f32 %v834_v44, 0.0  ;;  %v1427_v2 = vmax.f32 %v1362_v45, 0.0  ;;  %v837_v11 = vadd.f32 %v4359_v9, %v836_v57  ;;  %v1365_v1 = vadd.f32 %v4359_v9, %v1364_v55  ;;  %v3216_v14 = vpop.f32.mrb[91].mxu0  ;;  %v3326_v15 = vpop.f32.mrb[91].mxu1 }
 0x1aa   : > { %v4379_v0 = vmax.f32 %v899_v60, %v1427_v2  ;;  %v900_v19 = vmax.f32 %v837_v11, 0.0  ;;  %v1428_v25 = vmax.f32 %v1365_v1, 0.0  ;;  %3442 = vmatmul.mubr.msk.bf16.gmra.mrb[196].mxu0 %vm540_vm3, %v3669_v56  ;;  %3552 = vmatmul.mubr.msk.bf16.gmra.mrb[196].mxu1 %vm540_vm3, %v3670_v54 }
 0x1ac   : > { %4663 = vst [vmem:[#allocation2_spill] sm:$0xff] %v4379_v0  ;;  %v4383_v31 = vmax.f32 %v900_v19, %v1428_v25 }
 0x1ad   : > { %v841_v34 = vpop.f32.mrb[92].mxu0  ;;  %v1369_v49 = vpop.f32.mrb[92].mxu1 }
 0x1ae   : > { %4664 = vst [vmem:[#allocation3_spill] sm:$0xff] %v4383_v31  ;;  %v842_v44 = vadd.f32 %v4359_v9, %v841_v34  ;;  %v1370_v45 = vadd.f32 %v4359_v9, %v1369_v49  ;;  %v3219_v52 = vpop.f32.mrb[93].mxu0  ;;  %v3329_v57 = vpop.f32.mrb[93].mxu1 }
 0x1af   : > { %v844_v55 = vpop.f32.mrb[94].mxu0  ;;  %v1372_v14 = vpop.f32.mrb[94].mxu1 }
 0x1b0   : > { %v901_v60 = vmax.f32 %v842_v44, 0.0  ;;  %v1429_v2 = vmax.f32 %v1370_v45, 0.0  ;;  %v845_v11 = vadd.f32 %v4359_v9, %v844_v55  ;;  %v1373_v56 = vadd.f32 %v4359_v9, %v1372_v14  ;;  %v3220_v1 = vpop.f32.mrb[95].mxu0  ;;  %v3330_v54 = vpop.f32.mrb[95].mxu1 }
 0x1b2   : > { %v4389_v15 = vmax.f32 %v901_v60, %v1429_v2  ;;  %v902_v19 = vmax.f32 %v845_v11, 0.0  ;;  %v1430_v25 = vmax.f32 %v1373_v56, 0.0 }
 0x1b4   : > { %v4391_v31 = vmax.f32 %v902_v19, %v1430_v25 }
 0x1b5   : > { %v849_v34 = vpop.f32.mrb[96].mxu0  ;;  %v1377_v49 = vpop.f32.mrb[96].mxu1 }
 0x1b6   : > { %4665 = vst [vmem:[#allocation4_spill] sm:$0xff] %v4391_v31  ;;  %v850_v52 = vadd.f32 %v4359_v9, %v849_v34  ;;  %v1378_v57 = vadd.f32 %v4359_v9, %v1377_v49  ;;  %v3223_v44 = vpop.f32.mrb[97].mxu0  ;;  %v3333_v45 = vpop.f32.mrb[97].mxu1 }
 0x1b7   : > { %v852_v0 = vpop.f32.mrb[98].mxu0  ;;  %v1380_v55 = vpop.f32.mrb[98].mxu1 }
 0x1b8   : > { %v903_v14 = vmax.f32 %v850_v52, 0.0  ;;  %v1431_v1 = vmax.f32 %v1378_v57, 0.0  ;;  %v3224_v54 = vpop.f32.mrb[99].mxu0  ;;  %v3334_v60 = vpop.f32.mrb[99].mxu1 }
 0x1ba   : > { %v4395_v2 = vmax.f32 %v903_v14, %v1431_v1 }
 0x1bd   : > { %v1762_v11 = vpop.f32.mrb[100].mxu0  ;;  %v2290_v56 = vpop.f32.mrb[100].mxu1 }
 0x1be   : > { %v1763_v19 = vadd.f32 %v4359_v9, %v1762_v11  ;;  %v2291_v25 = vadd.f32 %v4359_v9, %v2290_v56  ;;  %v3347_v34 = vpop.f32.mrb[101].mxu0  ;;  %v3457_v31 = vpop.f32.mrb[101].mxu1 }
 0x1bf   : > { %v1765_v49 = vpop.f32.mrb[102].mxu0  ;;  %v2293_v44 = vpop.f32.mrb[102].mxu1 }
 0x1c0   : > { %v1960_v45 = vmax.f32 %v1763_v19, 0.0  ;;  %v2488_v0 = vmax.f32 %v2291_v25, 0.0  ;;  %v1766_v52 = vadd.f32 %v4359_v9, %v1765_v49  ;;  %v2294_v57 = vadd.f32 %v4359_v9, %v2293_v44  ;;  %v3348_v55 = vpop.f32.mrb[103].mxu0  ;;  %v3458_v14 = vpop.f32.mrb[103].mxu1 }
 0x1c2   : > { %v2537_v1 = vmax.f32 %v1960_v45, %v2488_v0  ;;  %v1961_v54 = vmax.f32 %v1766_v52, 0.0  ;;  %v2489_v60 = vmax.f32 %v2294_v57, 0.0 }
 0x1c4   : > { %v2586_v31 = vmax.f32 %v4022_v18, %v2537_v1  ;;  %v2538_v11 = vmax.f32 %v1961_v54, %v2489_v60 }
 0x1c5   : > { %v1770_v56 = vpop.f32.mrb[104].mxu0  ;;  %v2298_v19 = vpop.f32.mrb[104].mxu1 }
 0x1c6   : > { %2636 = vst.msk [vmem:[%s4405_s8] sm:$0xff] %vm2635_vm4, %v2586_v31  ;;  %v2587_v25 = vmax.f32 %v4030_v21, %v2538_v11  ;;  %v1771_v34 = vadd.f32 %v4359_v9, %v1770_v56  ;;  %v2299_v49 = vadd.f32 %v4359_v9, %v2298_v19  ;;  %v3351_v44 = vpop.f32.mrb[105].mxu0  ;;  %v3461_v45 = vpop.f32.mrb[105].mxu1 }
 0x1c7   : > { %v1773_v0 = vpop.f32.mrb[106].mxu0  ;;  %v2301_v52 = vpop.f32.mrb[106].mxu1 }
 0x1c8   : > { %2637 = vst.msk [vmem:[%s4405_s8 + $0x8] sm:$0xff] %vm2635_vm4, %v2587_v25  ;;  %v1962_v57 = vmax.f32 %v1771_v34, 0.0  ;;  %v2490_v18 = vmax.f32 %v2299_v49, 0.0  ;;  %v1774_v55 = vadd.f32 %v4359_v9, %v1773_v0  ;;  %v2302_v14 = vadd.f32 %v4359_v9, %v2301_v52  ;;  %v3352_v1 = vpop.f32.mrb[107].mxu0  ;;  %v3462_v54 = vpop.f32.mrb[107].mxu1 }
 0x1ca   : > { %v2539_v21 = vmax.f32 %v1962_v57, %v2490_v18  ;;  %v1963_v60 = vmax.f32 %v1774_v55, 0.0  ;;  %v2491_v31 = vmax.f32 %v2302_v14, 0.0 }
 0x1cc   : > { %v2588_v11 = vmax.f32 %v4038_v38, %v2539_v21  ;;  %v2540_v56 = vmax.f32 %v1963_v60, %v2491_v31 }
 0x1cd   : > { %v1778_v19 = vpop.f32.mrb[108].mxu0  ;;  %v2306_v44 = vpop.f32.mrb[108].mxu1 }
 0x1ce   : > { %2638 = vst.msk [vmem:[%s4405_s8 + $0x10] sm:$0xff] %vm2635_vm4, %v2588_v11  ;;  %v2589_v25 = vmax.f32 %v4046_v41, %v2540_v56  ;;  %v1779_v34 = vadd.f32 %v4359_v9, %v1778_v19  ;;  %v2307_v49 = vadd.f32 %v4359_v9, %v2306_v44  ;;  %v3355_v45 = vpop.f32.mrb[109].mxu0  ;;  %v3465_v0 = vpop.f32.mrb[109].mxu1 }
 0x1cf   : > { %v1781_v52 = vpop.f32.mrb[110].mxu0  ;;  %v2309_v57 = vpop.f32.mrb[110].mxu1 }
 0x1d0   : > { %2639 = vst.msk [vmem:[%s4405_s8 + $0x18] sm:$0xff] %vm2635_vm4, %v2589_v25  ;;  %v1964_v18 = vmax.f32 %v1779_v34, 0.0  ;;  %v2492_v38 = vmax.f32 %v2307_v49, 0.0  ;;  %v1782_v55 = vadd.f32 %v4359_v9, %v1781_v52  ;;  %v2310_v14 = vadd.f32 %v4359_v9, %v2309_v57  ;;  %v3356_v1 = vpop.f32.mrb[111].mxu0  ;;  %v3466_v54 = vpop.f32.mrb[111].mxu1 }
 0x1d2   : > { %v2541_v41 = vmax.f32 %v1964_v18, %v2492_v38  ;;  %v1965_v21 = vmax.f32 %v1782_v55, 0.0  ;;  %v2493_v60 = vmax.f32 %v2310_v14, 0.0 }
 0x1d4   : > { %v2590_v31 = vmax.f32 %v4054_v58, %v2541_v41  ;;  %v2542_v11 = vmax.f32 %v1965_v21, %v2493_v60 }
 0x1d5   : > { %v1786_v56 = vpop.f32.mrb[112].mxu0  ;;  %v2314_v19 = vpop.f32.mrb[112].mxu1 }
 0x1d6   : > { %2640 = vst.msk [vmem:[%s4405_s8 + $0x20] sm:$0xff] %vm2635_vm4, %v2590_v31  ;;  %v2591_v44 = vmax.f32 %v4062_v61, %v2542_v11  ;;  %v1787_v25 = vadd.f32 %v4359_v9, %v1786_v56  ;;  %v2315_v34 = vadd.f32 %v4359_v9, %v2314_v19  ;;  %v3359_v49 = vpop.f32.mrb[113].mxu0  ;;  %v3469_v45 = vpop.f32.mrb[113].mxu1 }
 0x1d7   : > { %v1789_v0 = vpop.f32.mrb[114].mxu0  ;;  %v2317_v52 = vpop.f32.mrb[114].mxu1 }
 0x1d8   : > { %2641 = vst.msk [vmem:[%s4405_s8 + $0x28] sm:$0xff] %vm2635_vm4, %v2591_v44  ;;  %v1966_v57 = vmax.f32 %v1787_v25, 0.0  ;;  %v2494_v58 = vmax.f32 %v2315_v34, 0.0  ;;  %v1790_v18 = vadd.f32 %v4359_v9, %v1789_v0  ;;  %v2318_v38 = vadd.f32 %v4359_v9, %v2317_v52  ;;  %v3360_v55 = vpop.f32.mrb[115].mxu0  ;;  %v3470_v14 = vpop.f32.mrb[115].mxu1 }
 0x1da   : > { %v2543_v61 = vmax.f32 %v1966_v57, %v2494_v58  ;;  %v1967_v1 = vmax.f32 %v1790_v18, 0.0  ;;  %v2495_v54 = vmax.f32 %v2318_v38, 0.0 }
 0x1dc   : > { %v2592_v41 = vmax.f32 %v4070_v16, %v2543_v61  ;;  %v2544_v21 = vmax.f32 %v1967_v1, %v2495_v54 }
 0x1dd   : > { %v1794_v60 = vpop.f32.mrb[116].mxu0  ;;  %v2322_v31 = vpop.f32.mrb[116].mxu1 }
 0x1de   : > { %2642 = vst.msk [vmem:[%s4405_s8 + $0x30] sm:$0xff] %vm2635_vm4, %v2592_v41  ;;  %v2593_v11 = vmax.f32 %v4078_v20, %v2544_v21  ;;  %v1795_v56 = vadd.f32 %v4359_v9, %v1794_v60  ;;  %v2323_v19 = vadd.f32 %v4359_v9, %v2322_v31  ;;  %v3363_v44 = vpop.f32.mrb[117].mxu0  ;;  %v3473_v25 = vpop.f32.mrb[117].mxu1 }
 0x1df   : > { %v1797_v34 = vpop.f32.mrb[118].mxu0  ;;  %v2325_v49 = vpop.f32.mrb[118].mxu1 }
 0x1e0   : > { %2643 = vst.msk [vmem:[%s4405_s8 + $0x38] sm:$0xff] %vm2635_vm4, %v2593_v11  ;;  %v1968_v45 = vmax.f32 %v1795_v56, 0.0  ;;  %v2496_v16 = vmax.f32 %v2323_v19, 0.0  ;;  %v1798_v0 = vadd.f32 %v4359_v9, %v1797_v34  ;;  %v2326_v52 = vadd.f32 %v4359_v9, %v2325_v49  ;;  %v3364_v57 = vpop.f32.mrb[119].mxu0  ;;  %v3474_v58 = vpop.f32.mrb[119].mxu1 }
 0x1e2   : > { %v2545_v20 = vmax.f32 %v1968_v45, %v2496_v16  ;;  %v1969_v18 = vmax.f32 %v1798_v0, 0.0  ;;  %v2497_v38 = vmax.f32 %v2326_v52, 0.0 }
 0x1e4   : > { %v2594_v55 = vmax.f32 %v4086_v39, %v2545_v20  ;;  %v2546_v14 = vmax.f32 %v1969_v18, %v2497_v38 }
 0x1e5   : > { %v1802_v61 = vpop.f32.mrb[120].mxu0  ;;  %v2330_v1 = vpop.f32.mrb[120].mxu1 }
 0x1e6   : > { %2644 = vst.msk [vmem:[%s4405_s8 + $0x40] sm:$0xff] %vm2635_vm4, %v2594_v55  ;;  %v2595_v54 = vmax.f32 %v4094_v43, %v2546_v14  ;;  %v1803_v41 = vadd.f32 %v4359_v9, %v1802_v61  ;;  %v2331_v21 = vadd.f32 %v4359_v9, %v2330_v1  ;;  %v3367_v60 = vpop.f32.mrb[121].mxu0  ;;  %v3477_v31 = vpop.f32.mrb[121].mxu1 }
 0x1e7   : > { %v1805_v11 = vpop.f32.mrb[122].mxu0  ;;  %v2333_v56 = vpop.f32.mrb[122].mxu1 }
 0x1e8   : > { %2645 = vst.msk [vmem:[%s4405_s8 + $0x48] sm:$0xff] %vm2635_vm4, %v2595_v54  ;;  %v1970_v19 = vmax.f32 %v1803_v41, 0.0  ;;  %v2498_v39 = vmax.f32 %v2331_v21, 0.0  ;;  %v1806_v44 = vadd.f32 %v4359_v9, %v1805_v11  ;;  %v2334_v25 = vadd.f32 %v4359_v9, %v2333_v56  ;;  %v3368_v34 = vpop.f32.mrb[123].mxu0  ;;  %v3478_v49 = vpop.f32.mrb[123].mxu1 }
 0x1ea   : > { %v2547_v43 = vmax.f32 %v1970_v19, %v2498_v39  ;;  %v1971_v45 = vmax.f32 %v1806_v44, 0.0  ;;  %v2499_v16 = vmax.f32 %v2334_v25, 0.0 }
 0x1ec   : > { %v2596_v0 = vmax.f32 %v4102_v62, %v2547_v43  ;;  %v2548_v52 = vmax.f32 %v1971_v45, %v2499_v16 }
 0x1ed   : > { %v1810_v57 = vpop.f32.mrb[124].mxu0  ;;  %v2338_v58 = vpop.f32.mrb[124].mxu1 }
 0x1ee   : > { %2646 = vst.msk [vmem:[%s4405_s8 + $0x50] sm:$0xff] %vm2635_vm4, %v2596_v0  ;;  %v2597_v20 = vmax.f32 %v4110_v3, %v2548_v52  ;;  %v1811_v18 = vadd.f32 %v4359_v9, %v1810_v57  ;;  %v2339_v38 = vadd.f32 %v4359_v9, %v2338_v58  ;;  %v3371_v55 = vpop.f32.mrb[125].mxu0  ;;  %v3481_v14 = vpop.f32.mrb[125].mxu1 }
 0x1ef   : > { %v1813_v61 = vpop.f32.mrb[126].mxu0  ;;  %v2341_v1 = vpop.f32.mrb[126].mxu1 }
 0x1f0   : > { %2647 = vst.msk [vmem:[%s4405_s8 + $0x58] sm:$0xff] %vm2635_vm4, %v2597_v20  ;;  %v1972_v54 = vmax.f32 %v1811_v18, 0.0  ;;  %v2500_v62 = vmax.f32 %v2339_v38, 0.0  ;;  %v1814_v41 = vadd.f32 %v4359_v9, %v1813_v61  ;;  %v2342_v21 = vadd.f32 %v4359_v9, %v2341_v1  ;;  %v3372_v60 = vpop.f32.mrb[127].mxu0  ;;  %v3482_v31 = vpop.f32.mrb[127].mxu1 }
 0x1f2   : > { %v2549_v3 = vmax.f32 %v1972_v54, %v2500_v62  ;;  %v1973_v11 = vmax.f32 %v1814_v41, 0.0  ;;  %v2501_v56 = vmax.f32 %v2342_v21, 0.0 }
 0x1f4   : > { %v2598_v19 = vmax.f32 %v4118_v24, %v2549_v3  ;;  %v2550_v39 = vmax.f32 %v1973_v11, %v2501_v56 }
 0x1f5   : > { %v1818_v44 = vpop.f32.mrb[128].mxu0  ;;  %v2346_v25 = vpop.f32.mrb[128].mxu1 }
 0x1f6   : > { %2648 = vst.msk [vmem:[%s4405_s8 + $0x60] sm:$0xff] %vm2635_vm4, %v2598_v19  ;;  %v2599_v34 = vmax.f32 %v4126_v27, %v2550_v39  ;;  %v1819_v49 = vadd.f32 %v4359_v9, %v1818_v44  ;;  %v2347_v43 = vadd.f32 %v4359_v9, %v2346_v25  ;;  %v3375_v45 = vpop.f32.mrb[129].mxu0  ;;  %v3485_v16 = vpop.f32.mrb[129].mxu1 }
 0x1f7   : > { %v1821_v0 = vpop.f32.mrb[130].mxu0  ;;  %v2349_v52 = vpop.f32.mrb[130].mxu1 }
 0x1f8   : > { %2649 = vst.msk [vmem:[%s4405_s8 + $0x68] sm:$0xff] %vm2635_vm4, %v2599_v34  ;;  %v1974_v57 = vmax.f32 %v1819_v49, 0.0  ;;  %v2502_v24 = vmax.f32 %v2347_v43, 0.0  ;;  %v1822_v58 = vadd.f32 %v4359_v9, %v1821_v0  ;;  %v2350_v20 = vadd.f32 %v4359_v9, %v2349_v52  ;;  %v3376_v18 = vpop.f32.mrb[131].mxu0  ;;  %v3486_v38 = vpop.f32.mrb[131].mxu1 }
 0x1fa   : > { %v2551_v27 = vmax.f32 %v1974_v57, %v2502_v24  ;;  %v1975_v55 = vmax.f32 %v1822_v58, 0.0  ;;  %v2503_v14 = vmax.f32 %v2350_v20, 0.0 }
 0x1fc   : > { %v2600_v61 = vmax.f32 %v4134_v48, %v2551_v27  ;;  %v2552_v1 = vmax.f32 %v1975_v55, %v2503_v14 }
 0x1fd   : > { %v1826_v54 = vpop.f32.mrb[132].mxu0  ;;  %v2354_v62 = vpop.f32.mrb[132].mxu1 }
 0x1fe   : > { %2650 = vst.msk [vmem:[%s4405_s8 + $0x70] sm:$0xff] %vm2635_vm4, %v2600_v61  ;;  %v2601_v41 = vmax.f32 %v4142_v51, %v2552_v1  ;;  %v1827_v21 = vadd.f32 %v4359_v9, %v1826_v54  ;;  %v2355_v60 = vadd.f32 %v4359_v9, %v2354_v62  ;;  %v3379_v31 = vpop.f32.mrb[133].mxu0  ;;  %v3489_v3 = vpop.f32.mrb[133].mxu1 }
 0x1ff   : > { %v1829_v11 = vpop.f32.mrb[134].mxu0  ;;  %v2357_v56 = vpop.f32.mrb[134].mxu1 }
 0x200   : > { %2651 = vst.msk [vmem:[%s4405_s8 + $0x78] sm:$0xff] %vm2635_vm4, %v2601_v41  ;;  %v1976_v19 = vmax.f32 %v1827_v21, 0.0  ;;  %v2504_v48 = vmax.f32 %v2355_v60, 0.0  ;;  %v1830_v39 = vadd.f32 %v4359_v9, %v1829_v11  ;;  %v2358_v44 = vadd.f32 %v4359_v9, %v2357_v56  ;;  %v3380_v25 = vpop.f32.mrb[135].mxu0  ;;  %v3490_v34 = vpop.f32.mrb[135].mxu1 }
 0x202   : > { %v2553_v51 = vmax.f32 %v1976_v19, %v2504_v48  ;;  %v1977_v49 = vmax.f32 %v1830_v39, 0.0  ;;  %v2505_v43 = vmax.f32 %v2358_v44, 0.0 }
 0x204   : > { %v2602_v45 = vmax.f32 %v4150_v10, %v2553_v51  ;;  %v2554_v16 = vmax.f32 %v1977_v49, %v2505_v43 }
 0x205   : > { %v1834_v0 = vpop.f32.mrb[136].mxu0  ;;  %v2362_v52 = vpop.f32.mrb[136].mxu1 }
 0x206   : > { %2652 = vst.msk [vmem:[%s4405_s8 + $0x80] sm:$0xff] %vm2635_vm4, %v2602_v45  ;;  %v2603_v57 = vmax.f32 %v4158_v13, %v2554_v16  ;;  %v1835_v24 = vadd.f32 %v4359_v9, %v1834_v0  ;;  %v2363_v58 = vadd.f32 %v4359_v9, %v2362_v52  ;;  %v3383_v20 = vpop.f32.mrb[137].mxu0  ;;  %v3493_v18 = vpop.f32.mrb[137].mxu1 }
 0x207   : > { %v1837_v38 = vpop.f32.mrb[138].mxu0  ;;  %v2365_v27 = vpop.f32.mrb[138].mxu1 }
 0x208   : > { %2653 = vst.msk [vmem:[%s4405_s8 + $0x88] sm:$0xff] %vm2635_vm4, %v2603_v57  ;;  %v1978_v55 = vmax.f32 %v1835_v24, 0.0  ;;  %v2506_v10 = vmax.f32 %v2363_v58, 0.0  ;;  %v1838_v14 = vadd.f32 %v4359_v9, %v1837_v38  ;;  %v2366_v61 = vadd.f32 %v4359_v9, %v2365_v27  ;;  %v3384_v1 = vpop.f32.mrb[139].mxu0  ;;  %v3494_v54 = vpop.f32.mrb[139].mxu1 }
 0x20a   : > { %v2555_v13 = vmax.f32 %v1978_v55, %v2506_v10  ;;  %v1979_v62 = vmax.f32 %v1838_v14, 0.0  ;;  %v2507_v41 = vmax.f32 %v2366_v61, 0.0 }
 0x20c   : > { %v2604_v21 = vmax.f32 %v4166_v36, %v2555_v13  ;;  %v2556_v60 = vmax.f32 %v1979_v62, %v2507_v41 }
 0x20d   : > { %v1842_v31 = vpop.f32.mrb[140].mxu0  ;;  %v2370_v3 = vpop.f32.mrb[140].mxu1 }
 0x20e   : > { %2654 = vst.msk [vmem:[%s4405_s8 + $0x90] sm:$0xff] %vm2635_vm4, %v2604_v21  ;;  %v2605_v11 = vmax.f32 %v4174_v42, %v2556_v60  ;;  %v1843_v56 = vadd.f32 %v4359_v9, %v1842_v31  ;;  %v2371_v19 = vadd.f32 %v4359_v9, %v2370_v3  ;;  %v3387_v48 = vpop.f32.mrb[141].mxu0  ;;  %v3497_v39 = vpop.f32.mrb[141].mxu1 }
 0x20f   : > { %v1845_v44 = vpop.f32.mrb[142].mxu0  ;;  %v2373_v25 = vpop.f32.mrb[142].mxu1 }
 0x210   : > { %2655 = vst.msk [vmem:[%s4405_s8 + $0x98] sm:$0xff] %vm2635_vm4, %v2605_v11  ;;  %v1980_v34 = vmax.f32 %v1843_v56, 0.0  ;;  %v2508_v36 = vmax.f32 %v2371_v19, 0.0  ;;  %v1846_v51 = vadd.f32 %v4359_v9, %v1845_v44  ;;  %v2374_v49 = vadd.f32 %v4359_v9, %v2373_v25  ;;  %v3388_v43 = vpop.f32.mrb[143].mxu0  ;;  %v3498_v45 = vpop.f32.mrb[143].mxu1 }
 0x212   : > { %v2557_v42 = vmax.f32 %v1980_v34, %v2508_v36  ;;  %v1981_v16 = vmax.f32 %v1846_v51, 0.0  ;;  %v2509_v0 = vmax.f32 %v2374_v49, 0.0 }
 0x214   : > { %v2606_v52 = vmax.f32 %v4182_v4, %v2557_v42  ;;  %v2558_v57 = vmax.f32 %v1981_v16, %v2509_v0 }
 0x215   : > { %v1850_v24 = vpop.f32.mrb[144].mxu0  ;;  %v2378_v58 = vpop.f32.mrb[144].mxu1 }
 0x216   : > { %2656 = vst.msk [vmem:[%s4405_s8 + $0xa0] sm:$0xff] %vm2635_vm4, %v2606_v52  ;;  %v2607_v20 = vmax.f32 %v4190_v7, %v2558_v57  ;;  %v1851_v18 = vadd.f32 %v4359_v9, %v1850_v24  ;;  %v2379_v38 = vadd.f32 %v4359_v9, %v2378_v58  ;;  %v3391_v27 = vpop.f32.mrb[145].mxu0  ;;  %v3501_v55 = vpop.f32.mrb[145].mxu1 }
 0x217   : > { %v1853_v10 = vpop.f32.mrb[146].mxu0  ;;  %v2381_v14 = vpop.f32.mrb[146].mxu1 }
 0x218   : > { %2657 = vst.msk [vmem:[%s4405_s8 + $0xa8] sm:$0xff] %vm2635_vm4, %v2607_v20  ;;  %v1982_v61 = vmax.f32 %v1851_v18, 0.0  ;;  %v2510_v4 = vmax.f32 %v2379_v38, 0.0  ;;  %v1854_v1 = vadd.f32 %v4359_v9, %v1853_v10  ;;  %v2382_v54 = vadd.f32 %v4359_v9, %v2381_v14  ;;  %v3392_v13 = vpop.f32.mrb[147].mxu0  ;;  %v3502_v62 = vpop.f32.mrb[147].mxu1 }
 0x21a   : > { %v2559_v7 = vmax.f32 %v1982_v61, %v2510_v4  ;;  %v1983_v41 = vmax.f32 %v1854_v1, 0.0  ;;  %v2511_v21 = vmax.f32 %v2382_v54, 0.0 }
 0x21c   : > { %v2608_v60 = vmax.f32 %v4198_v32, %v2559_v7  ;;  %v2560_v31 = vmax.f32 %v1983_v41, %v2511_v21 }
 0x21d   : > { %v1858_v3 = vpop.f32.mrb[148].mxu0  ;;  %v2386_v11 = vpop.f32.mrb[148].mxu1 }
 0x21e   : > { %2658 = vst.msk [vmem:[%s4405_s8 + $0xb0] sm:$0xff] %vm2635_vm4, %v2608_v60  ;;  %v2609_v56 = vmax.f32 %v4206_v35, %v2560_v31  ;;  %v1859_v19 = vadd.f32 %v4359_v9, %v1858_v3  ;;  %v2387_v48 = vadd.f32 %v4359_v9, %v2386_v11  ;;  %v3395_v39 = vpop.f32.mrb[149].mxu0  ;;  %v3505_v44 = vpop.f32.mrb[149].mxu1 }
 0x21f   : > { %v1861_v25 = vpop.f32.mrb[150].mxu0  ;;  %v2389_v34 = vpop.f32.mrb[150].mxu1 }
 0x220   : > { %2659 = vst.msk [vmem:[%s4405_s8 + $0xb8] sm:$0xff] %vm2635_vm4, %v2609_v56  ;;  %v1984_v36 = vmax.f32 %v1859_v19, 0.0  ;;  %v2512_v32 = vmax.f32 %v2387_v48, 0.0  ;;  %v1862_v51 = vadd.f32 %v4359_v9, %v1861_v25  ;;  %v2390_v49 = vadd.f32 %v4359_v9, %v2389_v34  ;;  %v3396_v43 = vpop.f32.mrb[151].mxu0  ;;  %v3506_v45 = vpop.f32.mrb[151].mxu1 }
 0x222   : > { %v2561_v35 = vmax.f32 %v1984_v36, %v2512_v32  ;;  %v1985_v42 = vmax.f32 %v1862_v51, 0.0  ;;  %v2513_v16 = vmax.f32 %v2390_v49, 0.0 }
 0x224   : > { %v2610_v0 = vmax.f32 %v4214_v63, %v2561_v35  ;;  %v2562_v52 = vmax.f32 %v1985_v42, %v2513_v16 }
 0x225   : > { %v1866_v57 = vpop.f32.mrb[152].mxu0  ;;  %v2394_v24 = vpop.f32.mrb[152].mxu1 }
 0x226   : > { %2660 = vst.msk [vmem:[%s4405_s8 + $0xc0] sm:$0xff] %vm2635_vm4, %v2610_v0  ;;  %v2611_v58 = vmax.f32 %v4222_v6, %v2562_v52  ;;  %v1867_v20 = vadd.f32 %v4359_v9, %v1866_v57  ;;  %v2395_v18 = vadd.f32 %v4359_v9, %v2394_v24  ;;  %v3399_v38 = vpop.f32.mrb[153].mxu0  ;;  %v3509_v27 = vpop.f32.mrb[153].mxu1 }
 0x227   : > { %v1869_v55 = vpop.f32.mrb[154].mxu0  ;;  %v2397_v10 = vpop.f32.mrb[154].mxu1 }
 0x228   : > { %2661 = vst.msk [vmem:[%s4405_s8 + $0xc8] sm:$0xff] %vm2635_vm4, %v2611_v58  ;;  %v1986_v14 = vmax.f32 %v1867_v20, 0.0  ;;  %v2514_v63 = vmax.f32 %v2395_v18, 0.0  ;;  %v1870_v61 = vadd.f32 %v4359_v9, %v1869_v55  ;;  %v2398_v4 = vadd.f32 %v4359_v9, %v2397_v10  ;;  %v3400_v1 = vpop.f32.mrb[155].mxu0  ;;  %v3510_v54 = vpop.f32.mrb[155].mxu1 }
 0x22a   : > { %v2563_v6 = vmax.f32 %v1986_v14, %v2514_v63  ;;  %v1987_v13 = vmax.f32 %v1870_v61, 0.0  ;;  %v2515_v62 = vmax.f32 %v2398_v4, 0.0 }
 0x22c   : > { %v2612_v7 = vmax.f32 %v4230_v33, %v2563_v6  ;;  %v2564_v41 = vmax.f32 %v1987_v13, %v2515_v62 }
 0x22d   : > { %v1874_v21 = vpop.f32.mrb[156].mxu0  ;;  %v2402_v60 = vpop.f32.mrb[156].mxu1 }
 0x22e   : > { %2662 = vst.msk [vmem:[%s4405_s8 + $0xd0] sm:$0xff] %vm2635_vm4, %v2612_v7  ;;  %v2613_v31 = vmax.f32 %v4238_v40, %v2564_v41  ;;  %v1875_v3 = vadd.f32 %v4359_v9, %v1874_v21  ;;  %v2403_v11 = vadd.f32 %v4359_v9, %v2402_v60  ;;  %v3403_v56 = vpop.f32.mrb[157].mxu0  ;;  %v3513_v19 = vpop.f32.mrb[157].mxu1 }
 0x22f   : > { %v1877_v48 = vpop.f32.mrb[158].mxu0  ;;  %v2405_v39 = vpop.f32.mrb[158].mxu1 }
 0x230   : > { %2663 = vst.msk [vmem:[%s4405_s8 + $0xd8] sm:$0xff] %vm2635_vm4, %v2613_v31  ;;  %v1988_v44 = vmax.f32 %v1875_v3, 0.0  ;;  %v2516_v33 = vmax.f32 %v2403_v11, 0.0  ;;  %v1878_v25 = vadd.f32 %v4359_v9, %v1877_v48  ;;  %v2406_v34 = vadd.f32 %v4359_v9, %v2405_v39  ;;  %v3404_v36 = vpop.f32.mrb[159].mxu0  ;;  %v3514_v32 = vpop.f32.mrb[159].mxu1 }
 0x232   : > { %v2565_v40 = vmax.f32 %v1988_v44, %v2516_v33  ;;  %v1989_v51 = vmax.f32 %v1878_v25, 0.0  ;;  %v2517_v49 = vmax.f32 %v2406_v34, 0.0 }
 0x234   : > { %v2614_v43 = vmax.f32 %v4246_v8, %v2565_v40  ;;  %v2566_v45 = vmax.f32 %v1989_v51, %v2517_v49 }
 0x235   : > { %v1882_v35 = vpop.f32.mrb[160].mxu0  ;;  %v2410_v42 = vpop.f32.mrb[160].mxu1 }
 0x236   : > { %2664 = vst.msk [vmem:[%s4405_s8 + $0xe0] sm:$0xff] %vm2635_vm4, %v2614_v43  ;;  %v2615_v16 = vmax.f32 %v4254_v12, %v2566_v45  ;;  %v1883_v0 = vadd.f32 %v4359_v9, %v1882_v35  ;;  %v2411_v52 = vadd.f32 %v4359_v9, %v2410_v42  ;;  %v3407_v57 = vpop.f32.mrb[161].mxu0  ;;  %v3517_v24 = vpop.f32.mrb[161].mxu1 }
 0x237   : > { %v1885_v58 = vpop.f32.mrb[162].mxu0  ;;  %v2413_v20 = vpop.f32.mrb[162].mxu1 }
 0x238   : > { %2665 = vst.msk [vmem:[%s4405_s8 + $0xe8] sm:$0xff] %vm2635_vm4, %v2615_v16  ;;  %v1990_v18 = vmax.f32 %v1883_v0, 0.0  ;;  %v2518_v8 = vmax.f32 %v2411_v52, 0.0  ;;  %v1886_v38 = vadd.f32 %v4359_v9, %v1885_v58  ;;  %v2414_v27 = vadd.f32 %v4359_v9, %v2413_v20  ;;  %v3408_v55 = vpop.f32.mrb[163].mxu0  ;;  %v3518_v10 = vpop.f32.mrb[163].mxu1 }
 0x23a   : > { %v2567_v12 = vmax.f32 %v1990_v18, %v2518_v8  ;;  %v1991_v14 = vmax.f32 %v1886_v38, 0.0  ;;  %v2519_v63 = vmax.f32 %v2414_v27, 0.0 }
 0x23c   : > { %v2616_v61 = vmax.f32 %v4262_v46, %v2567_v12  ;;  %v2568_v4 = vmax.f32 %v1991_v14, %v2519_v63 }
 0x23d   : > { %v1890_v1 = vpop.f32.mrb[164].mxu0  ;;  %v2418_v54 = vpop.f32.mrb[164].mxu1 }
 0x23e   : > { %2666 = vst.msk [vmem:[%s4405_s8 + $0xf0] sm:$0xff] %vm2635_vm4, %v2616_v61  ;;  %v2617_v6 = vmax.f32 %v4270_v50, %v2568_v4  ;;  %v1891_v13 = vadd.f32 %v4359_v9, %v1890_v1  ;;  %v2419_v62 = vadd.f32 %v4359_v9, %v2418_v54  ;;  %v3411_v7 = vpop.f32.mrb[165].mxu0  ;;  %v3521_v41 = vpop.f32.mrb[165].mxu1 }
 0x23f   : > { %v1893_v21 = vpop.f32.mrb[166].mxu0  ;;  %v2421_v60 = vpop.f32.mrb[166].mxu1 }
 0x240   : > { %2667 = vst.msk [vmem:[%s4405_s8 + $0xf8] sm:$0xff] %vm2635_vm4, %v2617_v6  ;;  %v1992_v31 = vmax.f32 %v1891_v13, 0.0  ;;  %v2520_v46 = vmax.f32 %v2419_v62, 0.0  ;;  %v1894_v3 = vadd.f32 %v4359_v9, %v1893_v21  ;;  %v2422_v11 = vadd.f32 %v4359_v9, %v2421_v60  ;;  %v3412_v56 = vpop.f32.mrb[167].mxu0  ;;  %v3522_v19 = vpop.f32.mrb[167].mxu1 }
 0x242   : > { %v2569_v50 = vmax.f32 %v1992_v31, %v2520_v46  ;;  %v1993_v48 = vmax.f32 %v1894_v3, 0.0  ;;  %v2521_v39 = vmax.f32 %v2422_v11, 0.0 }
 0x244   : > { %v2618_v44 = vmax.f32 %v4278_v22, %v2569_v50  ;;  %v2570_v33 = vmax.f32 %v1993_v48, %v2521_v39 }
 0x245   : > { %v1898_v25 = vpop.f32.mrb[168].mxu0  ;;  %v2426_v34 = vpop.f32.mrb[168].mxu1 }
 0x246   : > { %2668 = vst.msk [vmem:[%s4405_s8 + $0x100] sm:$0xff] %vm2635_vm4, %v2618_v44  ;;  %v2619_v36 = vmax.f32 %v4286_v26, %v2570_v33  ;;  %v1899_v32 = vadd.f32 %v4359_v9, %v1898_v25  ;;  %v2427_v40 = vadd.f32 %v4359_v9, %v2426_v34  ;;  %v3415_v51 = vpop.f32.mrb[169].mxu0  ;;  %v3525_v49 = vpop.f32.mrb[169].mxu1 }
 0x247   : > { %v1901_v43 = vpop.f32.mrb[170].mxu0  ;;  %v2429_v45 = vpop.f32.mrb[170].mxu1 }
 0x248   : > { %2669 = vst.msk [vmem:[%s4405_s8 + $0x108] sm:$0xff] %vm2635_vm4, %v2619_v36  ;;  %v1994_v35 = vmax.f32 %v1899_v32, 0.0  ;;  %v2522_v22 = vmax.f32 %v2427_v40, 0.0  ;;  %v1902_v42 = vadd.f32 %v4359_v9, %v1901_v43  ;;  %v2430_v16 = vadd.f32 %v4359_v9, %v2429_v45  ;;  %v3416_v0 = vpop.f32.mrb[171].mxu0  ;;  %v3526_v52 = vpop.f32.mrb[171].mxu1 }
 0x24a   : > { %v2571_v26 = vmax.f32 %v1994_v35, %v2522_v22  ;;  %v1995_v57 = vmax.f32 %v1902_v42, 0.0  ;;  %v2523_v24 = vmax.f32 %v2430_v16, 0.0 }
 0x24c   : > { %v2620_v58 = vmax.f32 %v4294_v59, %v2571_v26  ;;  %v2572_v20 = vmax.f32 %v1995_v57, %v2523_v24  ;;  %v4608_v26 = vld [vmem:[%s4661_s5] ss:$0 sm:$0xff] }
 0x24d   : > { %v1906_v18 = vpop.f32.mrb[172].mxu0  ;;  %v2434_v8 = vpop.f32.mrb[172].mxu1 }
 0x24e   : > { %2670 = vst.msk [vmem:[%s4405_s8 + $0x110] sm:$0xff] %vm2635_vm4, %v2620_v58  ;;  %v2621_v38 = vmax.f32 %v4302_v5, %v2572_v20  ;;  %v1907_v27 = vadd.f32 %v4359_v9, %v1906_v18  ;;  %v2435_v55 = vadd.f32 %v4359_v9, %v2434_v8  ;;  %v3419_v10 = vpop.f32.mrb[173].mxu0  ;;  %v3529_v12 = vpop.f32.mrb[173].mxu1 }
 0x24f   : > { %v1909_v14 = vpop.f32.mrb[174].mxu0  ;;  %v2437_v63 = vpop.f32.mrb[174].mxu1 }
 0x250   : > { %2671 = vst.msk [vmem:[%s4405_s8 + $0x118] sm:$0xff] %vm2635_vm4, %v2621_v38  ;;  %v1996_v61 = vmax.f32 %v1907_v27, 0.0  ;;  %v2524_v59 = vmax.f32 %v2435_v55, 0.0  ;;  %v1910_v4 = vadd.f32 %v4359_v9, %v1909_v14  ;;  %v2438_v1 = vadd.f32 %v4359_v9, %v2437_v63  ;;  %v3420_v54 = vpop.f32.mrb[175].mxu0  ;;  %v3530_v6 = vpop.f32.mrb[175].mxu1 }
 0x252   : > { %v2573_v5 = vmax.f32 %v1996_v61, %v2524_v59  ;;  %v1997_v13 = vmax.f32 %v1910_v4, 0.0  ;;  %v2525_v62 = vmax.f32 %v2438_v1, 0.0 }
 0x254   : > { %v2622_v7 = vmax.f32 %v4310_v47, %v2573_v5  ;;  %v2574_v41 = vmax.f32 %v1997_v13, %v2525_v62 }
 0x255   : > { %v1914_v21 = vpop.f32.mrb[176].mxu0  ;;  %v2442_v60 = vpop.f32.mrb[176].mxu1 }
 0x256   : > { %2672 = vst.msk [vmem:[%s4405_s8 + $0x120] sm:$0xff] %vm2635_vm4, %v2622_v7  ;;  %v2623_v31 = vmax.f32 %v4318_v53, %v2574_v41  ;;  %v1915_v46 = vadd.f32 %v4359_v9, %v1914_v21  ;;  %v2443_v3 = vadd.f32 %v4359_v9, %v2442_v60  ;;  %v3423_v11 = vpop.f32.mrb[177].mxu0  ;;  %v3533_v56 = vpop.f32.mrb[177].mxu1 }
 0x257   : > { %v1917_v19 = vpop.f32.mrb[178].mxu0  ;;  %v2445_v50 = vpop.f32.mrb[178].mxu1 }
 0x258   : > { %2673 = vst.msk [vmem:[%s4405_s8 + $0x128] sm:$0xff] %vm2635_vm4, %v2623_v31  ;;  %v1998_v48 = vmax.f32 %v1915_v46, 0.0  ;;  %v2526_v47 = vmax.f32 %v2443_v3, 0.0  ;;  %v1918_v39 = vadd.f32 %v4359_v9, %v1917_v19  ;;  %v2446_v44 = vadd.f32 %v4359_v9, %v2445_v50  ;;  %v3424_v33 = vpop.f32.mrb[179].mxu0  ;;  %v3534_v25 = vpop.f32.mrb[179].mxu1 }
 0x25a   : > { %v2575_v53 = vmax.f32 %v1998_v48, %v2526_v47  ;;  %v1999_v34 = vmax.f32 %v1918_v39, 0.0  ;;  %v2527_v36 = vmax.f32 %v2446_v44, 0.0 }
 0x25c   : > { %v2624_v32 = vmax.f32 %v4326_v30, %v2575_v53  ;;  %v2576_v40 = vmax.f32 %v1999_v34, %v2527_v36  ;;  %v4666_v36 = vld [vmem:[#allocation2_spill] sm:$0xff] }
 0x25d   : > { %v1922_v51 = vpop.f32.mrb[180].mxu0  ;;  %v2450_v49 = vpop.f32.mrb[180].mxu1 }
 0x25e   : > { %2674 = vst.msk [vmem:[%s4405_s8 + $0x130] sm:$0xff] %vm2635_vm4, %v2624_v32  ;;  %v2625_v43 = vmax.f32 %v4334_v37, %v2576_v40  ;;  %v1923_v45 = vadd.f32 %v4359_v9, %v1922_v51  ;;  %v2451_v35 = vadd.f32 %v4359_v9, %v2450_v49  ;;  %v3427_v22 = vpop.f32.mrb[181].mxu0  ;;  %v3537_v42 = vpop.f32.mrb[181].mxu1 }
 0x25f   : > { %v1925_v16 = vpop.f32.mrb[182].mxu0  ;;  %v2453_v0 = vpop.f32.mrb[182].mxu1 }
 0x260   : > { %2675 = vst.msk [vmem:[%s4405_s8 + $0x138] sm:$0xff] %vm2635_vm4, %v2625_v43  ;;  %v2000_v52 = vmax.f32 %v1923_v45, 0.0  ;;  %v2528_v30 = vmax.f32 %v2451_v35, 0.0  ;;  %v1926_v37 = vadd.f32 %v4608_v26, %v1925_v16  ;;  %v2454_v57 = vadd.f32 %v4608_v26, %v2453_v0  ;;  %v3428_v24 = vpop.f32.mrb[183].mxu0  ;;  %v3538_v9 = vpop.f32.mrb[183].mxu1  ;;  %v4667_v43 = vld [vmem:[#allocation3_spill] sm:$0xff] }
 0x262   : > { %v2577_v58 = vmax.f32 %v2000_v52, %v2528_v30  ;;  %v2001_v20 = vmax.f32 %v1926_v37, 0.0  ;;  %v2529_v18 = vmax.f32 %v2454_v57, 0.0 }
 0x264   : > { %v2626_v8 = vmax.f32 %v4342_v23, %v2577_v58  ;;  %v2578_v38 = vmax.f32 %v2001_v20, %v2529_v18 }
 0x265   : > { %v1930_v27 = vpop.f32.mrb[184].mxu0  ;;  %v2458_v55 = vpop.f32.mrb[184].mxu1 }
 0x266   : > { %2676 = vst.msk [vmem:[%s4405_s8 + $0x140] sm:$0xff] %vm2635_vm4, %v2626_v8  ;;  %v2627_v10 = vmax.f32 %v4350_v29, %v2578_v38  ;;  %v1931_v12 = vadd.f32 %v4608_v26, %v1930_v27  ;;  %v2459_v14 = vadd.f32 %v4608_v26, %v2458_v55  ;;  %v3431_v63 = vpop.f32.mrb[185].mxu0  ;;  %v3541_v61 = vpop.f32.mrb[185].mxu1 }
 0x267   : > { %v1933_v59 = vpop.f32.mrb[186].mxu0  ;;  %v2461_v4 = vpop.f32.mrb[186].mxu1 }
 0x268   : > { %2677 = vst.msk [vmem:[%s4405_s8 + $0x148] sm:$0xff] %vm2635_vm4, %v2627_v10  ;;  %v2002_v1 = vmax.f32 %v1931_v12, 0.0  ;;  %v2530_v23 = vmax.f32 %v2459_v14, 0.0  ;;  %v1934_v54 = vadd.f32 %v4608_v26, %v1933_v59  ;;  %v2462_v6 = vadd.f32 %v4608_v26, %v2461_v4  ;;  %v3432_v5 = vpop.f32.mrb[187].mxu0  ;;  %v3542_v13 = vpop.f32.mrb[187].mxu1  ;;  %v4668_v12 = vld [vmem:[#allocation4_spill] sm:$0xff] }
 0x26a   : > { %v2579_v29 = vmax.f32 %v2002_v1, %v2530_v23  ;;  %v2003_v62 = vmax.f32 %v1934_v54, 0.0  ;;  %v2531_v7 = vmax.f32 %v2462_v6, 0.0 }
 0x26c   : > { %v2628_v41 = vmax.f32 %v4363_v17, %v2579_v29  ;;  %v2580_v21 = vmax.f32 %v2003_v62, %v2531_v7 }
 0x26d   : > { %v1938_v60 = vpop.f32.mrb[188].mxu0  ;;  %v2466_v31 = vpop.f32.mrb[188].mxu1 }
 0x26e   : > { %2678 = vst.msk [vmem:[%s4405_s8 + $0x150] sm:$0xff] %vm2635_vm4, %v2628_v41  ;;  %v2629_v46 = vmax.f32 %v4371_v28, %v2580_v21  ;;  %v1939_v3 = vadd.f32 %v4608_v26, %v1938_v60  ;;  %v2467_v11 = vadd.f32 %v4608_v26, %v2466_v31  ;;  %v3435_v56 = vpop.f32.mrb[189].mxu0  ;;  %v3545_v19 = vpop.f32.mrb[189].mxu1 }
 0x26f   : > { %v1941_v50 = vpop.f32.mrb[190].mxu0  ;;  %v2469_v48 = vpop.f32.mrb[190].mxu1 }
 0x270   : > { %2679 = vst.msk [vmem:[%s4405_s8 + $0x158] sm:$0xff] %vm2635_vm4, %v2629_v46  ;;  %v2004_v47 = vmax.f32 %v1939_v3, 0.0  ;;  %v2532_v17 = vmax.f32 %v2467_v11, 0.0  ;;  %v1942_v39 = vadd.f32 %v4608_v26, %v1941_v50  ;;  %v2470_v44 = vadd.f32 %v4608_v26, %v2469_v48  ;;  %v3436_v33 = vpop.f32.mrb[191].mxu0  ;;  %v3546_v25 = vpop.f32.mrb[191].mxu1 }
 0x272   : > { %v2581_v28 = vmax.f32 %v2004_v47, %v2532_v17  ;;  %v2005_v53 = vmax.f32 %v1942_v39, 0.0  ;;  %v2533_v34 = vmax.f32 %v2470_v44, 0.0 }
 0x274   : > { %v2630_v32 = vmax.f32 %v4666_v36, %v2581_v28  ;;  %v2582_v40 = vmax.f32 %v2005_v53, %v2533_v34 }
 0x275   : > { %v1946_v51 = vpop.f32.mrb[192].mxu0  ;;  %v2474_v49 = vpop.f32.mrb[192].mxu1 }
 0x276   : > { %2680 = vst.msk [vmem:[%s4405_s8 + $0x160] sm:$0xff] %vm2635_vm4, %v2630_v32  ;;  %v2631_v45 = vmax.f32 %v4667_v43, %v2582_v40  ;;  %v1947_v35 = vadd.f32 %v4608_v26, %v1946_v51  ;;  %v2475_v22 = vadd.f32 %v4608_v26, %v2474_v49  ;;  %v3439_v42 = vpop.f32.mrb[193].mxu0  ;;  %v3549_v16 = vpop.f32.mrb[193].mxu1 }
 0x277   : > { %v1949_v0 = vpop.f32.mrb[194].mxu0  ;;  %v2477_v52 = vpop.f32.mrb[194].mxu1 }
 0x278   : > { %2681 = vst.msk [vmem:[%s4405_s8 + $0x168] sm:$0xff] %vm2635_vm4, %v2631_v45  ;;  %v2006_v30 = vmax.f32 %v1947_v35, 0.0  ;;  %v2534_v37 = vmax.f32 %v2475_v22, 0.0  ;;  %v1950_v57 = vadd.f32 %v4608_v26, %v1949_v0  ;;  %v2478_v24 = vadd.f32 %v4608_v26, %v2477_v52  ;;  %v3440_v9 = vpop.f32.mrb[195].mxu0  ;;  %v3550_v58 = vpop.f32.mrb[195].mxu1 }
 0x27a   : > { %v2583_v20 = vmax.f32 %v2006_v30, %v2534_v37  ;;  %v2007_v18 = vmax.f32 %v1950_v57, 0.0  ;;  %v2535_v8 = vmax.f32 %v2478_v24, 0.0 }
 0x27c   : > { %v2632_v38 = vmax.f32 %v4389_v15, %v2583_v20  ;;  %v2584_v27 = vmax.f32 %v2007_v18, %v2535_v8 }
 0x27d   : > { %v1954_v55 = vpop.f32.mrb[196].mxu0  ;;  %v2482_v10 = vpop.f32.mrb[196].mxu1 }
 0x27e   : > { %2682 = vst.msk [vmem:[%s4405_s8 + $0x170] sm:$0xff] %vm2635_vm4, %v2632_v38  ;;  %v2633_v14 = vmax.f32 %v4668_v12, %v2584_v27  ;;  %v1955_v63 = vadd.f32 %v4608_v26, %v1954_v55  ;;  %v2483_v61 = vadd.f32 %v4608_v26, %v2482_v10  ;;  %v3443_v59 = vpop.f32.mrb[197].mxu0  ;;  %v3553_v4 = vpop.f32.mrb[197].mxu1 }
 0x27f   : > { %v1957_v1 = vpop.f32.mrb[198].mxu0  ;;  %v2485_v23 = vpop.f32.mrb[198].mxu1 }
 0x280   : > { %2683 = vst.msk [vmem:[%s4405_s8 + $0x178] sm:$0xff] %vm2635_vm4, %v2633_v14  ;;  %v2008_v54 = vmax.f32 %v1955_v63, 0.0  ;;  %v2536_v15 = vmax.f32 %v2483_v61, 0.0  ;;  %v3444_v6 = vpop.f32.mrb[199].mxu0  ;;  %v3554_v5 = vpop.f32.mrb[199].mxu1 }
 0x282   : > { %v2585_v13 = vmax.f32 %v2008_v54, %v2536_v15 }
 0x284   : > { %v2634_v29 = vmax.f32 %v4395_v2, %v2585_v13 }
 0x286   : > { %2684 = vst.msk [vmem:[%s4405_s8 + $0x180] sm:$0xff] %vm2635_vm4, %v2634_v29 }
 0x287 PF: > { %s16_s21 = sadd.s32 1, %s3679_s21  }
 0x288   : > { %p13_p4 = scmp.ge.s32.totalorder %s16_s21, 4  }
 0x28a   :  { %15 = sbr.rel (!%p13_p4) target bundleno = 1 (0x1), region = 83 }

// kernel: cnn3_forward.4
= control target key start
LH: loop header
LB: loop body
LE: loop exit
PB: predicated region body
PF: predicated region fallthrough
CT: control target
= control target key end

     0   :  { %v1136_v0 = vmov 0   ;;  %vm180_vm0 = vcmask 179200   ;;  %vm202_vm1 = vcmask 1042432   ;;  %vm931_vm2 = vcmask 130048   ;;  %s1633_s4 = inlined_call_operand.vmem [shape: bf16[150,16], index: 4, kind: input, shape index: {}]   ;;  %s1634_s0 = inlined_call_operand.vmem [shape: bf16[100,150], index: 0, kind: input, shape index: {}]   ;;  %s1635_s1 = inlined_call_operand.vmem [shape: bf16[100,150], index: 1, kind: input, shape index: {}]   ;;  %s1636_s2 = inlined_call_operand.vmem [shape: bf16[100,150], index: 2, kind: input, shape index: {}]   ;;  %s1637_s3 = inlined_call_operand.vmem [shape: bf16[100,150], index: 3, kind: input, shape index: {}]   ;;  %s1638_s5 = inlined_call_operand.vmem [shape: f32[1,16], index: 5, kind: input, shape index: {}]   ;;  %s1639_s6 = inlined_call_operand.vmem [shape: f32[100,16], index: 6, kind: output, shape index: {}]  }
   0x1   :  { %206 = vmatprep.subr.bf16.mxu0 %v1136_v0  ;;  %401 = vmatprep.subr.bf16.mxu1 %v1136_v0  ;;  %v1177_v1 = vld [vmem:[%s1633_s4] sm:$0xff]   ;;  %v1184_v2 = vld [vmem:[%s1633_s4 + $0x8] sm:$0xff]   ;;  %v1193_v3 = vld [vmem:[%s1633_s4 + $0x10] sm:$0xff]   ;;  %vm944_vm3 = vcmask 125952  }
   0x2   :  { %207 = vmatpush1.bf16.msra.mxu0 %v1177_v1  ;;  %402 = vmatpush1.bf16.msra.mxu1 %v1177_v1  ;;  %v1202_v4 = vld [vmem:[%s1633_s4 + $0x18] sm:$0xff]   ;;  %v1058_v5 = vld [vmem:[%s1634_s0 + $0x4] ss:$8 sps:$4 sm:$0xff]   ;;  %v1237_v9 = vld [vmem:[%s1633_s4 + $0x30] sm:$0xff]  }
   0x3   :  { %208 = vmatprep.subr.bf16.mxu0 %v1136_v0  ;;  %403 = vmatprep.subr.bf16.mxu1 %v1136_v0  ;;  %v1061_v6 = vld [vmem:[%s1635_s1 + $0x4] ss:$8 sps:$4 sm:$0xff]   ;;  %v1246_v10 = vld [vmem:[%s1633_s4 + $0x38] sm:$0xff]   ;;  %v1055_v12 = vld [vmem:[%s1633_s4 + $0x48] ss:$0 sps:$4 sm:$0x77]  }
   0x4   :  { %975 = vmatprep.mubr.msk.bf16.mxu0 %vm180_vm0, %v1058_v5  ;;  %v1218_v7 = vld [vmem:[%s1633_s4 + $0x20] sm:$0xff]   ;;  %996 = vmatprep.mubr.msk.bf16.mxu1 %vm180_vm0, %v1061_v6  ;;  %v1228_v8 = vld [vmem:[%s1633_s4 + $0x28] sm:$0xff]   ;;  %v1266_v13 = vsel %vm202_vm1, %v1055_v12, 0  ;;  %v1062_v16 = vld [vmem:[%s1634_s0 + $0x14] ss:$8 sps:$4 sm:$0xff]  }
   0x5   :  { %v1255_v11 = vld [vmem:[%s1633_s4 + $0x40] sm:$0xff]   ;;  %v1064_v17 = vld [vmem:[%s1635_s1 + $0x14] ss:$8 sps:$4 sm:$0xff]   ;;  %v1066_v18 = vld [vmem:[%s1634_s0 + $0x10] ss:$8 sps:$4 sm:$0xff]  }
   0x6   :  { %209 = vmatpush1.bf16.msra.mxu0 %v1184_v2  ;;  %404 = vmatpush1.bf16.msra.mxu1 %v1184_v2  ;;  %v1056_v14 = vld [vmem:[%s1634_s0] ss:$8 sps:$4 sm:$0xff]   ;;  %v1067_v19 = vld [vmem:[%s1635_s1 + $0x10] ss:$8 sps:$4 sm:$0xff]   ;;  %v1068_v20 = vld [vmem:[%s1634_s0 + $0x24] ss:$8 sps:$4 sm:$0xff]  }
   0x7   :  { %210 = vmatprep.subr.bf16.mxu0 %v1136_v0  ;;  %405 = vmatprep.subr.bf16.mxu1 %v1136_v0  ;;  %v1059_v15 = vld [vmem:[%s1635_s1] ss:$8 sps:$4 sm:$0xff]   ;;  %v1070_v21 = vld [vmem:[%s1635_s1 + $0x24] ss:$8 sps:$4 sm:$0xff]   ;;  %v1074_v24 = vld [vmem:[%s1634_s0 + $0x34] ss:$8 sps:$4 sm:$0xff]  }
   0x8   :  { %v1072_v22 = vld [vmem:[%s1634_s0 + $0x20] ss:$8 sps:$4 sm:$0xff]   ;;  %v1076_v25 = vld [vmem:[%s1635_s1 + $0x34] ss:$8 sps:$4 sm:$0xff]   ;;  %v1078_v26 = vld [vmem:[%s1634_s0 + $0x30] ss:$8 sps:$4 sm:$0xff]  }
   0x9   :  { %v1073_v23 = vld [vmem:[%s1635_s1 + $0x20] ss:$8 sps:$4 sm:$0xff]   ;;  %v1079_v27 = vld [vmem:[%s1635_s1 + $0x30] ss:$8 sps:$4 sm:$0xff]   ;;  %v1080_v28 = vld [vmem:[%s1634_s0 + $0x44] ss:$8 sps:$4 sm:$0xff]  }
   0xa   :  { %211 = vmatpush1.bf16.msra.mxu0 %v1193_v3  ;;  %406 = vmatpush1.bf16.msra.mxu1 %v1193_v3  ;;  %v1082_v29 = vld [vmem:[%s1635_s1 + $0x44] ss:$8 sps:$4 sm:$0xff]   ;;  %v1084_v30 = vld [vmem:[%s1634_s0 + $0x40] ss:$8 sps:$4 sm:$0xff]   ;;  %v1086_v32 = vld [vmem:[%s1634_s0 + $0x54] ss:$8 sps:$4 sm:$0xff]  }
   0xb   :  { %212 = vmatprep.subr.bf16.mxu0 %v1136_v0  ;;  %407 = vmatprep.subr.bf16.mxu1 %v1136_v0  ;;  %v1085_v31 = vld [vmem:[%s1635_s1 + $0x40] ss:$8 sps:$4 sm:$0xff]   ;;  %v1088_v33 = vld [vmem:[%s1635_s1 + $0x54] ss:$8 sps:$4 sm:$0xff]   ;;  %v1090_v36 = vld [vmem:[%s1634_s0 + $0x50] ss:$8 sps:$4 sm:$0xff]  }
   0xc   :  { %v56_v34 = vld [vmem:[%s1634_s0 + $0x60] sm:$0x33]  ;;  %v1091_v37 = vld [vmem:[%s1635_s1 + $0x50] ss:$8 sps:$4 sm:$0xff]   ;;  %v1102_v46 = vld [vmem:[%s1636_s2 + $0x14] ss:$8 sps:$4 sm:$0xff]  }
   0xd   :  { %v319_v35 = vld [vmem:[%s1635_s1 + $0x60] sm:$0x33]  ;;  %v964_v38 = vcombine.high %v56_v34, %v56_v34  ;;  %v963_v40 = vcombine.low %v56_v34, %v56_v34  ;;  %v1104_v47 = vld [vmem:[%s1637_s3 + $0x14] ss:$8 sps:$4 sm:$0xff]   ;;  %v1106_v48 = vld [vmem:[%s1636_s2 + $0x10] ss:$8 sps:$4 sm:$0xff]  }
   0xe   :  { %213 = vmatpush1.bf16.msra.mxu0 %v1202_v4  ;;  %408 = vmatpush1.bf16.msra.mxu1 %v1202_v4  ;;  %v995_v39 = vcombine.high %v319_v35, %v319_v35  ;;  %v994_v41 = vcombine.low %v319_v35, %v319_v35  ;;  %v1098_v42 = vld [vmem:[%s1636_s2 + $0x4] ss:$8 sps:$4 sm:$0xff]   ;;  %v1096_v44 = vld [vmem:[%s1636_s2] ss:$8 sps:$4 sm:$0xff]   ;;  %v1107_v49 = vld [vmem:[%s1637_s3 + $0x10] ss:$8 sps:$4 sm:$0xff]  }
   0xf   :  { %214 = vmatprep.subr.bf16.mxu0 %v1136_v0  ;;  %409 = vmatprep.subr.bf16.mxu1 %v1136_v0  ;;  %v1101_v43 = vld [vmem:[%s1637_s3 + $0x4] ss:$8 sps:$4 sm:$0xff]   ;;  %v1099_v45 = vld [vmem:[%s1637_s3] ss:$8 sps:$4 sm:$0xff]   ;;  %v1114_v54 = vld [vmem:[%s1636_s2 + $0x34] ss:$8 sps:$4 sm:$0xff]  }
  0x10   :  { %v1108_v50 = vld [vmem:[%s1636_s2 + $0x24] ss:$8 sps:$4 sm:$0xff]   ;;  %v1112_v52 = vld [vmem:[%s1636_s2 + $0x20] ss:$8 sps:$4 sm:$0xff]   ;;  %v1116_v55 = vld [vmem:[%s1637_s3 + $0x34] ss:$8 sps:$4 sm:$0xff]  }
  0x11   :  { %v1110_v51 = vld [vmem:[%s1637_s3 + $0x24] ss:$8 sps:$4 sm:$0xff]   ;;  %v1113_v53 = vld [vmem:[%s1637_s3 + $0x20] ss:$8 sps:$4 sm:$0xff]   ;;  %v1118_v56 = vld [vmem:[%s1636_s2 + $0x30] ss:$8 sps:$4 sm:$0xff]  }
  0x12   :  { %215 = vmatpush1.bf16.msra.mxu0 %v1218_v7  ;;  %410 = vmatpush1.bf16.msra.mxu1 %v1218_v7  ;;  %v1119_v57 = vld [vmem:[%s1637_s3 + $0x30] ss:$8 sps:$4 sm:$0xff]   ;;  %v1120_v58 = vld [vmem:[%s1636_s2 + $0x44] ss:$8 sps:$4 sm:$0xff]   ;;  %v1124_v60 = vld [vmem:[%s1636_s2 + $0x40] ss:$8 sps:$4 sm:$0xff]  }
  0x13   :  { %216 = vmatprep.subr.bf16.mxu0 %v1136_v0  ;;  %411 = vmatprep.subr.bf16.mxu1 %v1136_v0  ;;  %v1122_v59 = vld [vmem:[%s1637_s3 + $0x44] ss:$8 sps:$4 sm:$0xff]   ;;  %v1125_v61 = vld [vmem:[%s1637_s3 + $0x40] ss:$8 sps:$4 sm:$0xff]   ;;  %v1126_v62 = vld [vmem:[%s1636_s2 + $0x54] ss:$8 sps:$4 sm:$0xff]  }
  0x14   :  { %v1128_v63 = vld [vmem:[%s1637_s3 + $0x54] ss:$8 sps:$4 sm:$0xff]  }
  0x16   :  { %217 = vmatpush1.bf16.msra.mxu0 %v1228_v8  ;;  %412 = vmatpush1.bf16.msra.mxu1 %v1228_v8 }
  0x17   :  { %218 = vmatprep.subr.bf16.mxu0 %v1136_v0  ;;  %413 = vmatprep.subr.bf16.mxu1 %v1136_v0 }
  0x1a   :  { %219 = vmatpush1.bf16.msra.mxu0 %v1237_v9  ;;  %414 = vmatpush1.bf16.msra.mxu1 %v1237_v9 }
  0x1b   :  { %220 = vmatprep.subr.bf16.mxu0 %v1136_v0  ;;  %415 = vmatprep.subr.bf16.mxu1 %v1136_v0 }
  0x1e   :  { %221 = vmatpush1.bf16.msra.mxu0 %v1246_v10  ;;  %416 = vmatpush1.bf16.msra.mxu1 %v1246_v10 }
  0x1f   :  { %222 = vmatprep.subr.bf16.mxu0 %v1136_v0  ;;  %417 = vmatprep.subr.bf16.mxu1 %v1136_v0 }
  0x22   :  { %223 = vmatpush1.bf16.msra.mxu0 %v1255_v11  ;;  %418 = vmatpush1.bf16.msra.mxu1 %v1255_v11 }
  0x23   :  { %224 = vmatprep.subr.bf16.mxu0 %v1136_v0  ;;  %419 = vmatprep.subr.bf16.mxu1 %v1136_v0 }
  0x26   :  { %225 = vmatpush1.bf16.msra.mxu0 %v1266_v13  ;;  %420 = vmatpush1.bf16.msra.mxu1 %v1266_v13 }
  0x27   :  { %609 = vmatprep.subr.bf16.mxu0 %v1136_v0  ;;  %804 = vmatprep.subr.bf16.mxu1 %v1136_v0 }
  0x29   :  { %239 = vmatmul.mubr.bf16.vlgmr.msra.gmra.mrb[0].mxu0 %v1056_v14  ;;  %434 = vmatmul.mubr.bf16.vlgmr.msra.gmra.mrb[0].mxu1 %v1059_v15 }
  0x2a   :  { %610 = vmatpush1.bf16.msra.mxu0 %v1177_v1  ;;  %805 = vmatpush1.bf16.msra.mxu1 %v1177_v1  ;;  %v722_v1 = vld [vmem:[%s1637_s3 + $0x60] sm:$0x33] }
  0x2b   :  { %611 = vmatprep.subr.bf16.mxu0 %v1136_v0  ;;  %806 = vmatprep.subr.bf16.mxu1 %v1136_v0  ;;  %v1037_v5 = vcombine.high %v722_v1, %v722_v1 }
  0x2c   :  { %976 = vmatprep.mubr.msk.bf16.mxu0 %vm180_vm0, %v1062_v16  ;;  %997 = vmatprep.mubr.msk.bf16.mxu1 %vm180_vm0, %v1064_v17 }
  0x2e   :  { %612 = vmatpush1.bf16.msra.mxu0 %v1184_v2  ;;  %807 = vmatpush1.bf16.msra.mxu1 %v1184_v2  ;;  %v1130_v2 = vld [vmem:[%s1636_s2 + $0x50] ss:$8 sps:$4 sm:$0xff]  }
  0x2f   :  { %613 = vmatprep.subr.bf16.mxu0 %v1136_v0  ;;  %808 = vmatprep.subr.bf16.mxu1 %v1136_v0 }
  0x31   :  { %247 = vmatmul.mubr.bf16.gmra.mrb[4].mxu0 %v1066_v18  ;;  %442 = vmatmul.mubr.bf16.gmra.mrb[4].mxu1 %v1067_v19 }
  0x32   :  { %614 = vmatpush1.bf16.msra.mxu0 %v1193_v3  ;;  %809 = vmatpush1.bf16.msra.mxu1 %v1193_v3  ;;  %v1131_v3 = vld [vmem:[%s1637_s3 + $0x50] ss:$8 sps:$4 sm:$0xff]  }
  0x33   :  { %977 = vmatprep.mubr.msk.bf16.mxu0 %vm180_vm0, %v1068_v20  ;;  %998 = vmatprep.mubr.msk.bf16.mxu1 %vm180_vm0, %v1070_v21 }
  0x34   :  { %615 = vmatprep.subr.bf16.mxu0 %v1136_v0  ;;  %810 = vmatprep.subr.bf16.mxu1 %v1136_v0 }
  0x36   :  { %616 = vmatpush1.bf16.msra.mxu0 %v1202_v4  ;;  %811 = vmatpush1.bf16.msra.mxu1 %v1202_v4 }
  0x37   :  { %617 = vmatprep.subr.bf16.mxu0 %v1136_v0  ;;  %812 = vmatprep.subr.bf16.mxu1 %v1136_v0 }
  0x39   :  { %255 = vmatmul.mubr.bf16.gmra.mrb[8].mxu0 %v1072_v22  ;;  %450 = vmatmul.mubr.bf16.gmra.mrb[8].mxu1 %v1073_v23 }
  0x3a   :  { %978 = vmatprep.mubr.msk.bf16.mxu0 %vm180_vm0, %v1074_v24  ;;  %999 = vmatprep.mubr.msk.bf16.mxu1 %vm180_vm0, %v1076_v25 }
  0x3b   :  { %618 = vmatpush1.bf16.msra.mxu0 %v1218_v7  ;;  %813 = vmatpush1.bf16.msra.mxu1 %v1218_v7  ;;  %v1036_v7 = vcombine.low %v722_v1, %v722_v1 }
  0x3c   :  { %619 = vmatprep.subr.bf16.mxu0 %v1136_v0  ;;  %814 = vmatprep.subr.bf16.mxu1 %v1136_v0 }
  0x3f   :  { %620 = vmatpush1.bf16.msra.mxu0 %v1228_v8  ;;  %815 = vmatpush1.bf16.msra.mxu1 %v1228_v8  ;;  %v1489_v8 = vld [vmem:[%s1638_s5] ss:$0 sm:$0xff] }
  0x40   :  { %621 = vmatprep.subr.bf16.mxu0 %v1136_v0  ;;  %816 = vmatprep.subr.bf16.mxu1 %v1136_v0 }
  0x41   :  { %263 = vmatmul.mubr.bf16.gmra.mrb[12].mxu0 %v1078_v26  ;;  %458 = vmatmul.mubr.bf16.gmra.mrb[12].mxu1 %v1079_v27 }
  0x42   :  { %979 = vmatprep.mubr.msk.bf16.mxu0 %vm180_vm0, %v1080_v28  ;;  %1000 = vmatprep.mubr.msk.bf16.mxu1 %vm180_vm0, %v1082_v29 }
  0x43   :  { %622 = vmatpush1.bf16.msra.mxu0 %v1237_v9  ;;  %817 = vmatpush1.bf16.msra.mxu1 %v1237_v9 }
  0x44   :  { %623 = vmatprep.subr.bf16.mxu0 %v1136_v0  ;;  %818 = vmatprep.subr.bf16.mxu1 %v1136_v0 }
  0x47   :  { %624 = vmatpush1.bf16.msra.mxu0 %v1246_v10  ;;  %819 = vmatpush1.bf16.msra.mxu1 %v1246_v10 }
  0x48   :  { %625 = vmatprep.subr.bf16.mxu0 %v1136_v0  ;;  %820 = vmatprep.subr.bf16.mxu1 %v1136_v0 }
  0x49   :  { %271 = vmatmul.mubr.bf16.gmra.mrb[16].mxu0 %v1084_v30  ;;  %466 = vmatmul.mubr.bf16.gmra.mrb[16].mxu1 %v1085_v31 }
  0x4a   :  { %980 = vmatprep.mubr.msk.bf16.mxu0 %vm180_vm0, %v1086_v32  ;;  %1001 = vmatprep.mubr.msk.bf16.mxu1 %vm180_vm0, %v1088_v33 }
  0x4b   :  { %626 = vmatpush1.bf16.msra.mxu0 %v1255_v11  ;;  %821 = vmatpush1.bf16.msra.mxu1 %v1255_v11 }
  0x4c   :  { %627 = vmatprep.subr.bf16.mxu0 %v1136_v0  ;;  %822 = vmatprep.subr.bf16.mxu1 %v1136_v0  ;;  %v527_v0 = vld [vmem:[%s1636_s2 + $0x60] sm:$0x33] }
  0x4d   :  { %v1016_v4 = vcombine.high %v527_v0, %v527_v0  ;;  %v1015_v6 = vcombine.low %v527_v0, %v527_v0 }
  0x4f   :  { %628 = vmatpush1.bf16.msra.mxu0 %v1266_v13  ;;  %823 = vmatpush1.bf16.msra.mxu1 %v1266_v13 }
  0x51   :  { %279 = vmatmul.mubr.bf16.gmra.mrb[20].mxu0 %v1090_v36  ;;  %474 = vmatmul.mubr.bf16.gmra.mrb[20].mxu1 %v1091_v37 }
  0x52   :  { %981 = vmatprep.mubr.msk.bf16.mxu0 %vm180_vm0, %v964_v38  ;;  %1002 = vmatprep.mubr.msk.bf16.mxu1 %vm180_vm0, %v995_v39 }
  0x59   :  { %287 = vmatmul.mubr.bf16.gmra.mrb[24].mxu0 %v963_v40  ;;  %482 = vmatmul.mubr.bf16.gmra.mrb[24].mxu1 %v994_v41 }
  0x5a   :  { %1017 = vmatprep.mubr.msk.bf16.mxu0 %vm180_vm0, %v1098_v42  ;;  %1038 = vmatprep.mubr.msk.bf16.mxu1 %vm180_vm0, %v1101_v43 }
  0x61   :  { %642 = vmatmul.mubr.bf16.vlgmr.msra.gmra.mrb[28].mxu0 %v1096_v44  ;;  %837 = vmatmul.mubr.bf16.vlgmr.msra.gmra.mrb[28].mxu1 %v1099_v45 }
  0x62   :  { %1018 = vmatprep.mubr.msk.bf16.mxu0 %vm180_vm0, %v1102_v46  ;;  %1039 = vmatprep.mubr.msk.bf16.mxu1 %vm180_vm0, %v1104_v47 }
  0x69   :  { %650 = vmatmul.mubr.bf16.gmra.mrb[32].mxu0 %v1106_v48  ;;  %845 = vmatmul.mubr.bf16.gmra.mrb[32].mxu1 %v1107_v49 }
  0x6a   :  { %1019 = vmatprep.mubr.msk.bf16.mxu0 %vm180_vm0, %v1108_v50  ;;  %1040 = vmatprep.mubr.msk.bf16.mxu1 %vm180_vm0, %v1110_v51 }
  0x71   :  { %658 = vmatmul.mubr.bf16.gmra.mrb[36].mxu0 %v1112_v52  ;;  %853 = vmatmul.mubr.bf16.gmra.mrb[36].mxu1 %v1113_v53 }
  0x72   :  { %1020 = vmatprep.mubr.msk.bf16.mxu0 %vm180_vm0, %v1114_v54  ;;  %1041 = vmatprep.mubr.msk.bf16.mxu1 %vm180_vm0, %v1116_v55 }
  0x79   :  { %666 = vmatmul.mubr.bf16.gmra.mrb[40].mxu0 %v1118_v56  ;;  %861 = vmatmul.mubr.bf16.gmra.mrb[40].mxu1 %v1119_v57 }
  0x7a   :  { %1021 = vmatprep.mubr.msk.bf16.mxu0 %vm180_vm0, %v1120_v58  ;;  %1042 = vmatprep.mubr.msk.bf16.mxu1 %vm180_vm0, %v1122_v59 }
  0x81   :  { %674 = vmatmul.mubr.bf16.gmra.mrb[44].mxu0 %v1124_v60  ;;  %869 = vmatmul.mubr.bf16.gmra.mrb[44].mxu1 %v1125_v61 }
  0x82   :  { %1022 = vmatprep.mubr.msk.bf16.mxu0 %vm180_vm0, %v1126_v62  ;;  %1043 = vmatprep.mubr.msk.bf16.mxu1 %vm180_vm0, %v1128_v63 }
  0x89   :  { %682 = vmatmul.mubr.bf16.gmra.mrb[48].mxu0 %v1130_v2  ;;  %877 = vmatmul.mubr.bf16.gmra.mrb[48].mxu1 %v1131_v3 }
  0x8a   :  { %1023 = vmatprep.mubr.msk.bf16.mxu0 %vm180_vm0, %v1016_v4  ;;  %1044 = vmatprep.mubr.msk.bf16.mxu1 %vm180_vm0, %v1037_v5 }
  0x91   :  { %690 = vmatmul.mubr.bf16.gmra.mrb[52].mxu0 %v1015_v6  ;;  %885 = vmatmul.mubr.bf16.gmra.mrb[52].mxu1 %v1036_v7 }
  0xfc   :  { %v240_v9 = vpop.f32.mrb[0].mxu0  ;;  %v435_v10 = vpop.f32.mrb[0].mxu1 }
  0xfd   :  { %v241_v11 = vadd.f32 %v1489_v8, %v240_v9  ;;  %v436_v12 = vadd.f32 %v1489_v8, %v435_v10  ;;  %v242_v13 = vpop.f32.mrb[1].mxu0  ;;  %v437_v14 = vpop.f32.mrb[1].mxu1 }
  0xfe   :  { %v243_v15 = vpop.f32.mrb[2].mxu0  ;;  %v438_v16 = vpop.f32.mrb[2].mxu1 }
  0xff   :  { %v294_v17 = vmax.f32 %v241_v11, 0.0  ;;  %v489_v18 = vmax.f32 %v436_v12, 0.0  ;;  %v244_v19 = vadd.f32 %v1489_v8, %v243_v15  ;;  %v439_v20 = vadd.f32 %v1489_v8, %v438_v16  ;;  %v245_v21 = vpop.f32.mrb[3].mxu0  ;;  %v440_v22 = vpop.f32.mrb[3].mxu1 }
 0x101   :  { %v1495_v23 = vmax.f32 %v294_v17, %v489_v18  ;;  %v295_v24 = vmax.f32 %v244_v19, 0.0  ;;  %v490_v25 = vmax.f32 %v439_v20, 0.0 }
 0x103   :  { %v1497_v26 = vmax.f32 %v295_v24, %v490_v25 }
 0x104   :  { %v248_v27 = vpop.f32.mrb[4].mxu0  ;;  %v443_v28 = vpop.f32.mrb[4].mxu1 }
 0x105   :  { %v249_v29 = vadd.f32 %v1489_v8, %v248_v27  ;;  %v444_v30 = vadd.f32 %v1489_v8, %v443_v28  ;;  %v250_v31 = vpop.f32.mrb[5].mxu0  ;;  %v445_v32 = vpop.f32.mrb[5].mxu1 }
 0x106   :  { %v251_v33 = vpop.f32.mrb[6].mxu0  ;;  %v446_v34 = vpop.f32.mrb[6].mxu1 }
 0x107   :  { %v296_v35 = vmax.f32 %v249_v29, 0.0  ;;  %v491_v36 = vmax.f32 %v444_v30, 0.0  ;;  %v252_v37 = vadd.f32 %v1489_v8, %v251_v33  ;;  %v447_v38 = vadd.f32 %v1489_v8, %v446_v34  ;;  %v253_v39 = vpop.f32.mrb[7].mxu0  ;;  %v448_v40 = vpop.f32.mrb[7].mxu1 }
 0x109   :  { %v1503_v41 = vmax.f32 %v296_v35, %v491_v36  ;;  %v297_v42 = vmax.f32 %v252_v37, 0.0  ;;  %v492_v43 = vmax.f32 %v447_v38, 0.0 }
 0x10b   :  { %v1505_v44 = vmax.f32 %v297_v42, %v492_v43 }
 0x10c   :  { %v256_v45 = vpop.f32.mrb[8].mxu0  ;;  %v451_v46 = vpop.f32.mrb[8].mxu1 }
 0x10d   :  { %v257_v47 = vadd.f32 %v1489_v8, %v256_v45  ;;  %v452_v48 = vadd.f32 %v1489_v8, %v451_v46  ;;  %v258_v49 = vpop.f32.mrb[9].mxu0  ;;  %v453_v50 = vpop.f32.mrb[9].mxu1 }
 0x10e   :  { %v259_v51 = vpop.f32.mrb[10].mxu0  ;;  %v454_v52 = vpop.f32.mrb[10].mxu1 }
 0x10f   :  { %v298_v53 = vmax.f32 %v257_v47, 0.0  ;;  %v493_v54 = vmax.f32 %v452_v48, 0.0  ;;  %v260_v55 = vadd.f32 %v1489_v8, %v259_v51  ;;  %v455_v56 = vadd.f32 %v1489_v8, %v454_v52  ;;  %v261_v57 = vpop.f32.mrb[11].mxu0  ;;  %v456_v58 = vpop.f32.mrb[11].mxu1 }
 0x111   :  { %v1511_v59 = vmax.f32 %v298_v53, %v493_v54  ;;  %v299_v60 = vmax.f32 %v260_v55, 0.0  ;;  %v494_v61 = vmax.f32 %v455_v56, 0.0 }
 0x113   :  { %v1513_v62 = vmax.f32 %v299_v60, %v494_v61 }
 0x114   :  { %v264_v63 = vpop.f32.mrb[12].mxu0  ;;  %v459_v0 = vpop.f32.mrb[12].mxu1 }
 0x115   :  { %v265_v1 = vadd.f32 %v1489_v8, %v264_v63  ;;  %v460_v2 = vadd.f32 %v1489_v8, %v459_v0  ;;  %v266_v3 = vpop.f32.mrb[13].mxu0  ;;  %v461_v4 = vpop.f32.mrb[13].mxu1 }
 0x116   :  { %v267_v5 = vpop.f32.mrb[14].mxu0  ;;  %v462_v6 = vpop.f32.mrb[14].mxu1 }
 0x117   :  { %v300_v7 = vmax.f32 %v265_v1, 0.0  ;;  %v495_v9 = vmax.f32 %v460_v2, 0.0  ;;  %v268_v10 = vadd.f32 %v1489_v8, %v267_v5  ;;  %v463_v11 = vadd.f32 %v1489_v8, %v462_v6  ;;  %v269_v12 = vpop.f32.mrb[15].mxu0  ;;  %v464_v13 = vpop.f32.mrb[15].mxu1 }
 0x119   :  { %v1519_v14 = vmax.f32 %v300_v7, %v495_v9  ;;  %v301_v15 = vmax.f32 %v268_v10, 0.0  ;;  %v496_v16 = vmax.f32 %v463_v11, 0.0 }
 0x11b   :  { %v1521_v17 = vmax.f32 %v301_v15, %v496_v16 }
 0x11c   :  { %v272_v18 = vpop.f32.mrb[16].mxu0  ;;  %v467_v19 = vpop.f32.mrb[16].mxu1 }
 0x11d   :  { %v273_v20 = vadd.f32 %v1489_v8, %v272_v18  ;;  %v468_v21 = vadd.f32 %v1489_v8, %v467_v19  ;;  %v274_v22 = vpop.f32.mrb[17].mxu0  ;;  %v469_v24 = vpop.f32.mrb[17].mxu1 }
 0x11e   :  { %v275_v25 = vpop.f32.mrb[18].mxu0  ;;  %v470_v27 = vpop.f32.mrb[18].mxu1 }
 0x11f   :  { %v302_v28 = vmax.f32 %v273_v20, 0.0  ;;  %v497_v29 = vmax.f32 %v468_v21, 0.0  ;;  %v276_v30 = vadd.f32 %v1489_v8, %v275_v25  ;;  %v471_v31 = vadd.f32 %v1489_v8, %v470_v27  ;;  %v277_v32 = vpop.f32.mrb[19].mxu0  ;;  %v472_v33 = vpop.f32.mrb[19].mxu1 }
 0x121   :  { %v1527_v34 = vmax.f32 %v302_v28, %v497_v29  ;;  %v303_v35 = vmax.f32 %v276_v30, 0.0  ;;  %v498_v36 = vmax.f32 %v471_v31, 0.0 }
 0x123   :  { %v1529_v37 = vmax.f32 %v303_v35, %v498_v36 }
 0x124   :  { %v280_v38 = vpop.f32.mrb[20].mxu0  ;;  %v475_v39 = vpop.f32.mrb[20].mxu1 }
 0x125   :  { %v281_v40 = vadd.f32 %v1489_v8, %v280_v38  ;;  %v476_v42 = vadd.f32 %v1489_v8, %v475_v39  ;;  %v282_v43 = vpop.f32.mrb[21].mxu0  ;;  %v477_v45 = vpop.f32.mrb[21].mxu1 }
 0x126   :  { %v283_v46 = vpop.f32.mrb[22].mxu0  ;;  %v478_v47 = vpop.f32.mrb[22].mxu1 }
 0x127   :  { %v304_v48 = vmax.f32 %v281_v40, 0.0  ;;  %v499_v49 = vmax.f32 %v476_v42, 0.0  ;;  %v284_v50 = vadd.f32 %v1489_v8, %v283_v46  ;;  %v479_v51 = vadd.f32 %v1489_v8, %v478_v47  ;;  %v285_v52 = vpop.f32.mrb[23].mxu0  ;;  %v480_v53 = vpop.f32.mrb[23].mxu1 }
 0x129   :  { %v1535_v54 = vmax.f32 %v304_v48, %v499_v49  ;;  %v305_v55 = vmax.f32 %v284_v50, 0.0  ;;  %v500_v56 = vmax.f32 %v479_v51, 0.0 }
 0x12b   :  { %v1537_v57 = vmax.f32 %v305_v55, %v500_v56 }
 0x12c   :  { %v288_v58 = vpop.f32.mrb[24].mxu0  ;;  %v483_v60 = vpop.f32.mrb[24].mxu1 }
 0x12d   :  { %v289_v61 = vadd.f32 %v1489_v8, %v288_v58  ;;  %v484_v63 = vadd.f32 %v1489_v8, %v483_v60  ;;  %v290_v0 = vpop.f32.mrb[25].mxu0  ;;  %v485_v1 = vpop.f32.mrb[25].mxu1 }
 0x12e   :  { %v291_v2 = vpop.f32.mrb[26].mxu0  ;;  %v486_v3 = vpop.f32.mrb[26].mxu1 }
 0x12f   :  { %v306_v4 = vmax.f32 %v289_v61, 0.0  ;;  %v501_v5 = vmax.f32 %v484_v63, 0.0  ;;  %v292_v6 = vpop.f32.mrb[27].mxu0  ;;  %v487_v7 = vpop.f32.mrb[27].mxu1 }
 0x131   :  { %v1541_v9 = vmax.f32 %v306_v4, %v501_v5 }
 0x134   :  { %v643_v10 = vpop.f32.mrb[28].mxu0  ;;  %v838_v11 = vpop.f32.mrb[28].mxu1 }
 0x135   :  { %v644_v12 = vadd.f32 %v1489_v8, %v643_v10  ;;  %v839_v13 = vadd.f32 %v1489_v8, %v838_v11  ;;  %v645_v15 = vpop.f32.mrb[29].mxu0  ;;  %v840_v16 = vpop.f32.mrb[29].mxu1 }
 0x136   :  { %v646_v18 = vpop.f32.mrb[30].mxu0  ;;  %v841_v19 = vpop.f32.mrb[30].mxu1 }
 0x137   :  { %v697_v20 = vmax.f32 %v644_v12, 0.0  ;;  %v892_v21 = vmax.f32 %v839_v13, 0.0  ;;  %v647_v22 = vadd.f32 %v1489_v8, %v646_v18  ;;  %v842_v24 = vadd.f32 %v1489_v8, %v841_v19  ;;  %v648_v25 = vpop.f32.mrb[31].mxu0  ;;  %v843_v27 = vpop.f32.mrb[31].mxu1 }
 0x139   :  { %v905_v28 = vmax.f32 %v697_v20, %v892_v21  ;;  %v698_v29 = vmax.f32 %v647_v22, 0.0  ;;  %v893_v30 = vmax.f32 %v842_v24, 0.0 }
 0x13b   :  { %v918_v31 = vmax.f32 %v1495_v23, %v905_v28  ;;  %v906_v32 = vmax.f32 %v698_v29, %v893_v30 }
 0x13c   :  { %v651_v33 = vpop.f32.mrb[32].mxu0  ;;  %v846_v35 = vpop.f32.mrb[32].mxu1 }
 0x13d   :  { %932 = vst.msk [vmem:[%s1639_s6] sm:$0xff] %vm931_vm2, %v918_v31  ;;  %v919_v36 = vmax.f32 %v1497_v26, %v906_v32  ;;  %v652_v38 = vadd.f32 %v1489_v8, %v651_v33  ;;  %v847_v39 = vadd.f32 %v1489_v8, %v846_v35  ;;  %v653_v40 = vpop.f32.mrb[33].mxu0  ;;  %v848_v42 = vpop.f32.mrb[33].mxu1 }
 0x13e   :  { %v654_v43 = vpop.f32.mrb[34].mxu0  ;;  %v849_v45 = vpop.f32.mrb[34].mxu1 }
 0x13f   :  { %933 = vst.msk [vmem:[%s1639_s6 + $0x8] sm:$0xff] %vm931_vm2, %v919_v36  ;;  %v699_v23 = vmax.f32 %v652_v38, 0.0  ;;  %v894_v46 = vmax.f32 %v847_v39, 0.0  ;;  %v655_v47 = vadd.f32 %v1489_v8, %v654_v43  ;;  %v850_v48 = vadd.f32 %v1489_v8, %v849_v45  ;;  %v656_v26 = vpop.f32.mrb[35].mxu0  ;;  %v851_v49 = vpop.f32.mrb[35].mxu1 }
 0x141   :  { %v907_v50 = vmax.f32 %v699_v23, %v894_v46  ;;  %v700_v51 = vmax.f32 %v655_v47, 0.0  ;;  %v895_v52 = vmax.f32 %v850_v48, 0.0 }
 0x143   :  { %v920_v53 = vmax.f32 %v1503_v41, %v907_v50  ;;  %v908_v55 = vmax.f32 %v700_v51, %v895_v52 }
 0x144   :  { %v659_v56 = vpop.f32.mrb[36].mxu0  ;;  %v854_v58 = vpop.f32.mrb[36].mxu1 }
 0x145   :  { %934 = vst.msk [vmem:[%s1639_s6 + $0x10] sm:$0xff] %vm931_vm2, %v920_v53  ;;  %v921_v60 = vmax.f32 %v1505_v44, %v908_v55  ;;  %v660_v61 = vadd.f32 %v1489_v8, %v659_v56  ;;  %v855_v63 = vadd.f32 %v1489_v8, %v854_v58  ;;  %v661_v0 = vpop.f32.mrb[37].mxu0  ;;  %v856_v1 = vpop.f32.mrb[37].mxu1 }
 0x146   :  { %v662_v2 = vpop.f32.mrb[38].mxu0  ;;  %v857_v3 = vpop.f32.mrb[38].mxu1 }
 0x147   :  { %935 = vst.msk [vmem:[%s1639_s6 + $0x18] sm:$0xff] %vm931_vm2, %v921_v60  ;;  %v701_v41 = vmax.f32 %v660_v61, 0.0  ;;  %v896_v4 = vmax.f32 %v855_v63, 0.0  ;;  %v663_v5 = vadd.f32 %v1489_v8, %v662_v2  ;;  %v858_v6 = vadd.f32 %v1489_v8, %v857_v3  ;;  %v664_v44 = vpop.f32.mrb[39].mxu0  ;;  %v859_v7 = vpop.f32.mrb[39].mxu1 }
 0x149   :  { %v909_v10 = vmax.f32 %v701_v41, %v896_v4  ;;  %v702_v11 = vmax.f32 %v663_v5, 0.0  ;;  %v897_v12 = vmax.f32 %v858_v6, 0.0 }
 0x14b   :  { %v922_v13 = vmax.f32 %v1511_v59, %v909_v10  ;;  %v910_v15 = vmax.f32 %v702_v11, %v897_v12 }
 0x14c   :  { %v667_v16 = vpop.f32.mrb[40].mxu0  ;;  %v862_v18 = vpop.f32.mrb[40].mxu1 }
 0x14d   :  { %936 = vst.msk [vmem:[%s1639_s6 + $0x20] sm:$0xff] %vm931_vm2, %v922_v13  ;;  %v923_v19 = vmax.f32 %v1513_v62, %v910_v15  ;;  %v668_v20 = vadd.f32 %v1489_v8, %v667_v16  ;;  %v863_v21 = vadd.f32 %v1489_v8, %v862_v18  ;;  %v669_v22 = vpop.f32.mrb[41].mxu0  ;;  %v864_v24 = vpop.f32.mrb[41].mxu1 }
 0x14e   :  { %v670_v25 = vpop.f32.mrb[42].mxu0  ;;  %v865_v27 = vpop.f32.mrb[42].mxu1 }
 0x14f   :  { %937 = vst.msk [vmem:[%s1639_s6 + $0x28] sm:$0xff] %vm931_vm2, %v923_v19  ;;  %v703_v59 = vmax.f32 %v668_v20, 0.0  ;;  %v898_v28 = vmax.f32 %v863_v21, 0.0  ;;  %v671_v29 = vadd.f32 %v1489_v8, %v670_v25  ;;  %v866_v30 = vadd.f32 %v1489_v8, %v865_v27  ;;  %v672_v62 = vpop.f32.mrb[43].mxu0  ;;  %v867_v31 = vpop.f32.mrb[43].mxu1 }
 0x151   :  { %v911_v32 = vmax.f32 %v703_v59, %v898_v28  ;;  %v704_v33 = vmax.f32 %v671_v29, 0.0  ;;  %v899_v35 = vmax.f32 %v866_v30, 0.0 }
 0x153   :  { %v924_v36 = vmax.f32 %v1519_v14, %v911_v32  ;;  %v912_v38 = vmax.f32 %v704_v33, %v899_v35 }
 0x154   :  { %v675_v39 = vpop.f32.mrb[44].mxu0  ;;  %v870_v40 = vpop.f32.mrb[44].mxu1 }
 0x155   :  { %938 = vst.msk [vmem:[%s1639_s6 + $0x30] sm:$0xff] %vm931_vm2, %v924_v36  ;;  %v925_v42 = vmax.f32 %v1521_v17, %v912_v38  ;;  %v676_v43 = vadd.f32 %v1489_v8, %v675_v39  ;;  %v871_v45 = vadd.f32 %v1489_v8, %v870_v40  ;;  %v677_v23 = vpop.f32.mrb[45].mxu0  ;;  %v872_v46 = vpop.f32.mrb[45].mxu1 }
 0x156   :  { %v678_v47 = vpop.f32.mrb[46].mxu0  ;;  %v873_v48 = vpop.f32.mrb[46].mxu1 }
 0x157   :  { %939 = vst.msk [vmem:[%s1639_s6 + $0x38] sm:$0xff] %vm931_vm2, %v925_v42  ;;  %v705_v14 = vmax.f32 %v676_v43, 0.0  ;;  %v900_v26 = vmax.f32 %v871_v45, 0.0  ;;  %v679_v49 = vadd.f32 %v1489_v8, %v678_v47  ;;  %v874_v50 = vadd.f32 %v1489_v8, %v873_v48  ;;  %v680_v17 = vpop.f32.mrb[47].mxu0  ;;  %v875_v51 = vpop.f32.mrb[47].mxu1 }
 0x159   :  { %v913_v52 = vmax.f32 %v705_v14, %v900_v26  ;;  %v706_v53 = vmax.f32 %v679_v49, 0.0  ;;  %v901_v55 = vmax.f32 %v874_v50, 0.0 }
 0x15b   :  { %v926_v56 = vmax.f32 %v1527_v34, %v913_v52  ;;  %v914_v58 = vmax.f32 %v706_v53, %v901_v55 }
 0x15c   :  { %v683_v60 = vpop.f32.mrb[48].mxu0  ;;  %v878_v61 = vpop.f32.mrb[48].mxu1 }
 0x15d   :  { %940 = vst.msk [vmem:[%s1639_s6 + $0x40] sm:$0xff] %vm931_vm2, %v926_v56  ;;  %v927_v63 = vmax.f32 %v1529_v37, %v914_v58  ;;  %v684_v0 = vadd.f32 %v1489_v8, %v683_v60  ;;  %v879_v1 = vadd.f32 %v1489_v8, %v878_v61  ;;  %v685_v2 = vpop.f32.mrb[49].mxu0  ;;  %v880_v3 = vpop.f32.mrb[49].mxu1 }
 0x15e   :  { %v686_v41 = vpop.f32.mrb[50].mxu0  ;;  %v881_v4 = vpop.f32.mrb[50].mxu1 }
 0x15f   :  { %941 = vst.msk [vmem:[%s1639_s6 + $0x48] sm:$0xff] %vm931_vm2, %v927_v63  ;;  %v707_v34 = vmax.f32 %v684_v0, 0.0  ;;  %v902_v5 = vmax.f32 %v879_v1, 0.0  ;;  %v687_v6 = vadd.f32 %v1489_v8, %v686_v41  ;;  %v882_v44 = vadd.f32 %v1489_v8, %v881_v4  ;;  %v688_v37 = vpop.f32.mrb[51].mxu0  ;;  %v883_v7 = vpop.f32.mrb[51].mxu1 }
 0x161   :  { %v915_v10 = vmax.f32 %v707_v34, %v902_v5  ;;  %v708_v11 = vmax.f32 %v687_v6, 0.0  ;;  %v903_v12 = vmax.f32 %v882_v44, 0.0 }
 0x163   :  { %v928_v13 = vmax.f32 %v1535_v54, %v915_v10  ;;  %v916_v15 = vmax.f32 %v708_v11, %v903_v12 }
 0x164   :  { %v691_v16 = vpop.f32.mrb[52].mxu0  ;;  %v886_v18 = vpop.f32.mrb[52].mxu1 }
 0x165   :  { %942 = vst.msk [vmem:[%s1639_s6 + $0x50] sm:$0xff] %vm931_vm2, %v928_v13  ;;  %v929_v19 = vmax.f32 %v1537_v57, %v916_v15  ;;  %v692_v20 = vadd.f32 %v1489_v8, %v691_v16  ;;  %v887_v21 = vadd.f32 %v1489_v8, %v886_v18  ;;  %v693_v22 = vpop.f32.mrb[53].mxu0  ;;  %v888_v24 = vpop.f32.mrb[53].mxu1 }
 0x166   :  { %v694_v25 = vpop.f32.mrb[54].mxu0  ;;  %v889_v27 = vpop.f32.mrb[54].mxu1 }
 0x167   :  { %943 = vst.msk [vmem:[%s1639_s6 + $0x58] sm:$0xff] %vm931_vm2, %v929_v19  ;;  %v709_v54 = vmax.f32 %v692_v20, 0.0  ;;  %v904_v59 = vmax.f32 %v887_v21, 0.0  ;;  %v695_v28 = vpop.f32.mrb[55].mxu0  ;;  %v890_v29 = vpop.f32.mrb[55].mxu1 }
 0x169   :  { %v917_v30 = vmax.f32 %v709_v54, %v904_v59 }
 0x16b   :  { %v930_v57 = vmax.f32 %v1541_v9, %v917_v30 }
 0x16d   :  { %945 = vst.msk [vmem:[%s1639_s6 + $0x60] sm:$0xf] %vm944_vm3, %v930_v57 }

// kernel: cnn3_forward.5
= control target key start
LH: loop header
LB: loop body
LE: loop exit
PB: predicated region body
PF: predicated region fallthrough
CT: control target
= control target key end

     0   :  { %v746_v4 = vmov 0.0|0.0   ;;  %s1086_s0 = inlined_call_operand.vmem [shape: f32[4,400], index: 0, kind: input, shape index: {}]   ;;  %s1087_s1 = inlined_call_operand.vmem [shape: f32[400,120], index: 1, kind: input, shape index: {}]   ;;  %s1088_s2 = inlined_call_operand.vmem [shape: f32[1,120], index: 2, kind: input, shape index: {}]   ;;  %s1089_s3 = inlined_call_operand.vmem [shape: f32[1,120], index: 3, kind: input, shape index: {}]   ;;  %s1090_s4 = inlined_call_operand.vmem [shape: f32[1,120], index: 4, kind: input, shape index: {}]   ;;  %s1091_s5 = inlined_call_operand.vmem [shape: f32[120,84], index: 5, kind: input, shape index: {}]   ;;  %s1092_s6 = inlined_call_operand.vmem [shape: f32[1,84], index: 6, kind: input, shape index: {}]   ;;  %s1093_s7 = inlined_call_operand.vmem [shape: f32[84,10], index: 7, kind: input, shape index: {}]   ;;  %s1094_s8 = inlined_call_operand.vmem [shape: f32[1,10], index: 8, kind: input, shape index: {}]   ;;  %s1095_s9 = inlined_call_operand.hbm [shape: f32[4,10], index: 9, kind: output, shape index: {}]  }
   0x1   :  { %v51_v0 = vld [vmem:[%s1087_s1 + $0x80] sm:$0xff]  ;;  %v52_v1 = vld [vmem:[%s1087_s1 + $0x88] sm:$0xff]  ;;  %651 = vmatprep.subr.bf16.mxu1 %v746_v4  ;;  %v53_v10 = vld [vmem:[%s1087_s1 + $0x90] sm:$0xff] }
   0x2   :  { %v35_v2 = vld [vmem:[%s1087_s1] sm:$0xff]  ;;  %v619_v3 = vpack.c.bf16 %v52_v1, %v51_v0  ;;  %v36_v5 = vld [vmem:[%s1087_s1 + $0x8] sm:$0xff]  ;;  %v54_v11 = vld [vmem:[%s1087_s1 + $0x98] sm:$0xff] }
   0x3   :  { %v67_v6 = vld [vmem:[%s1087_s1 + $0x100] sm:$0xff]  ;;  %v68_v7 = vld [vmem:[%s1087_s1 + $0x108] sm:$0xff]  ;;  %v621_v8 = vpack.c.bf16 %v36_v5, %v35_v2  ;;  %v37_v12 = vld [vmem:[%s1087_s1 + $0x10] sm:$0xff]  ;;  %v623_v13 = vpack.c.bf16 %v54_v11, %v53_v10 }
   0x4   :  { %v652_v9 = vpack.c.bf16 %v68_v7, %v67_v6  ;;  %620 = vmatprep.subr.bf16.mxu0 %v619_v3  ;;  %v38_v14 = vld [vmem:[%s1087_s1 + $0x18] sm:$0xff]  ;;  %v69_v15 = vld [vmem:[%s1087_s1 + $0x110] sm:$0xff]  ;;  %v55_v19 = vld [vmem:[%s1087_s1 + $0xa0] sm:$0xff] }
   0x5   :  { %v70_v16 = vld [vmem:[%s1087_s1 + $0x118] sm:$0xff]  ;;  %622 = vmatpush3.bf16.msra.mxu0 %v621_v8  ;;  %v625_v17 = vpack.c.bf16 %v38_v14, %v37_v12  ;;  %v56_v20 = vld [vmem:[%s1087_s1 + $0xa8] sm:$0xff]  ;;  %v39_v21 = vld [vmem:[%s1087_s1 + $0x20] sm:$0xff] }
   0x6   :  { %653 = vmatpush1.bf16.msra.mxu1 %v652_v9  ;;  %v655_v18 = vpack.c.bf16 %v70_v16, %v69_v15  ;;  %624 = vmatprep.subr.bf16.mxu0 %v623_v13  ;;  %v627_v22 = vpack.c.bf16 %v56_v20, %v55_v19  ;;  %v40_v23 = vld [vmem:[%s1087_s1 + $0x28] sm:$0xff]  ;;  %v71_v24 = vld [vmem:[%s1087_s1 + $0x120] sm:$0xff]  ;;  %v57_v26 = vld [vmem:[%s1087_s1 + $0xb0] sm:$0xff] }
   0x7   :  { %654 = vmatprep.subr.bf16.mxu1 %v746_v4  ;;  %v72_v25 = vld [vmem:[%s1087_s1 + $0x128] sm:$0xff]  ;;  %v58_v27 = vld [vmem:[%s1087_s1 + $0xb8] sm:$0xff]  ;;  %v629_v28 = vpack.c.bf16 %v40_v23, %v39_v21  ;;  %v41_v30 = vld [vmem:[%s1087_s1 + $0x30] sm:$0xff] }
   0x8   :  { %v658_v29 = vpack.c.bf16 %v72_v25, %v71_v24  ;;  %v631_v31 = vpack.c.bf16 %v58_v27, %v57_v26  ;;  %v42_v32 = vld [vmem:[%s1087_s1 + $0x38] sm:$0xff]  ;;  %v73_v33 = vld [vmem:[%s1087_s1 + $0x130] sm:$0xff]  ;;  %v59_v35 = vld [vmem:[%s1087_s1 + $0xc0] sm:$0xff] }
   0x9   :  { %626 = vmatpush3.bf16.msra.mxu0 %v625_v17  ;;  %v74_v34 = vld [vmem:[%s1087_s1 + $0x138] sm:$0xff]  ;;  %v60_v36 = vld [vmem:[%s1087_s1 + $0xc8] sm:$0xff]  ;;  %v633_v37 = vpack.c.bf16 %v42_v32, %v41_v30  ;;  %v43_v39 = vld [vmem:[%s1087_s1 + $0x40] sm:$0xff] }
   0xa   :  { %656 = vmatpush1.bf16.msra.mxu1 %v655_v18  ;;  %628 = vmatprep.subr.bf16.mxu0 %v627_v22  ;;  %v661_v38 = vpack.c.bf16 %v74_v34, %v73_v33  ;;  %v635_v40 = vpack.c.bf16 %v60_v36, %v59_v35  ;;  %v44_v41 = vld [vmem:[%s1087_s1 + $0x48] sm:$0xff]  ;;  %v75_v42 = vld [vmem:[%s1087_s1 + $0x140] sm:$0xff]  ;;  %v61_v44 = vld [vmem:[%s1087_s1 + $0xd0] sm:$0xff] }
   0xb   :  { %657 = vmatprep.subr.bf16.mxu1 %v746_v4  ;;  %v76_v43 = vld [vmem:[%s1087_s1 + $0x148] sm:$0xff]  ;;  %v62_v45 = vld [vmem:[%s1087_s1 + $0xd8] sm:$0xff]  ;;  %v45_v46 = vld [vmem:[%s1087_s1 + $0x50] sm:$0xff]  ;;  %v637_v47 = vpack.c.bf16 %v44_v41, %v43_v39 }
   0xc   :  { %v664_v48 = vpack.c.bf16 %v76_v43, %v75_v42  ;;  %v46_v49 = vld [vmem:[%s1087_s1 + $0x58] sm:$0xff]  ;;  %v77_v50 = vld [vmem:[%s1087_s1 + $0x150] sm:$0xff]  ;;  %v33_v51 = vld [vmem:[%s1086_s0] sm:$0xff]  ;;  %v639_v52 = vpack.c.bf16 %v62_v45, %v61_v44 }
   0xd   :  { %630 = vmatpush3.bf16.msra.mxu0 %v629_v28  ;;  %v78_v53 = vld [vmem:[%s1087_s1 + $0x158] sm:$0xff]  ;;  %v94_v54 = vcombine.high %v33_v51, %v33_v51  ;;  %v34_v55 = vld [vmem:[%s1086_s0 + $0x8] sm:$0xff] }
   0xe   :  { %659 = vmatpush1.bf16.msra.mxu1 %v658_v29  ;;  %632 = vmatprep.subr.bf16.mxu0 %v631_v31 }
   0xf   :  { %660 = vmatprep.subr.bf16.mxu1 %v746_v4 }
  0x11   :  { %634 = vmatpush3.bf16.msra.mxu0 %v633_v37 }
  0x12   :  { %662 = vmatpush1.bf16.msra.mxu1 %v661_v38  ;;  %636 = vmatprep.subr.bf16.mxu0 %v635_v40 }
  0x13   :  { %663 = vmatprep.subr.bf16.mxu1 %v746_v4 }
  0x14   :  { %14 = vsyncpa [#allocation3], 0  ;;  %v63_v56 = vld [vmem:[%s1087_s1 + $0xe0] sm:$0xff]  ;;  %v64_v57 = vld [vmem:[%s1087_s1 + $0xe8] sm:$0xff]  ;;  %v95_v58 = vcombine.high %v34_v55, %v34_v55  ;;  %164 = vmatprep.mubr.f32.mxu0 %v94_v54  ;;  %vm97_vm0 = vcmask 130048   ;;  %v641_v59 = vpack.c.bf16 %v46_v49, %v45_v46  ;;  %v667_v60 = vpack.c.bf16 %v78_v53, %v77_v50  ;;  %s749_s17 = smov [#allocation2]  }
  0x15   :  { %638 = vmatpush3.bf16.msra.mxu0 %v637_v47  ;;  %v47_v61 = vld [vmem:[%s1087_s1 + $0x60] sm:$0xff]  ;;  %v643_v62 = vpack.c.bf16 %v64_v57, %v63_v56  ;;  %v48_v63 = vld [vmem:[%s1087_s1 + $0x68] sm:$0xff]  ;;  %v65_v2 = vld [vmem:[%s1087_s1 + $0xf0] sm:$0xff]  ;;  %v747_v38 = vmov 0.0   ;;  %vm748_vm1 = vmmov 0   ;;  %vm241_vm2 = vcmask 977920  }
  0x16   :  { %665 = vmatpush1.bf16.msra.mxu1 %v664_v48  ;;  %640 = vmatprep.subr.bf16.mxu0 %v639_v52  ;;  %v79_v0 = vld [vmem:[%s1087_s1 + $0x160] sm:$0xff]  ;;  %v80_v1 = vld [vmem:[%s1087_s1 + $0x168] sm:$0xff]  ;;  %v66_v3 = vld [vmem:[%s1087_s1 + $0xf8] sm:$0xff]  ;;  %v645_v5 = vpack.c.bf16 %v48_v63, %v47_v61  ;;  %vm302_vm3 = vcmask 982016   ;;  %vm399_vm4 = vcmask 1043456   ;;  %vm395_vm5 = vcmask 687104  }
  0x17   :  { %666 = vmatprep.subr.bf16.mxu1 %v746_v4  ;;  %490 = vmatprep.mubr.msk.f32.mxu1 %vm97_vm0, %v95_v58  ;;  %v670_v6 = vpack.c.bf16 %v80_v1, %v79_v0  ;;  %v49_v7 = vld [vmem:[%s1087_s1 + $0x70] sm:$0xff]  ;;  %v647_v8 = vpack.c.bf16 %v66_v3, %v65_v2  ;;  %v50_v9 = vld [vmem:[%s1087_s1 + $0x78] sm:$0xff]  ;;  %v83_v14 = vld [vmem:[%s1087_s1 + $0x180] sm:$0xff]  ;;  %vm473_vm6 = vcmask 76800  }
  0x18   :  { %v81_v10 = vld [vmem:[%s1087_s1 + $0x170] sm:$0xff]  ;;  %v82_v11 = vld [vmem:[%s1087_s1 + $0x178] sm:$0xff]  ;;  %v649_v12 = vpack.c.bf16 %v50_v9, %v49_v7  ;;  %v84_v15 = vld [vmem:[%s1087_s1 + $0x188] sm:$0xff] }
  0x19   :  { %642 = vmatpush3.bf16.msra.mxu0 %v641_v59  ;;  %v673_v13 = vpack.c.bf16 %v82_v11, %v81_v10  ;;  %v676_v16 = vpack.c.bf16 %v84_v15, %v83_v14  ;;  %v280_v17 = vld [vmem:[%s1091_s5] sm:$0xff]  ;;  %v281_v18 = vld [vmem:[%s1091_s5 + $0x8] sm:$0xff]  ;;  %v282_v20 = vld [vmem:[%s1091_s5 + $0x10] sm:$0xff] }
  0x1a   :  { %668 = vmatpush1.bf16.msra.mxu1 %v667_v60  ;;  %644 = vmatprep.subr.bf16.mxu0 %v643_v62  ;;  %v679_v19 = vpack.c.bf16 %v281_v18, %v280_v17  ;;  %v283_v21 = vld [vmem:[%s1091_s5 + $0x18] sm:$0xff]  ;;  %v284_v23 = vld [vmem:[%s1091_s5 + $0x20] sm:$0xff]  ;;  %v285_v24 = vld [vmem:[%s1091_s5 + $0x28] sm:$0xff] }
  0x1b   :  { %669 = vmatprep.subr.bf16.mxu1 %v746_v4  ;;  %v682_v22 = vpack.c.bf16 %v283_v21, %v282_v20  ;;  %v685_v25 = vpack.c.bf16 %v285_v24, %v284_v23  ;;  %v286_v26 = vld [vmem:[%s1091_s5 + $0x30] sm:$0xff]  ;;  %v287_v27 = vld [vmem:[%s1091_s5 + $0x38] sm:$0xff]  ;;  %v288_v29 = vld [vmem:[%s1091_s5 + $0x40] sm:$0xff] }
  0x1c   :  { %v688_v28 = vpack.c.bf16 %v287_v27, %v286_v26  ;;  %v289_v30 = vld [vmem:[%s1091_s5 + $0x48] sm:$0xff]  ;;  %v290_v32 = vld [vmem:[%s1091_s5 + $0x50] sm:$0xff]  ;;  %v291_v33 = vld [vmem:[%s1091_s5 + $0x58] sm:$0xff] }
  0x1d   :  { %646 = vmatpush3.bf16.msra.mxu0 %v645_v5  ;;  %v691_v31 = vpack.c.bf16 %v289_v30, %v288_v29  ;;  %v694_v34 = vpack.c.bf16 %v291_v33, %v290_v32  ;;  %v292_v35 = vld [vmem:[%s1091_s5 + $0x60] sm:$0xff]  ;;  %v293_v36 = vld [vmem:[%s1091_s5 + $0x68] sm:$0xff]  ;;  %v294_v39 = vld [vmem:[%s1091_s5 + $0x70] sm:$0xff]  ;;  %s481_s5 = sshll.u32 %s749_s17, 4  ;;  %s482_s5 = int_to_ptr.vmem [resolvable:$true] %s481_s5 }
  0x1e   :  { %671 = vmatpush1.bf16.msra.mxu1 %v670_v6  ;;  %648 = vmatprep.subr.bf16.mxu0 %v647_v8  ;;  %v697_v37 = vpack.c.bf16 %v293_v36, %v292_v35  ;;  %v377_v40 = vld [vmem:[%s1093_s7] sm:$0xff]  ;;  %v378_v41 = vld [vmem:[%s1093_s7 + $0x8] sm:$0xff]  ;;  %v379_v42 = vld [vmem:[%s1093_s7 + $0x10] sm:$0xff]  ;;  %p727_p1 = scmp.lt.s32.totalorder %s482_s5, %s482_s5 }
  0x1f   :  { %672 = vmatprep.subr.bf16.mxu1 %v746_v4  ;;  %v700_v43 = vpack.c.bf16 %v378_v41, %v377_v40  ;;  %v380_v44 = vld [vmem:[%s1093_s7 + $0x18] sm:$0xff]  ;;  %v381_v46 = vld [vmem:[%s1093_s7 + $0x20] sm:$0xff]  ;;  %v382_v47 = vld [vmem:[%s1093_s7 + $0x28] sm:$0xff] }
  0x20   :  { %v703_v45 = vpack.c.bf16 %v380_v44, %v379_v42  ;;  %v706_v48 = vpack.c.bf16 %v382_v47, %v381_v46  ;;  %v383_v49 = vld [vmem:[%s1093_s7 + $0x30] sm:$0xff]  ;;  %v384_v50 = vld [vmem:[%s1093_s7 + $0x38] sm:$0xff]  ;;  %v489_v54 = vld [vmem:[%s1088_s2] ss:$0 sm:$0xff] }
  0x21   :  { %650 = vmatpush3.bf16.msra.mxu0 %v649_v12  ;;  %v491_v17 = vld [vmem:[%s1089_s3] ss:$0 sm:$0xff]  ;;  %v386_v23 = vld [vmem:[%s1093_s7 + $0x48] sm:$0xff] }
  0x22   :  { %674 = vmatpush1.bf16.msra.mxu1 %v673_v13  ;;  %678 = vmatprep.subr.bf16.mxu0 %v746_v4  ;;  %v493_v26 = vld [vmem:[%s1092_s6] ss:$0 sm:$0xff] }
  0x23   :  { %675 = vmatprep.subr.bf16.mxu1 %v746_v4 }
  0x24   :  { %165 = vmatmul.mubr.f32.vlgmr.msra.gmra.mrb[0].mxu0 %v33_v51  ;;  %v709_v51 = vpack.c.bf16 %v384_v50, %v383_v49 }
  0x25   :  { %680 = vmatpush3.bf16.msra.mxu0 %v679_v19  ;;  %591 = vmatprep.mubr.msk.f32.mxu0 %vm748_vm1, %v747_v38  ;;  %v492_v19 = vld [vmem:[%s1090_s4] ss:$0 sm:$0xff] }
  0x26   :  { %677 = vmatpush1.bf16.msra.mxu1 %v676_v16  ;;  %681 = vmatprep.subr.bf16.mxu0 %v746_v4 }
  0x27   :  { %699 = vmatprep.subr.bf16.mxu1 %v746_v4 }
  0x29   :  { %235 = vmatmul.mubr.f32.vlgmr.msra.gmra.mrb[0].mxu1 %v34_v55  ;;  %683 = vmatpush3.bf16.msra.mxu0 %v682_v22  ;;  %v385_v22 = vld [vmem:[%s1093_s7 + $0x40] sm:$0xff] }
  0x2a   :  { %684 = vmatprep.subr.bf16.mxu0 %v746_v4  ;;  %616 = vmatprep.mubr.msk.f32.mxu1 %vm748_vm1, %v747_v38  ;;  %v712_v24 = vpack.c.bf16 %v386_v23, %v385_v22 }
  0x2b   :  { %701 = vmatpush3.bf16.msra.mxu1 %v700_v43 }
  0x2c   :  { %702 = vmatprep.subr.bf16.mxu1 %v746_v4 }
  0x2d   :  { %686 = vmatpush3.bf16.msra.mxu0 %v685_v25  ;;  %v387_v25 = vld [vmem:[%s1093_s7 + $0x50] sm:$0xf]  ;;  %s722_s7 = scalar_lea.vmem %s482_s5, 64 }
  0x2e   :  { %687 = vmatprep.subr.bf16.mxu0 %v746_v4  ;;  %p723_p0 = scmp.ne.s32.totalorder %s482_s5, %s722_s7  ;;  %p728_p2 = scmp.lt.s32.totalorder %s722_s7, %s722_s7 }
  0x2f   :  { %704 = vmatpush3.bf16.msra.mxu1 %v703_v45 }
  0x30   :  { %705 = vmatprep.subr.bf16.mxu1 %v746_v4  ;;  %p729_p3 = por %p728_p2, %p727_p1 }
  0x31   :  { %689 = vmatpush3.bf16.msra.mxu0 %v688_v28 }
  0x32   :  { %690 = vmatprep.subr.bf16.mxu0 %v746_v4  ;;  %p730_p4 = pnand %p729_p3, %p723_p0 }
  0x33   :  { %707 = vmatpush3.bf16.msra.mxu1 %v706_v48 }
  0x34   :  { %708 = vmatprep.subr.bf16.mxu1 %v746_v4 }
  0x35   :  { %692 = vmatpush3.bf16.msra.mxu0 %v691_v31  ;;  %v495_v31 = vld [vmem:[%s1094_s8] ss:$0 sm:$0xff] }
  0x36   :  { %693 = vmatprep.subr.bf16.mxu0 %v746_v4 }
  0x37   :  { %710 = vmatpush3.bf16.msra.mxu1 %v709_v51 }
  0x38   :  { %711 = vmatprep.subr.bf16.mxu1 %v746_v4 }
  0x39   :  { %695 = vmatpush3.bf16.msra.mxu0 %v694_v34 }
  0x3a   :  { %696 = vmatprep.subr.bf16.mxu0 %v746_v4 }
  0x3b   :  { %713 = vmatpush3.bf16.msra.mxu1 %v712_v24 }
  0x3c   :  { %614 = vmatprep.subr.mxu1 %v747_v38 }
  0x3d   :  { %698 = vmatpush3.bf16.msra.mxu0 %v697_v37 }
  0x3e   :  { %589 = vmatprep.subr.mxu0 %v747_v38 }
  0x3f   :  { %615 = vmatpush3.msk.msra.mxu1 %vm399_vm4, %v387_v25 }
  0x41   :  { %590 = vmatpush3.msra.mxu0 %v294_v39 }
  0xf7   :  { %v530_v52 = vpop.f32.mrb[0].mxu0 }
  0xf8   :  { %v531_v53 = vpop.f32.mrb[1].mxu0 }
  0xf9   :  { %v532_v55 = vadd.f32 %v531_v53, %v530_v52 }
  0xfb   :  { %v167_v56 = vadd.f32 %v532_v55, %v489_v54 }
  0xfc   :  { %v236_v57 = vpop.f32.mrb[0].mxu1 }
  0xfd   :  { %v238_v58 = vpop.f32.mrb[1].mxu1  ;;  %v237_v59 = vadd.f32 %v236_v57, %v167_v56 }
  0xff   :  { %v240_v60 = vmax.f32 %v237_v59, 0.0 }
 0x101   :  { %v242_v61 = vsel %vm241_vm2, %v240_v60, 0.0 }
 0x102   :  { %v243_v62 = vrot.slane %v242_v61, 4 }
 0x104   :  { %v244_v63 = vadd.f32 %v243_v62, %v242_v61 }
 0x106   :  { %v245_v0 = vrot.slane %v244_v63, 2 }
 0x108   :  { %v246_v1 = vadd.f32 %v245_v0, %v244_v63 }
 0x10a   :  { %v247_v2 = vrot.slane %v246_v1, 1 }
 0x10c   :  { %v248_v4 = vadd.f32 %v247_v2, %v246_v1 }
 0x10e   :  { %v250_v3 = vmul.f32 0.25, %v248_v4 }
 0x110   :  { %v251_v5 = vsub.f32 %v240_v60, %v250_v3 }
 0x112   :  { %v252_v6 = vmul.f32 %v251_v5, %v251_v5 }
 0x114   :  { %v253_v7 = vsel %vm241_vm2, %v252_v6, 0.0 }
 0x115   :  { %v254_v8 = vrot.slane %v253_v7, 4 }
 0x117   :  { %v255_v9 = vadd.f32 %v254_v8, %v253_v7 }
 0x119   :  { %v256_v10 = vrot.slane %v255_v9, 2 }
 0x11b   :  { %v257_v11 = vadd.f32 %v256_v10, %v255_v9 }
 0x11d   :  { %v258_v12 = vrot.slane %v257_v11, 1 }
 0x11f   :  { %v259_v13 = vadd.f32 %v258_v12, %v257_v11 }
 0x121   :  { %v260_v14 = vmul.f32 0.33333334, %v259_v13 }
 0x123   :  { %v262_v15 = vadd.f32 1e-05, %v260_v14 }
 0x125   :  { %720 = vrsqrt.f32 %v262_v15 }
 0x12f   :  { %v721_v16 = vpop.eup %720 }
 0x130   :  { %v264_v18 = vmul.f32 %v721_v16, %v251_v5 }
 0x132   :  { %v271_v20 = vmul.f32 %v491_v17, %v264_v18 }
 0x134   :  { %v279_v21 = vadd.f32 %v492_v19, %v271_v20 }
 0x136   :  { %592 = vmatmul.mubr.msk.f32.vlgmr.msra.gmra.mrb[2].mxu0 %vm302_vm3, %v279_v21 }
 0x209   :  { %v372_v27 = vpop.f32.mrb[2].mxu0 }
 0x20a   :  { %v373_v28 = vadd.f32 %v493_v26, %v372_v27  ;;  %v593_v29 = vpop.f32.mrb[3].mxu0 }
 0x20c   :  { %v376_v30 = vmax.f32 %v373_v28, 0.0 }
 0x20e   :  { %617 = vmatmul.mubr.msk.f32.vlgmr.msra.gmra.mrb[2].mxu1 %vm395_vm5, %v376_v30 }
 0x2e1   :  { %v469_v32 = vpop.f32.mrb[2].mxu1 }
 0x2e2   :  { %v470_v33 = vadd.f32 %v495_v31, %v469_v32  ;;  %v618_v34 = vpop.f32.mrb[3].mxu1 }
 0x2e4   :  { %474 = vst.msk [vmem:[#allocation2] sm:$0xf] %vm473_vm6, %v470_v33 }
 0x2e5   :  { %733 = shalt.err (!%p730_p4)
}
 0x2e6   :  { %s734_s19 = scalar_lea.hbm %s1095_s9, 64 }
 0x2e7   :  { %p735_p5 = scmp.ne.s32.totalorder %s1095_s9, %s734_s19  ;;  %p738_p6 = scmp.lt.u32.totalorder %s734_s19, %s1095_s9 }
 0x2e9   :  { %p740_p7 = pnand %p738_p6, %p735_p5 }
 0x2eb   :  { %743 = shalt.err (!%p740_p7)
}
 0x2ec   :  { %484 = dma.vmem_to_hbm [thread:$0]  %s482_s5, 64, %s1095_s9, [#allocation3]  }
 0x2ed   :  { %744 = dma.done.wait [#allocation3], 64  }
 0x2ee   :  { %745 = vsyncadd [#allocation3], 4294967232 }
 0x2ef   :  { %488 = vsyncpa [#allocation3], 1 }

</bundles_post_ra>
